<compile_context>
chip_gen: v5e
topology: v5e:2x2
jax: 0.10.0
libtpu: 0.0.40
codegen_flags: <defaults>
</compile_context>

<pallas_src>
import numpy as np

import jax
import jax.numpy as jnp
from jax.experimental import pallas as pl
from jax.experimental.pallas import tpu as pltpu

_MM_DTYPE = jnp.float32   # flip to bfloat16 on v6e/v7x to halve weight DMA
_D = 64                   # conv_dim

# stride-2 conv tap di -> (3x3 window offset over the space-to-depth image, parity)
_S2D = ((0, 1), (1, 0), (1, 1), (2, 0))


# ---------------------------------------------------------------------------
# Static numpy index tables (built once at import).
# ---------------------------------------------------------------------------
def _conv1_patch_idx():
    """im2col gather for conv1 (4x4, s=2, p=1) on the padded 18x18 input.

    Patch row r = blk*16 + u*4 + v  with blk = 2*rp + cp  corresponds to conv1
    output pixel (2u+rp, 2v+cp); this row order makes the space-to-depth image
    a pure slice+concat inside the kernel.
    """
    idx = np.zeros((64, 16), np.int32)
    for blk in range(4):
        rp, cp = blk // 2, blk % 2
        for u in range(4):
            for v in range(4):
                r = blk * 16 + u * 4 + v
                i, j = 2 * u + rp, 2 * v + cp
                for di in range(4):
                    for dj in range(4):
                        idx[r, di * 4 + dj] = (2 * i + di) * 18 + (2 * j + dj)
    return idx


def _conv2_kidx():
    """conv2 (4x4,s2) as a 3x3 s1 conv over the s2d image: tap -> 4x4 kernel idx."""
    k = np.full((3, 3, 2, 2), 16, np.int32)        # 16 == "zero" row
    for di in range(4):
        tr, rp = _S2D[di]
        for dj in range(4):
            tc, cp = _S2D[dj]
            k[tr, tc, rp, cp] = di * 4 + dj
    return k


def _deconv1_kidx():
    """deconv1 sub-pixel phases: (3x3 tap, output phase a,b) -> 4x4 kernel idx."""
    k = np.full((3, 3, 2, 2), 16, np.int32)
    for a in range(2):
        for tr in (a, a + 1):
            kr = a - 2 * (tr - 1) + 1
            for b in range(2):
                for tc in (b, b + 1):
                    kc = b - 2 * (tc - 1) + 1
                    k[tr, tc, a, b] = kr * 4 + kc
    return k


def _deconv2_kidx():
    """deconv2 banded weights: (row parity, row tap t, input col j, out col s)."""
    krt = ((3, 1), (2, 0))                          # [row parity][t] -> kernel row
    colt = (((-1, 3), (0, 1)), ((0, 2), (1, 0)))    # [col parity] -> ((dj, kc), ...)
    k = np.full((2, 2, 8, 16), 16, np.int32)
    for rr in range(2):
        for t in range(2):
            kr = krt[rr][t]
            for q in range(8):
                for rc in range(2):
                    s = 2 * q + rc
                    for dj, kc in colt[rc]:
                        j = q + dj
                        if 0 <= j < 8:
                            k[rr, t, j, s] = kr * 4 + kc
    return k


_C1_IDX = _conv1_patch_idx()
_C2_KIDX = _conv2_kidx()
_D1_KIDX = _deconv1_kidx()
_D2_KIDX = _deconv2_kidx()


# ---------------------------------------------------------------------------
# Weight packing (thin XLA glue, runs once per forward).
# ---------------------------------------------------------------------------
def _prepare_params(params, dtype):
    d = _D
    # conv1: (d, 1, 4, 4) -> (16, d), rows di*4+dj
    w1m = jnp.transpose(params["conv1"], (2, 3, 1, 0)).reshape(16, d).astype(dtype)

    # conv2 (2d, d, 4, 4) -> 3x3 s1 conv over the s2d image: (9*4d, 2d)
    w2 = params["conv2"]
    w2r = jnp.transpose(w2, (1, 2, 3, 0)).reshape(d, 16, 2 * d)            # (c, ktap, co)
    w2p = jnp.concatenate([w2r, jnp.zeros((d, 1, 2 * d), w2r.dtype)], axis=1)
    w2g = w2p[:, _C2_KIDX, :]                                              # (c,3,3,2,2,co)
    w2m = jnp.transpose(w2g, (1, 2, 3, 4, 0, 5)).reshape(36 * d, 2 * d).astype(dtype)

    # conv3 / conv4: (2d, 2d, 3, 3) -> (9*2d, 2d)
    w3m = jnp.transpose(params["conv3"], (2, 3, 1, 0)).reshape(18 * d, 2 * d).astype(dtype)
    w4m = jnp.transpose(params["conv4"], (2, 3, 1, 0)).reshape(18 * d, 2 * d).astype(dtype)

    # deconv1 (2d, d, 4, 4): 4 sub-pixel phases as extra output columns (9*2d, 4d)
    w5 = params["deconv1"]
    w5r = jnp.transpose(w5, (2, 3, 0, 1)).reshape(16, 2 * d, d)            # (ktap, c, co)
    w5p = jnp.concatenate([w5r, jnp.zeros((1, 2 * d, d), w5r.dtype)], axis=0)
    w5g = w5p[_D1_KIDX]                                                    # (3,3,2,2,c,co)
    w5m = jnp.transpose(w5g, (0, 1, 4, 2, 3, 5)).reshape(18 * d, 4 * d).astype(dtype)

    # deconv2 (d, 1, 4, 4): banded per-output-row-parity matrices (2, 16*d, 16)
    w6 = params["deconv2"]
    w6r = jnp.transpose(w6[:, 0], (1, 2, 0)).reshape(16, d)                # (ktap, c)
    w6p = jnp.concatenate([w6r, jnp.zeros((1, d), w6r.dtype)], axis=0)
    w6g = w6p[_D2_KIDX]                                                    # (2,2,8,16,c)
    w6m = jnp.transpose(w6g, (0, 1, 2, 4, 3)).reshape(2, 16 * d, 16).astype(dtype)
    return w1m, w2m, w3m, w4m, w5m, w6m


# ---------------------------------------------------------------------------
# The fused Pallas kernel (one sample per grid step).
# ---------------------------------------------------------------------------
def _g21_kernel(p1_ref, w1_ref, w2_ref, w3_ref, w4_ref, w5_ref, w6_ref,
                o_ref, h_ref):
    f32 = jnp.float32
    eps, slope = 1e-5, 0.05

    def mm(a, b):
        return jnp.dot(a.astype(b.dtype), b, preferred_element_type=f32)

    def lrelu(y):
        return jnp.where(y >= 0, y, slope * y)

    def inorm_lrelu(y):
        m = jnp.mean(y, axis=0, keepdims=True)
        v = jnp.maximum(jnp.mean(y * y, axis=0, keepdims=True) - m * m, 0.0)
        return lrelu((y - m) * jax.lax.rsqrt(v + eps))

    def shift_rows(x, k):
        # result[p] = x[p + k], zero-filled outside [0, rows)
        n = x.shape[0]
        if k == 0:
            return x
        z = jnp.zeros((abs(k), x.shape[1]), x.dtype)
        if k > 0:
            return jnp.concatenate([x[k:, :], z], axis=0)
        return jnp.concatenate([z, x[:n + k, :]], axis=0)

    def patches3x3(img, w_img):
        # img: (h*w_img, C) row-major; returns (h*w_img, 9*C) pad-1 3x3 patches.
        nr, nc = img.shape
        col = jax.lax.broadcasted_iota(jnp.int32, (nr, nc), 0) % w_img
        taps = []
        for dr in (-1, 0, 1):
            for dc in (-1, 0, 1):
                t = shift_rows(img, dr * w_img + dc)
                if dc == -1:
                    t = jnp.where(col >= 1, t, 0.0)
                elif dc == 1:
                    t = jnp.where(col < w_img - 1, t, 0.0)
                taps.append(t)
        return jnp.concatenate(taps, axis=1)

    # ---- layer 1: conv 4x4 s2 p1 (im2col patches precomputed) + IN + leaky ----
    y1 = inorm_lrelu(mm(p1_ref[0], w1_ref[...]))                    # (64, 64)

    # space-to-depth of conv1 output (row order was (parity block, u, v))
    s2d = jnp.concatenate([y1[0:16, :], y1[16:32, :],
                           y1[32:48, :], y1[48:64, :]], axis=1)     # (16, 256)

    # ---- layer 2: conv 4x4 s2 p1 == 3x3 s1 conv over the s2d image ------------
    y2 = inorm_lrelu(mm(patches3x3(s2d, 4), w2_ref[...]))           # (16, 128)
    # ---- layers 3 & 4: conv 3x3 s1 p1 ----------------------------------------
    y3 = inorm_lrelu(mm(patches3x3(y2, 4), w3_ref[...]))            # (16, 128)
    y4 = inorm_lrelu(mm(patches3x3(y3, 4), w4_ref[...]))            # (16, 128)

    # ---- layer 5: deconv 4x4 s2 p1, 4 sub-pixel phases as output columns ------
    y5r = mm(patches3x3(y4, 4), w5_ref[...])                        # (16, 256)
    cs = jnp.sum(y5r, axis=0, keepdims=True)
    cq = jnp.sum(y5r * y5r, axis=0, keepdims=True)
    mean = (cs[:, 0:64] + cs[:, 64:128] + cs[:, 128:192] + cs[:, 192:256]) / 64.0
    msq = (cq[:, 0:64] + cq[:, 64:128] + cq[:, 128:192] + cq[:, 192:256]) / 64.0
    inv = jax.lax.rsqrt(jnp.maximum(msq - mean * mean, 0.0) + eps)
    mean4 = jnp.concatenate([mean, mean, mean, mean], axis=1)
    inv4 = jnp.concatenate([inv, inv, inv, inv], axis=1)
    y5 = lrelu((y5r - mean4) * inv4)                                # (16, 256)

    # relayout deconv1 output to (8 image rows, (col, chan) lanes) via scratch
    for u in range(4):
        for v in range(4):
            src = y5[u * 4 + v:u * 4 + v + 1, :]                    # (1, 256)
            h_ref[2 * u:2 * u + 1, v * 128:v * 128 + 128] = src[:, 0:128]
            h_ref[2 * u + 1:2 * u + 2, v * 128:v * 128 + 128] = src[:, 128:256]
    h8 = h_ref[...]                                                 # (8, 512)

    # ---- layer 6: deconv 4x4 s2 p1 -> 1 ch, banded matmul per row parity ------
    zrow = jnp.zeros((1, 512), f32)
    hm1 = jnp.concatenate([zrow, h8[0:7, :]], axis=0)               # H[p-1]
    hp1 = jnp.concatenate([h8[1:8, :], zrow], axis=0)               # H[p+1]
    out0 = jnp.tanh(mm(jnp.concatenate([hm1, h8], axis=1), w6_ref[0]))   # (8, 16)
    out1 = jnp.tanh(mm(jnp.concatenate([h8, hp1], axis=1), w6_ref[1]))   # (8, 16)
    o_ref[0, 0] = out0
    o_ref[0, 1] = out1


# ---------------------------------------------------------------------------
# Forward wrapper.
# ---------------------------------------------------------------------------
def g21_forward(x_nchw, params):
    n = x_nchw.shape[0]
    d = _D
    # conv1 im2col on the raw 16x16 input (single cheap gather in the wrapper)
    xp = jnp.pad(x_nchw[:, 0], ((0, 0), (1, 1), (1, 1)))            # (N, 18, 18)
    p1 = xp.reshape(n, 18 * 18)[:, _C1_IDX].astype(_MM_DTYPE)       # (N, 64, 16)
    w1m, w2m, w3m, w4m, w5m, w6m = _prepare_params(params, _MM_DTYPE)

    out = pl.pallas_call(
        _g21_kernel,
        out_shape=jax.ShapeDtypeStruct((n, 2, 8, 16), jnp.float32),
        grid=(n,),
        in_specs=[
            pl.BlockSpec((1, 64, 16), lambda b: (b, 0, 0)),
            pl.BlockSpec((16, d), lambda b: (0, 0)),
            pl.BlockSpec((36 * d, 2 * d), lambda b: (0, 0)),
            pl.BlockSpec((18 * d, 2 * d), lambda b: (0, 0)),
            pl.BlockSpec((18 * d, 2 * d), lambda b: (0, 0)),
            pl.BlockSpec((18 * d, 4 * d), lambda b: (0, 0)),
            pl.BlockSpec((2, 16 * d, 16), lambda b: (0, 0, 0)),
        ],
        out_specs=pl.BlockSpec((1, 2, 8, 16), lambda b: (b, 0, 0, 0)),
        scratch_shapes=[pltpu.VMEM((8, 8 * d), jnp.float32)],
        compiler_params=pltpu.CompilerParams(dimension_semantics=("parallel",)),
    )(p1, w1m, w2m, w3m, w4m, w5m, w6m)

    # interleave the two row-parity planes: out[b, rho, p, s] -> img[b, 2p+rho, s]
    return jnp.transpose(out, (0, 2, 1, 3)).reshape(n, 1, 16, 16)


# ---------------------------------------------------------------------------
# Pure-XLA reference (sanity check) and param init.
# ---------------------------------------------------------------------------
def _reference_forward(x, params):
    hi = jax.lax.Precision.HIGHEST

    def conv(y, w, stride, pad):
        return jax.lax.conv_general_dilated(
            y, w, (stride, stride), [(pad, pad), (pad, pad)],
            dimension_numbers=("NCHW", "OIHW", "NCHW"), precision=hi)

    def deconv(y, w, stride, pad):
        wf = jnp.transpose(w, (1, 0, 2, 3))[:, :, ::-1, ::-1]
        return jax.lax.conv_general_dilated(
            y, wf, (1, 1), [(3 - pad, 3 - pad)] * 2, lhs_dilation=(stride, stride),
            dimension_numbers=("NCHW", "OIHW", "NCHW"), precision=hi)

    def inorm(y):
        m = y.mean(axis=(2, 3), keepdims=True)
        v = y.var(axis=(2, 3), keepdims=True)
        return (y - m) / jnp.sqrt(v + 1e-5)

    def lrelu(y):
        return jnp.where(y >= 0, y, 0.05 * y)

    out = lrelu(inorm(conv(x, params["conv1"], 2, 1)))
    out = lrelu(inorm(conv(out, params["conv2"], 2, 1)))
    out = lrelu(inorm(conv(out, params["conv3"], 1, 1)))
    out = lrelu(inorm(conv(out, params["conv4"], 1, 1)))
    out = lrelu(inorm(deconv(out, params["deconv1"], 2, 1)))
    return jnp.tanh(deconv(out, params["deconv2"], 2, 1))


def init_params(key, conv_dim=64):
    ks = jax.random.split(key, 6)

    def nrm(k, shape, fan_in):
        return jax.random.normal(k, shape, jnp.float32) / jnp.sqrt(fan_in)

    d = conv_dim
    return {
        # Conv2d weights: (Cout, Cin, kh, kw)
        "conv1":   nrm(ks[0], (d, 1, 4, 4), 16),
        "conv2":   nrm(ks[1], (2 * d, d, 4, 4), d * 16),
        "conv3":   nrm(ks[2], (2 * d, 2 * d, 3, 3), 2 * d * 9),
        "conv4":   nrm(ks[3], (2 * d, 2 * d, 3, 3), 2 * d * 9),
        # ConvTranspose2d weights: (Cin, Cout, kh, kw)
        "deconv1": nrm(ks[4], (2 * d, d, 4, 4), 2 * d * 16),
        "deconv2": nrm(ks[5], (d, 1, 4, 4), d * 16),
    }


if __name__ == "__main__":
    key = jax.random.PRNGKey(0)
    k_x, k_p = jax.random.split(key)
    x = jax.random.normal(k_x, (2, 1, 16, 16), jnp.float32)
    params = init_params(k_p, conv_dim=64)

    fwd = jax.jit(g21_forward)
    out = jax.block_until_ready(fwd(x, params))
    assert out.shape == (2, 1, 16, 16), out.shape
    assert out.dtype == jnp.float32

    ref = jax.block_until_ready(jax.jit(_reference_forward)(x, params))
    np.testing.assert_allclose(np.asarray(out), np.asarray(ref), atol=5e-2, rtol=0)

    print("KERNEL_OK")
</pallas_src>

<mosaic_0001>
module attributes {stable_mosaic.version = 11 : i64} {
  func.func @_g21_kernel(%arg0: i32, %arg1: memref<1x64x16xf32, #tpu.memory_space<vmem>>, %arg2: memref<16x64xf32, #tpu.memory_space<vmem>>, %arg3: memref<2304x128xf32, #tpu.memory_space<vmem>>, %arg4: memref<1152x128xf32, #tpu.memory_space<vmem>>, %arg5: memref<1152x128xf32, #tpu.memory_space<vmem>>, %arg6: memref<1152x256xf32, #tpu.memory_space<vmem>>, %arg7: memref<2x1024x16xf32, #tpu.memory_space<vmem>>, %arg8: memref<1x2x8x16xf32, #tpu.memory_space<vmem>>, %arg9: memref<8x512xf32, #tpu.memory_space<vmem>>) attributes {dimension_semantics = [#tpu.dimension_semantics<parallel>], iteration_bounds = array<i64: 2>, scalar_prefetch = 0 : i64, scratch_operands = 1 : i64, tpu.core_type = #tpu.core_type<tc>, window_params = [{transform_indices = @transform_0, window_bounds = array<i64: 1, 64, 16>}, {pipeline_mode = #tpu.pipeline_mode<synchronous>, transform_indices = @transform_1, window_bounds = array<i64: 16, 64>}, {pipeline_mode = #tpu.pipeline_mode<synchronous>, transform_indices = @transform_2, window_bounds = array<i64: 2304, 128>}, {pipeline_mode = #tpu.pipeline_mode<synchronous>, transform_indices = @transform_3, window_bounds = array<i64: 1152, 128>}, {pipeline_mode = #tpu.pipeline_mode<synchronous>, transform_indices = @transform_4, window_bounds = array<i64: 1152, 128>}, {pipeline_mode = #tpu.pipeline_mode<synchronous>, transform_indices = @transform_5, window_bounds = array<i64: 1152, 256>}, {pipeline_mode = #tpu.pipeline_mode<synchronous>, transform_indices = @transform_6, window_bounds = array<i64: 2, 1024, 16>}, {transform_indices = @transform_7, window_bounds = array<i64: 1, 2, 8, 16>}]} {
    %c0 = arith.constant 0 : index
    %c0_0 = arith.constant 0 : index
    %c0_1 = arith.constant 0 : index
    %0 = vector.load %arg1[%c0, %c0_0, %c0_1] : memref<1x64x16xf32, #tpu.memory_space<vmem>>, vector<1x64x16xf32>
    %1 = vector.shape_cast %0 : vector<1x64x16xf32> to vector<64x16xf32>
    %c0_2 = arith.constant 0 : index
    %c0_3 = arith.constant 0 : index
    %2 = vector.load %arg2[%c0_2, %c0_3] : memref<16x64xf32, #tpu.memory_space<vmem>>, vector<16x64xf32>
    %cst = arith.constant dense<0.000000e+00> : vector<64x64xf32>
    %3 = tpu.matmul %1, %2, %cst {dimension_numbers = #tpu.dot_dimension_numbers<[1], [0], [0], [1], [0, 0, 1, 1], [], []>} : vector<64x16xf32>, vector<16x64xf32>, vector<64x64xf32> -> vector<64x64xf32>
    %cst_4 = arith.constant dense<0.000000e+00> : vector<64xf32>
    %4 = vector.multi_reduction <add>, %3, %cst_4 [0] : vector<64x64xf32> to vector<64xf32>
    %5 = vector.shape_cast %4 : vector<64xf32> to vector<1x64xf32>
    %cst_5 = arith.constant 6.400000e+01 : f32
    %6 = vector.broadcast %cst_5 : f32 to vector<1x64xf32>
    %7 = arith.divf %5, %6 : vector<1x64xf32>
    %8 = arith.mulf %3, %3 : vector<64x64xf32>
    %cst_6 = arith.constant dense<0.000000e+00> : vector<64xf32>
    %9 = vector.multi_reduction <add>, %8, %cst_6 [0] : vector<64x64xf32> to vector<64xf32>
    %10 = vector.shape_cast %9 : vector<64xf32> to vector<1x64xf32>
    %cst_7 = arith.constant 6.400000e+01 : f32
    %11 = vector.broadcast %cst_7 : f32 to vector<1x64xf32>
    %12 = arith.divf %10, %11 : vector<1x64xf32>
    %13 = arith.mulf %7, %7 : vector<1x64xf32>
    %14 = arith.subf %12, %13 : vector<1x64xf32>
    %cst_8 = arith.constant 0.000000e+00 : f32
    %15 = vector.broadcast %cst_8 : f32 to vector<1x64xf32>
    %16 = arith.maximumf %14, %15 : vector<1x64xf32>
    %17 = vector.broadcast %7 : vector<1x64xf32> to vector<64x64xf32>
    %18 = arith.subf %3, %17 : vector<64x64xf32>
    %cst_9 = arith.constant 9.99999974E-6 : f32
    %19 = vector.broadcast %cst_9 : f32 to vector<1x64xf32>
    %20 = arith.addf %16, %19 : vector<1x64xf32>
    %21 = math.rsqrt %20 : vector<1x64xf32>
    %22 = vector.broadcast %21 : vector<1x64xf32> to vector<64x64xf32>
    %23 = arith.mulf %18, %22 : vector<64x64xf32>
    %cst_10 = arith.constant 0.000000e+00 : f32
    %24 = vector.broadcast %cst_10 : f32 to vector<64x64xf32>
    %25 = arith.cmpf oge, %23, %24 : vector<64x64xf32>
    %cst_11 = arith.constant 5.000000e-02 : f32
    %26 = vector.broadcast %cst_11 : f32 to vector<64x64xf32>
    %27 = arith.mulf %26, %23 : vector<64x64xf32>
    %28 = arith.select %25, %23, %27 : vector<64x64xi1>, vector<64x64xf32>
    %29 = vector.extract_strided_slice %28 {offsets = [0, 0], sizes = [16, 64], strides = [1, 1]} : vector<64x64xf32> to vector<16x64xf32>
    %30 = vector.extract_strided_slice %28 {offsets = [16, 0], sizes = [16, 64], strides = [1, 1]} : vector<64x64xf32> to vector<16x64xf32>
    %31 = vector.extract_strided_slice %28 {offsets = [32, 0], sizes = [16, 64], strides = [1, 1]} : vector<64x64xf32> to vector<16x64xf32>
    %32 = vector.extract_strided_slice %28 {offsets = [48, 0], sizes = [16, 64], strides = [1, 1]} : vector<64x64xf32> to vector<16x64xf32>
    %33 = tpu.concatenate %29, %30, %31, %32 in 1 : vector<16x64xf32>, vector<16x64xf32>, vector<16x64xf32>, vector<16x64xf32> -> vector<16x256xf32>
    %34 = tpu.iota {dimensions = array<i32: 0>} : vector<16x256xi32>
    %c4_i32 = arith.constant 4 : i32
    %c0_i32 = arith.constant 0 : i32
    %35 = arith.cmpi eq, %c4_i32, %c0_i32 : i32
    %c1_i32 = arith.constant 1 : i32
    %36 = arith.select %35, %c1_i32, %c4_i32 : i32
    %37 = vector.broadcast %36 : i32 to vector<16x256xi32>
    %38 = arith.remsi %34, %37 : vector<16x256xi32>
    %c0_i32_12 = arith.constant 0 : i32
    %39 = vector.broadcast %c0_i32_12 : i32 to vector<16x256xi32>
    %40 = arith.cmpi ne, %38, %39 : vector<16x256xi32>
    %c0_i32_13 = arith.constant 0 : i32
    %41 = vector.broadcast %c0_i32_13 : i32 to vector<16x256xi32>
    %42 = arith.cmpi slt, %38, %41 : vector<16x256xi32>
    %c0_i32_14 = arith.constant 0 : i32
    %43 = arith.cmpi slt, %36, %c0_i32_14 : i32
    %44 = vector.broadcast %43 : i1 to vector<16x256xi1>
    %45 = vector.broadcast %44 : vector<16x256xi1> to vector<16x256xi1>
    %46 = arith.xori %42, %45 : vector<16x256xi1>
    %47 = arith.andi %46, %40 : vector<16x256xi1>
    %48 = vector.broadcast %36 : i32 to vector<16x256xi32>
    %49 = arith.addi %38, %48 : vector<16x256xi32>
    %50 = arith.select %47, %49, %38 : vector<16x256xi1>, vector<16x256xi32>
    %cst_15 = arith.constant 0.000000e+00 : f32
    %51 = vector.broadcast %cst_15 : f32 to vector<5x256xf32>
    %52 = vector.extract_strided_slice %33 {offsets = [0, 0], sizes = [11, 256], strides = [1, 1]} : vector<16x256xf32> to vector<11x256xf32>
    %53 = tpu.concatenate %51, %52 in 0 : vector<5x256xf32>, vector<11x256xf32> -> vector<16x256xf32>
    %c1_i32_16 = arith.constant 1 : i32
    %54 = vector.broadcast %c1_i32_16 : i32 to vector<16x256xi32>
    %55 = arith.cmpi sge, %50, %54 : vector<16x256xi32>
    %cst_17 = arith.constant 0.000000e+00 : f32
    %56 = vector.broadcast %cst_17 : f32 to vector<16x256xf32>
    %57 = arith.select %55, %53, %56 : vector<16x256xi1>, vector<16x256xf32>
    %cst_18 = arith.constant 0.000000e+00 : f32
    %58 = vector.broadcast %cst_18 : f32 to vector<4x256xf32>
    %59 = vector.extract_strided_slice %33 {offsets = [0, 0], sizes = [12, 256], strides = [1, 1]} : vector<16x256xf32> to vector<12x256xf32>
    %60 = tpu.concatenate %58, %59 in 0 : vector<4x256xf32>, vector<12x256xf32> -> vector<16x256xf32>
    %cst_19 = arith.constant 0.000000e+00 : f32
    %61 = vector.broadcast %cst_19 : f32 to vector<3x256xf32>
    %62 = vector.extract_strided_slice %33 {offsets = [0, 0], sizes = [13, 256], strides = [1, 1]} : vector<16x256xf32> to vector<13x256xf32>
    %63 = tpu.concatenate %61, %62 in 0 : vector<3x256xf32>, vector<13x256xf32> -> vector<16x256xf32>
    %c3_i32 = arith.constant 3 : i32
    %64 = vector.broadcast %c3_i32 : i32 to vector<16x256xi32>
    %65 = arith.cmpi slt, %50, %64 : vector<16x256xi32>
    %cst_20 = arith.constant 0.000000e+00 : f32
    %66 = vector.broadcast %cst_20 : f32 to vector<16x256xf32>
    %67 = arith.select %65, %63, %66 : vector<16x256xi1>, vector<16x256xf32>
    %cst_21 = arith.constant 0.000000e+00 : f32
    %68 = vector.broadcast %cst_21 : f32 to vector<1x256xf32>
    %69 = vector.extract_strided_slice %33 {offsets = [0, 0], sizes = [15, 256], strides = [1, 1]} : vector<16x256xf32> to vector<15x256xf32>
    %70 = tpu.concatenate %68, %69 in 0 : vector<1x256xf32>, vector<15x256xf32> -> vector<16x256xf32>
    %c1_i32_22 = arith.constant 1 : i32
    %71 = vector.broadcast %c1_i32_22 : i32 to vector<16x256xi32>
    %72 = arith.cmpi sge, %50, %71 : vector<16x256xi32>
    %cst_23 = arith.constant 0.000000e+00 : f32
    %73 = vector.broadcast %cst_23 : f32 to vector<16x256xf32>
    %74 = arith.select %72, %70, %73 : vector<16x256xi1>, vector<16x256xf32>
    %cst_24 = arith.constant 0.000000e+00 : f32
    %75 = vector.broadcast %cst_24 : f32 to vector<1x256xf32>
    %76 = vector.extract_strided_slice %33 {offsets = [1, 0], sizes = [15, 256], strides = [1, 1]} : vector<16x256xf32> to vector<15x256xf32>
    %77 = tpu.concatenate %76, %75 in 0 : vector<15x256xf32>, vector<1x256xf32> -> vector<16x256xf32>
    %c3_i32_25 = arith.constant 3 : i32
    %78 = vector.broadcast %c3_i32_25 : i32 to vector<16x256xi32>
    %79 = arith.cmpi slt, %50, %78 : vector<16x256xi32>
    %cst_26 = arith.constant 0.000000e+00 : f32
    %80 = vector.broadcast %cst_26 : f32 to vector<16x256xf32>
    %81 = arith.select %79, %77, %80 : vector<16x256xi1>, vector<16x256xf32>
    %cst_27 = arith.constant 0.000000e+00 : f32
    %82 = vector.broadcast %cst_27 : f32 to vector<3x256xf32>
    %83 = vector.extract_strided_slice %33 {offsets = [3, 0], sizes = [13, 256], strides = [1, 1]} : vector<16x256xf32> to vector<13x256xf32>
    %84 = tpu.concatenate %83, %82 in 0 : vector<13x256xf32>, vector<3x256xf32> -> vector<16x256xf32>
    %c1_i32_28 = arith.constant 1 : i32
    %85 = vector.broadcast %c1_i32_28 : i32 to vector<16x256xi32>
    %86 = arith.cmpi sge, %50, %85 : vector<16x256xi32>
    %cst_29 = arith.constant 0.000000e+00 : f32
    %87 = vector.broadcast %cst_29 : f32 to vector<16x256xf32>
    %88 = arith.select %86, %84, %87 : vector<16x256xi1>, vector<16x256xf32>
    %cst_30 = arith.constant 0.000000e+00 : f32
    %89 = vector.broadcast %cst_30 : f32 to vector<4x256xf32>
    %90 = vector.extract_strided_slice %33 {offsets = [4, 0], sizes = [12, 256], strides = [1, 1]} : vector<16x256xf32> to vector<12x256xf32>
    %91 = tpu.concatenate %90, %89 in 0 : vector<12x256xf32>, vector<4x256xf32> -> vector<16x256xf32>
    %cst_31 = arith.constant 0.000000e+00 : f32
    %92 = vector.broadcast %cst_31 : f32 to vector<5x256xf32>
    %93 = vector.extract_strided_slice %33 {offsets = [5, 0], sizes = [11, 256], strides = [1, 1]} : vector<16x256xf32> to vector<11x256xf32>
    %94 = tpu.concatenate %93, %92 in 0 : vector<11x256xf32>, vector<5x256xf32> -> vector<16x256xf32>
    %c3_i32_32 = arith.constant 3 : i32
    %95 = vector.broadcast %c3_i32_32 : i32 to vector<16x256xi32>
    %96 = arith.cmpi slt, %50, %95 : vector<16x256xi32>
    %cst_33 = arith.constant 0.000000e+00 : f32
    %97 = vector.broadcast %cst_33 : f32 to vector<16x256xf32>
    %98 = arith.select %96, %94, %97 : vector<16x256xi1>, vector<16x256xf32>
    %99 = tpu.concatenate %57, %60, %67, %74, %33, %81, %88, %91, %98 in 1 : vector<16x256xf32>, vector<16x256xf32>, vector<16x256xf32>, vector<16x256xf32>, vector<16x256xf32>, vector<16x256xf32>, vector<16x256xf32>, vector<16x256xf32>, vector<16x256xf32> -> vector<16x2304xf32>
    %c0_34 = arith.constant 0 : index
    %c0_35 = arith.constant 0 : index
    %100 = vector.load %arg3[%c0_34, %c0_35] : memref<2304x128xf32, #tpu.memory_space<vmem>>, vector<2304x128xf32>
    %cst_36 = arith.constant dense<0.000000e+00> : vector<16x128xf32>
    %101 = tpu.matmul %99, %100, %cst_36 {dimension_numbers = #tpu.dot_dimension_numbers<[1], [0], [0], [1], [0, 0, 1, 1], [], []>} : vector<16x2304xf32>, vector<2304x128xf32>, vector<16x128xf32> -> vector<16x128xf32>
    %cst_37 = arith.constant dense<0.000000e+00> : vector<128xf32>
    %102 = vector.multi_reduction <add>, %101, %cst_37 [0] : vector<16x128xf32> to vector<128xf32>
    %103 = vector.shape_cast %102 : vector<128xf32> to vector<1x128xf32>
    %cst_38 = arith.constant 1.600000e+01 : f32
    %104 = vector.broadcast %cst_38 : f32 to vector<1x128xf32>
    %105 = arith.divf %103, %104 : vector<1x128xf32>
    %106 = arith.mulf %101, %101 : vector<16x128xf32>
    %cst_39 = arith.constant dense<0.000000e+00> : vector<128xf32>
    %107 = vector.multi_reduction <add>, %106, %cst_39 [0] : vector<16x128xf32> to vector<128xf32>
    %108 = vector.shape_cast %107 : vector<128xf32> to vector<1x128xf32>
    %cst_40 = arith.constant 1.600000e+01 : f32
    %109 = vector.broadcast %cst_40 : f32 to vector<1x128xf32>
    %110 = arith.divf %108, %109 : vector<1x128xf32>
    %111 = arith.mulf %105, %105 : vector<1x128xf32>
    %112 = arith.subf %110, %111 : vector<1x128xf32>
    %cst_41 = arith.constant 0.000000e+00 : f32
    %113 = vector.broadcast %cst_41 : f32 to vector<1x128xf32>
    %114 = arith.maximumf %112, %113 : vector<1x128xf32>
    %115 = vector.broadcast %105 : vector<1x128xf32> to vector<16x128xf32>
    %116 = arith.subf %101, %115 : vector<16x128xf32>
    %cst_42 = arith.constant 9.99999974E-6 : f32
    %117 = vector.broadcast %cst_42 : f32 to vector<1x128xf32>
    %118 = arith.addf %114, %117 : vector<1x128xf32>
    %119 = math.rsqrt %118 : vector<1x128xf32>
    %120 = vector.broadcast %119 : vector<1x128xf32> to vector<16x128xf32>
    %121 = arith.mulf %116, %120 : vector<16x128xf32>
    %cst_43 = arith.constant 0.000000e+00 : f32
    %122 = vector.broadcast %cst_43 : f32 to vector<16x128xf32>
    %123 = arith.cmpf oge, %121, %122 : vector<16x128xf32>
    %cst_44 = arith.constant 5.000000e-02 : f32
    %124 = vector.broadcast %cst_44 : f32 to vector<16x128xf32>
    %125 = arith.mulf %124, %121 : vector<16x128xf32>
    %126 = arith.select %123, %121, %125 : vector<16x128xi1>, vector<16x128xf32>
    %127 = tpu.iota {dimensions = array<i32: 0>} : vector<16x128xi32>
    %c4_i32_45 = arith.constant 4 : i32
    %c0_i32_46 = arith.constant 0 : i32
    %128 = arith.cmpi eq, %c4_i32_45, %c0_i32_46 : i32
    %c1_i32_47 = arith.constant 1 : i32
    %129 = arith.select %128, %c1_i32_47, %c4_i32_45 : i32
    %130 = vector.broadcast %129 : i32 to vector<16x128xi32>
    %131 = arith.remsi %127, %130 : vector<16x128xi32>
    %c0_i32_48 = arith.constant 0 : i32
    %132 = vector.broadcast %c0_i32_48 : i32 to vector<16x128xi32>
    %133 = arith.cmpi ne, %131, %132 : vector<16x128xi32>
    %c0_i32_49 = arith.constant 0 : i32
    %134 = vector.broadcast %c0_i32_49 : i32 to vector<16x128xi32>
    %135 = arith.cmpi slt, %131, %134 : vector<16x128xi32>
    %c0_i32_50 = arith.constant 0 : i32
    %136 = arith.cmpi slt, %129, %c0_i32_50 : i32
    %137 = vector.broadcast %136 : i1 to vector<16x128xi1>
    %138 = vector.broadcast %137 : vector<16x128xi1> to vector<16x128xi1>
    %139 = arith.xori %135, %138 : vector<16x128xi1>
    %140 = arith.andi %139, %133 : vector<16x128xi1>
    %141 = vector.broadcast %129 : i32 to vector<16x128xi32>
    %142 = arith.addi %131, %141 : vector<16x128xi32>
    %143 = arith.select %140, %142, %131 : vector<16x128xi1>, vector<16x128xi32>
    %cst_51 = arith.constant 0.000000e+00 : f32
    %144 = vector.broadcast %cst_51 : f32 to vector<5x128xf32>
    %145 = vector.extract_strided_slice %126 {offsets = [0, 0], sizes = [11, 128], strides = [1, 1]} : vector<16x128xf32> to vector<11x128xf32>
    %146 = tpu.concatenate %144, %145 in 0 : vector<5x128xf32>, vector<11x128xf32> -> vector<16x128xf32>
    %c1_i32_52 = arith.constant 1 : i32
    %147 = vector.broadcast %c1_i32_52 : i32 to vector<16x128xi32>
    %148 = arith.cmpi sge, %143, %147 : vector<16x128xi32>
    %cst_53 = arith.constant 0.000000e+00 : f32
    %149 = vector.broadcast %cst_53 : f32 to vector<16x128xf32>
    %150 = arith.select %148, %146, %149 : vector<16x128xi1>, vector<16x128xf32>
    %cst_54 = arith.constant 0.000000e+00 : f32
    %151 = vector.broadcast %cst_54 : f32 to vector<4x128xf32>
    %152 = vector.extract_strided_slice %126 {offsets = [0, 0], sizes = [12, 128], strides = [1, 1]} : vector<16x128xf32> to vector<12x128xf32>
    %153 = tpu.concatenate %151, %152 in 0 : vector<4x128xf32>, vector<12x128xf32> -> vector<16x128xf32>
    %cst_55 = arith.constant 0.000000e+00 : f32
    %154 = vector.broadcast %cst_55 : f32 to vector<3x128xf32>
    %155 = vector.extract_strided_slice %126 {offsets = [0, 0], sizes = [13, 128], strides = [1, 1]} : vector<16x128xf32> to vector<13x128xf32>
    %156 = tpu.concatenate %154, %155 in 0 : vector<3x128xf32>, vector<13x128xf32> -> vector<16x128xf32>
    %c3_i32_56 = arith.constant 3 : i32
    %157 = vector.broadcast %c3_i32_56 : i32 to vector<16x128xi32>
    %158 = arith.cmpi slt, %143, %157 : vector<16x128xi32>
    %cst_57 = arith.constant 0.000000e+00 : f32
    %159 = vector.broadcast %cst_57 : f32 to vector<16x128xf32>
    %160 = arith.select %158, %156, %159 : vector<16x128xi1>, vector<16x128xf32>
    %cst_58 = arith.constant 0.000000e+00 : f32
    %161 = vector.broadcast %cst_58 : f32 to vector<1x128xf32>
    %162 = vector.extract_strided_slice %126 {offsets = [0, 0], sizes = [15, 128], strides = [1, 1]} : vector<16x128xf32> to vector<15x128xf32>
    %163 = tpu.concatenate %161, %162 in 0 : vector<1x128xf32>, vector<15x128xf32> -> vector<16x128xf32>
    %c1_i32_59 = arith.constant 1 : i32
    %164 = vector.broadcast %c1_i32_59 : i32 to vector<16x128xi32>
    %165 = arith.cmpi sge, %143, %164 : vector<16x128xi32>
    %cst_60 = arith.constant 0.000000e+00 : f32
    %166 = vector.broadcast %cst_60 : f32 to vector<16x128xf32>
    %167 = arith.select %165, %163, %166 : vector<16x128xi1>, vector<16x128xf32>
    %cst_61 = arith.constant 0.000000e+00 : f32
    %168 = vector.broadcast %cst_61 : f32 to vector<1x128xf32>
    %169 = vector.extract_strided_slice %126 {offsets = [1, 0], sizes = [15, 128], strides = [1, 1]} : vector<16x128xf32> to vector<15x128xf32>
    %170 = tpu.concatenate %169, %168 in 0 : vector<15x128xf32>, vector<1x128xf32> -> vector<16x128xf32>
    %c3_i32_62 = arith.constant 3 : i32
    %171 = vector.broadcast %c3_i32_62 : i32 to vector<16x128xi32>
    %172 = arith.cmpi slt, %143, %171 : vector<16x128xi32>
    %cst_63 = arith.constant 0.000000e+00 : f32
    %173 = vector.broadcast %cst_63 : f32 to vector<16x128xf32>
    %174 = arith.select %172, %170, %173 : vector<16x128xi1>, vector<16x128xf32>
    %cst_64 = arith.constant 0.000000e+00 : f32
    %175 = vector.broadcast %cst_64 : f32 to vector<3x128xf32>
    %176 = vector.extract_strided_slice %126 {offsets = [3, 0], sizes = [13, 128], strides = [1, 1]} : vector<16x128xf32> to vector<13x128xf32>
    %177 = tpu.concatenate %176, %175 in 0 : vector<13x128xf32>, vector<3x128xf32> -> vector<16x128xf32>
    %c1_i32_65 = arith.constant 1 : i32
    %178 = vector.broadcast %c1_i32_65 : i32 to vector<16x128xi32>
    %179 = arith.cmpi sge, %143, %178 : vector<16x128xi32>
    %cst_66 = arith.constant 0.000000e+00 : f32
    %180 = vector.broadcast %cst_66 : f32 to vector<16x128xf32>
    %181 = arith.select %179, %177, %180 : vector<16x128xi1>, vector<16x128xf32>
    %cst_67 = arith.constant 0.000000e+00 : f32
    %182 = vector.broadcast %cst_67 : f32 to vector<4x128xf32>
    %183 = vector.extract_strided_slice %126 {offsets = [4, 0], sizes = [12, 128], strides = [1, 1]} : vector<16x128xf32> to vector<12x128xf32>
    %184 = tpu.concatenate %183, %182 in 0 : vector<12x128xf32>, vector<4x128xf32> -> vector<16x128xf32>
    %cst_68 = arith.constant 0.000000e+00 : f32
    %185 = vector.broadcast %cst_68 : f32 to vector<5x128xf32>
    %186 = vector.extract_strided_slice %126 {offsets = [5, 0], sizes = [11, 128], strides = [1, 1]} : vector<16x128xf32> to vector<11x128xf32>
    %187 = tpu.concatenate %186, %185 in 0 : vector<11x128xf32>, vector<5x128xf32> -> vector<16x128xf32>
    %c3_i32_69 = arith.constant 3 : i32
    %188 = vector.broadcast %c3_i32_69 : i32 to vector<16x128xi32>
    %189 = arith.cmpi slt, %143, %188 : vector<16x128xi32>
    %cst_70 = arith.constant 0.000000e+00 : f32
    %190 = vector.broadcast %cst_70 : f32 to vector<16x128xf32>
    %191 = arith.select %189, %187, %190 : vector<16x128xi1>, vector<16x128xf32>
    %192 = tpu.concatenate %150, %153, %160, %167, %126, %174, %181, %184, %191 in 1 : vector<16x128xf32>, vector<16x128xf32>, vector<16x128xf32>, vector<16x128xf32>, vector<16x128xf32>, vector<16x128xf32>, vector<16x128xf32>, vector<16x128xf32>, vector<16x128xf32> -> vector<16x1152xf32>
    %c0_71 = arith.constant 0 : index
    %c0_72 = arith.constant 0 : index
    %193 = vector.load %arg4[%c0_71, %c0_72] : memref<1152x128xf32, #tpu.memory_space<vmem>>, vector<1152x128xf32>
    %cst_73 = arith.constant dense<0.000000e+00> : vector<16x128xf32>
    %194 = tpu.matmul %192, %193, %cst_73 {dimension_numbers = #tpu.dot_dimension_numbers<[1], [0], [0], [1], [0, 0, 1, 1], [], []>} : vector<16x1152xf32>, vector<1152x128xf32>, vector<16x128xf32> -> vector<16x128xf32>
    %cst_74 = arith.constant dense<0.000000e+00> : vector<128xf32>
    %195 = vector.multi_reduction <add>, %194, %cst_74 [0] : vector<16x128xf32> to vector<128xf32>
    %196 = vector.shape_cast %195 : vector<128xf32> to vector<1x128xf32>
    %cst_75 = arith.constant 1.600000e+01 : f32
    %197 = vector.broadcast %cst_75 : f32 to vector<1x128xf32>
    %198 = arith.divf %196, %197 : vector<1x128xf32>
    %199 = arith.mulf %194, %194 : vector<16x128xf32>
    %cst_76 = arith.constant dense<0.000000e+00> : vector<128xf32>
    %200 = vector.multi_reduction <add>, %199, %cst_76 [0] : vector<16x128xf32> to vector<128xf32>
    %201 = vector.shape_cast %200 : vector<128xf32> to vector<1x128xf32>
    %cst_77 = arith.constant 1.600000e+01 : f32
    %202 = vector.broadcast %cst_77 : f32 to vector<1x128xf32>
    %203 = arith.divf %201, %202 : vector<1x128xf32>
    %204 = arith.mulf %198, %198 : vector<1x128xf32>
    %205 = arith.subf %203, %204 : vector<1x128xf32>
    %cst_78 = arith.constant 0.000000e+00 : f32
    %206 = vector.broadcast %cst_78 : f32 to vector<1x128xf32>
    %207 = arith.maximumf %205, %206 : vector<1x128xf32>
    %208 = vector.broadcast %198 : vector<1x128xf32> to vector<16x128xf32>
    %209 = arith.subf %194, %208 : vector<16x128xf32>
    %cst_79 = arith.constant 9.99999974E-6 : f32
    %210 = vector.broadcast %cst_79 : f32 to vector<1x128xf32>
    %211 = arith.addf %207, %210 : vector<1x128xf32>
    %212 = math.rsqrt %211 : vector<1x128xf32>
    %213 = vector.broadcast %212 : vector<1x128xf32> to vector<16x128xf32>
    %214 = arith.mulf %209, %213 : vector<16x128xf32>
    %cst_80 = arith.constant 0.000000e+00 : f32
    %215 = vector.broadcast %cst_80 : f32 to vector<16x128xf32>
    %216 = arith.cmpf oge, %214, %215 : vector<16x128xf32>
    %cst_81 = arith.constant 5.000000e-02 : f32
    %217 = vector.broadcast %cst_81 : f32 to vector<16x128xf32>
    %218 = arith.mulf %217, %214 : vector<16x128xf32>
    %219 = arith.select %216, %214, %218 : vector<16x128xi1>, vector<16x128xf32>
    %220 = tpu.iota {dimensions = array<i32: 0>} : vector<16x128xi32>
    %c4_i32_82 = arith.constant 4 : i32
    %c0_i32_83 = arith.constant 0 : i32
    %221 = arith.cmpi eq, %c4_i32_82, %c0_i32_83 : i32
    %c1_i32_84 = arith.constant 1 : i32
    %222 = arith.select %221, %c1_i32_84, %c4_i32_82 : i32
    %223 = vector.broadcast %222 : i32 to vector<16x128xi32>
    %224 = arith.remsi %220, %223 : vector<16x128xi32>
    %c0_i32_85 = arith.constant 0 : i32
    %225 = vector.broadcast %c0_i32_85 : i32 to vector<16x128xi32>
    %226 = arith.cmpi ne, %224, %225 : vector<16x128xi32>
    %c0_i32_86 = arith.constant 0 : i32
    %227 = vector.broadcast %c0_i32_86 : i32 to vector<16x128xi32>
    %228 = arith.cmpi slt, %224, %227 : vector<16x128xi32>
    %c0_i32_87 = arith.constant 0 : i32
    %229 = arith.cmpi slt, %222, %c0_i32_87 : i32
    %230 = vector.broadcast %229 : i1 to vector<16x128xi1>
    %231 = vector.broadcast %230 : vector<16x128xi1> to vector<16x128xi1>
    %232 = arith.xori %228, %231 : vector<16x128xi1>
    %233 = arith.andi %232, %226 : vector<16x128xi1>
    %234 = vector.broadcast %222 : i32 to vector<16x128xi32>
    %235 = arith.addi %224, %234 : vector<16x128xi32>
    %236 = arith.select %233, %235, %224 : vector<16x128xi1>, vector<16x128xi32>
    %cst_88 = arith.constant 0.000000e+00 : f32
    %237 = vector.broadcast %cst_88 : f32 to vector<5x128xf32>
    %238 = vector.extract_strided_slice %219 {offsets = [0, 0], sizes = [11, 128], strides = [1, 1]} : vector<16x128xf32> to vector<11x128xf32>
    %239 = tpu.concatenate %237, %238 in 0 : vector<5x128xf32>, vector<11x128xf32> -> vector<16x128xf32>
    %c1_i32_89 = arith.constant 1 : i32
    %240 = vector.broadcast %c1_i32_89 : i32 to vector<16x128xi32>
    %241 = arith.cmpi sge, %236, %240 : vector<16x128xi32>
    %cst_90 = arith.constant 0.000000e+00 : f32
    %242 = vector.broadcast %cst_90 : f32 to vector<16x128xf32>
    %243 = arith.select %241, %239, %242 : vector<16x128xi1>, vector<16x128xf32>
    %cst_91 = arith.constant 0.000000e+00 : f32
    %244 = vector.broadcast %cst_91 : f32 to vector<4x128xf32>
    %245 = vector.extract_strided_slice %219 {offsets = [0, 0], sizes = [12, 128], strides = [1, 1]} : vector<16x128xf32> to vector<12x128xf32>
    %246 = tpu.concatenate %244, %245 in 0 : vector<4x128xf32>, vector<12x128xf32> -> vector<16x128xf32>
    %cst_92 = arith.constant 0.000000e+00 : f32
    %247 = vector.broadcast %cst_92 : f32 to vector<3x128xf32>
    %248 = vector.extract_strided_slice %219 {offsets = [0, 0], sizes = [13, 128], strides = [1, 1]} : vector<16x128xf32> to vector<13x128xf32>
    %249 = tpu.concatenate %247, %248 in 0 : vector<3x128xf32>, vector<13x128xf32> -> vector<16x128xf32>
    %c3_i32_93 = arith.constant 3 : i32
    %250 = vector.broadcast %c3_i32_93 : i32 to vector<16x128xi32>
    %251 = arith.cmpi slt, %236, %250 : vector<16x128xi32>
    %cst_94 = arith.constant 0.000000e+00 : f32
    %252 = vector.broadcast %cst_94 : f32 to vector<16x128xf32>
    %253 = arith.select %251, %249, %252 : vector<16x128xi1>, vector<16x128xf32>
    %cst_95 = arith.constant 0.000000e+00 : f32
    %254 = vector.broadcast %cst_95 : f32 to vector<1x128xf32>
    %255 = vector.extract_strided_slice %219 {offsets = [0, 0], sizes = [15, 128], strides = [1, 1]} : vector<16x128xf32> to vector<15x128xf32>
    %256 = tpu.concatenate %254, %255 in 0 : vector<1x128xf32>, vector<15x128xf32> -> vector<16x128xf32>
    %c1_i32_96 = arith.constant 1 : i32
    %257 = vector.broadcast %c1_i32_96 : i32 to vector<16x128xi32>
    %258 = arith.cmpi sge, %236, %257 : vector<16x128xi32>
    %cst_97 = arith.constant 0.000000e+00 : f32
    %259 = vector.broadcast %cst_97 : f32 to vector<16x128xf32>
    %260 = arith.select %258, %256, %259 : vector<16x128xi1>, vector<16x128xf32>
    %cst_98 = arith.constant 0.000000e+00 : f32
    %261 = vector.broadcast %cst_98 : f32 to vector<1x128xf32>
    %262 = vector.extract_strided_slice %219 {offsets = [1, 0], sizes = [15, 128], strides = [1, 1]} : vector<16x128xf32> to vector<15x128xf32>
    %263 = tpu.concatenate %262, %261 in 0 : vector<15x128xf32>, vector<1x128xf32> -> vector<16x128xf32>
    %c3_i32_99 = arith.constant 3 : i32
    %264 = vector.broadcast %c3_i32_99 : i32 to vector<16x128xi32>
    %265 = arith.cmpi slt, %236, %264 : vector<16x128xi32>
    %cst_100 = arith.constant 0.000000e+00 : f32
    %266 = vector.broadcast %cst_100 : f32 to vector<16x128xf32>
    %267 = arith.select %265, %263, %266 : vector<16x128xi1>, vector<16x128xf32>
    %cst_101 = arith.constant 0.000000e+00 : f32
    %268 = vector.broadcast %cst_101 : f32 to vector<3x128xf32>
    %269 = vector.extract_strided_slice %219 {offsets = [3, 0], sizes = [13, 128], strides = [1, 1]} : vector<16x128xf32> to vector<13x128xf32>
    %270 = tpu.concatenate %269, %268 in 0 : vector<13x128xf32>, vector<3x128xf32> -> vector<16x128xf32>
    %c1_i32_102 = arith.constant 1 : i32
    %271 = vector.broadcast %c1_i32_102 : i32 to vector<16x128xi32>
    %272 = arith.cmpi sge, %236, %271 : vector<16x128xi32>
    %cst_103 = arith.constant 0.000000e+00 : f32
    %273 = vector.broadcast %cst_103 : f32 to vector<16x128xf32>
    %274 = arith.select %272, %270, %273 : vector<16x128xi1>, vector<16x128xf32>
    %cst_104 = arith.constant 0.000000e+00 : f32
    %275 = vector.broadcast %cst_104 : f32 to vector<4x128xf32>
    %276 = vector.extract_strided_slice %219 {offsets = [4, 0], sizes = [12, 128], strides = [1, 1]} : vector<16x128xf32> to vector<12x128xf32>
    %277 = tpu.concatenate %276, %275 in 0 : vector<12x128xf32>, vector<4x128xf32> -> vector<16x128xf32>
    %cst_105 = arith.constant 0.000000e+00 : f32
    %278 = vector.broadcast %cst_105 : f32 to vector<5x128xf32>
    %279 = vector.extract_strided_slice %219 {offsets = [5, 0], sizes = [11, 128], strides = [1, 1]} : vector<16x128xf32> to vector<11x128xf32>
    %280 = tpu.concatenate %279, %278 in 0 : vector<11x128xf32>, vector<5x128xf32> -> vector<16x128xf32>
    %c3_i32_106 = arith.constant 3 : i32
    %281 = vector.broadcast %c3_i32_106 : i32 to vector<16x128xi32>
    %282 = arith.cmpi slt, %236, %281 : vector<16x128xi32>
    %cst_107 = arith.constant 0.000000e+00 : f32
    %283 = vector.broadcast %cst_107 : f32 to vector<16x128xf32>
    %284 = arith.select %282, %280, %283 : vector<16x128xi1>, vector<16x128xf32>
    %285 = tpu.concatenate %243, %246, %253, %260, %219, %267, %274, %277, %284 in 1 : vector<16x128xf32>, vector<16x128xf32>, vector<16x128xf32>, vector<16x128xf32>, vector<16x128xf32>, vector<16x128xf32>, vector<16x128xf32>, vector<16x128xf32>, vector<16x128xf32> -> vector<16x1152xf32>
    %c0_108 = arith.constant 0 : index
    %c0_109 = arith.constant 0 : index
    %286 = vector.load %arg5[%c0_108, %c0_109] : memref<1152x128xf32, #tpu.memory_space<vmem>>, vector<1152x128xf32>
    %cst_110 = arith.constant dense<0.000000e+00> : vector<16x128xf32>
    %287 = tpu.matmul %285, %286, %cst_110 {dimension_numbers = #tpu.dot_dimension_numbers<[1], [0], [0], [1], [0, 0, 1, 1], [], []>} : vector<16x1152xf32>, vector<1152x128xf32>, vector<16x128xf32> -> vector<16x128xf32>
    %cst_111 = arith.constant dense<0.000000e+00> : vector<128xf32>
    %288 = vector.multi_reduction <add>, %287, %cst_111 [0] : vector<16x128xf32> to vector<128xf32>
    %289 = vector.shape_cast %288 : vector<128xf32> to vector<1x128xf32>
    %cst_112 = arith.constant 1.600000e+01 : f32
    %290 = vector.broadcast %cst_112 : f32 to vector<1x128xf32>
    %291 = arith.divf %289, %290 : vector<1x128xf32>
    %292 = arith.mulf %287, %287 : vector<16x128xf32>
    %cst_113 = arith.constant dense<0.000000e+00> : vector<128xf32>
    %293 = vector.multi_reduction <add>, %292, %cst_113 [0] : vector<16x128xf32> to vector<128xf32>
    %294 = vector.shape_cast %293 : vector<128xf32> to vector<1x128xf32>
    %cst_114 = arith.constant 1.600000e+01 : f32
    %295 = vector.broadcast %cst_114 : f32 to vector<1x128xf32>
    %296 = arith.divf %294, %295 : vector<1x128xf32>
    %297 = arith.mulf %291, %291 : vector<1x128xf32>
    %298 = arith.subf %296, %297 : vector<1x128xf32>
    %cst_115 = arith.constant 0.000000e+00 : f32
    %299 = vector.broadcast %cst_115 : f32 to vector<1x128xf32>
    %300 = arith.maximumf %298, %299 : vector<1x128xf32>
    %301 = vector.broadcast %291 : vector<1x128xf32> to vector<16x128xf32>
    %302 = arith.subf %287, %301 : vector<16x128xf32>
    %cst_116 = arith.constant 9.99999974E-6 : f32
    %303 = vector.broadcast %cst_116 : f32 to vector<1x128xf32>
    %304 = arith.addf %300, %303 : vector<1x128xf32>
    %305 = math.rsqrt %304 : vector<1x128xf32>
    %306 = vector.broadcast %305 : vector<1x128xf32> to vector<16x128xf32>
    %307 = arith.mulf %302, %306 : vector<16x128xf32>
    %cst_117 = arith.constant 0.000000e+00 : f32
    %308 = vector.broadcast %cst_117 : f32 to vector<16x128xf32>
    %309 = arith.cmpf oge, %307, %308 : vector<16x128xf32>
    %cst_118 = arith.constant 5.000000e-02 : f32
    %310 = vector.broadcast %cst_118 : f32 to vector<16x128xf32>
    %311 = arith.mulf %310, %307 : vector<16x128xf32>
    %312 = arith.select %309, %307, %311 : vector<16x128xi1>, vector<16x128xf32>
    %313 = tpu.iota {dimensions = array<i32: 0>} : vector<16x128xi32>
    %c4_i32_119 = arith.constant 4 : i32
    %c0_i32_120 = arith.constant 0 : i32
    %314 = arith.cmpi eq, %c4_i32_119, %c0_i32_120 : i32
    %c1_i32_121 = arith.constant 1 : i32
    %315 = arith.select %314, %c1_i32_121, %c4_i32_119 : i32
    %316 = vector.broadcast %315 : i32 to vector<16x128xi32>
    %317 = arith.remsi %313, %316 : vector<16x128xi32>
    %c0_i32_122 = arith.constant 0 : i32
    %318 = vector.broadcast %c0_i32_122 : i32 to vector<16x128xi32>
    %319 = arith.cmpi ne, %317, %318 : vector<16x128xi32>
    %c0_i32_123 = arith.constant 0 : i32
    %320 = vector.broadcast %c0_i32_123 : i32 to vector<16x128xi32>
    %321 = arith.cmpi slt, %317, %320 : vector<16x128xi32>
    %c0_i32_124 = arith.constant 0 : i32
    %322 = arith.cmpi slt, %315, %c0_i32_124 : i32
    %323 = vector.broadcast %322 : i1 to vector<16x128xi1>
    %324 = vector.broadcast %323 : vector<16x128xi1> to vector<16x128xi1>
    %325 = arith.xori %321, %324 : vector<16x128xi1>
    %326 = arith.andi %325, %319 : vector<16x128xi1>
    %327 = vector.broadcast %315 : i32 to vector<16x128xi32>
    %328 = arith.addi %317, %327 : vector<16x128xi32>
    %329 = arith.select %326, %328, %317 : vector<16x128xi1>, vector<16x128xi32>
    %cst_125 = arith.constant 0.000000e+00 : f32
    %330 = vector.broadcast %cst_125 : f32 to vector<5x128xf32>
    %331 = vector.extract_strided_slice %312 {offsets = [0, 0], sizes = [11, 128], strides = [1, 1]} : vector<16x128xf32> to vector<11x128xf32>
    %332 = tpu.concatenate %330, %331 in 0 : vector<5x128xf32>, vector<11x128xf32> -> vector<16x128xf32>
    %c1_i32_126 = arith.constant 1 : i32
    %333 = vector.broadcast %c1_i32_126 : i32 to vector<16x128xi32>
    %334 = arith.cmpi sge, %329, %333 : vector<16x128xi32>
    %cst_127 = arith.constant 0.000000e+00 : f32
    %335 = vector.broadcast %cst_127 : f32 to vector<16x128xf32>
    %336 = arith.select %334, %332, %335 : vector<16x128xi1>, vector<16x128xf32>
    %cst_128 = arith.constant 0.000000e+00 : f32
    %337 = vector.broadcast %cst_128 : f32 to vector<4x128xf32>
    %338 = vector.extract_strided_slice %312 {offsets = [0, 0], sizes = [12, 128], strides = [1, 1]} : vector<16x128xf32> to vector<12x128xf32>
    %339 = tpu.concatenate %337, %338 in 0 : vector<4x128xf32>, vector<12x128xf32> -> vector<16x128xf32>
    %cst_129 = arith.constant 0.000000e+00 : f32
    %340 = vector.broadcast %cst_129 : f32 to vector<3x128xf32>
    %341 = vector.extract_strided_slice %312 {offsets = [0, 0], sizes = [13, 128], strides = [1, 1]} : vector<16x128xf32> to vector<13x128xf32>
    %342 = tpu.concatenate %340, %341 in 0 : vector<3x128xf32>, vector<13x128xf32> -> vector<16x128xf32>
    %c3_i32_130 = arith.constant 3 : i32
    %343 = vector.broadcast %c3_i32_130 : i32 to vector<16x128xi32>
    %344 = arith.cmpi slt, %329, %343 : vector<16x128xi32>
    %cst_131 = arith.constant 0.000000e+00 : f32
    %345 = vector.broadcast %cst_131 : f32 to vector<16x128xf32>
    %346 = arith.select %344, %342, %345 : vector<16x128xi1>, vector<16x128xf32>
    %cst_132 = arith.constant 0.000000e+00 : f32
    %347 = vector.broadcast %cst_132 : f32 to vector<1x128xf32>
    %348 = vector.extract_strided_slice %312 {offsets = [0, 0], sizes = [15, 128], strides = [1, 1]} : vector<16x128xf32> to vector<15x128xf32>
    %349 = tpu.concatenate %347, %348 in 0 : vector<1x128xf32>, vector<15x128xf32> -> vector<16x128xf32>
    %c1_i32_133 = arith.constant 1 : i32
    %350 = vector.broadcast %c1_i32_133 : i32 to vector<16x128xi32>
    %351 = arith.cmpi sge, %329, %350 : vector<16x128xi32>
    %cst_134 = arith.constant 0.000000e+00 : f32
    %352 = vector.broadcast %cst_134 : f32 to vector<16x128xf32>
    %353 = arith.select %351, %349, %352 : vector<16x128xi1>, vector<16x128xf32>
    %cst_135 = arith.constant 0.000000e+00 : f32
    %354 = vector.broadcast %cst_135 : f32 to vector<1x128xf32>
    %355 = vector.extract_strided_slice %312 {offsets = [1, 0], sizes = [15, 128], strides = [1, 1]} : vector<16x128xf32> to vector<15x128xf32>
    %356 = tpu.concatenate %355, %354 in 0 : vector<15x128xf32>, vector<1x128xf32> -> vector<16x128xf32>
    %c3_i32_136 = arith.constant 3 : i32
    %357 = vector.broadcast %c3_i32_136 : i32 to vector<16x128xi32>
    %358 = arith.cmpi slt, %329, %357 : vector<16x128xi32>
    %cst_137 = arith.constant 0.000000e+00 : f32
    %359 = vector.broadcast %cst_137 : f32 to vector<16x128xf32>
    %360 = arith.select %358, %356, %359 : vector<16x128xi1>, vector<16x128xf32>
    %cst_138 = arith.constant 0.000000e+00 : f32
    %361 = vector.broadcast %cst_138 : f32 to vector<3x128xf32>
    %362 = vector.extract_strided_slice %312 {offsets = [3, 0], sizes = [13, 128], strides = [1, 1]} : vector<16x128xf32> to vector<13x128xf32>
    %363 = tpu.concatenate %362, %361 in 0 : vector<13x128xf32>, vector<3x128xf32> -> vector<16x128xf32>
    %c1_i32_139 = arith.constant 1 : i32
    %364 = vector.broadcast %c1_i32_139 : i32 to vector<16x128xi32>
    %365 = arith.cmpi sge, %329, %364 : vector<16x128xi32>
    %cst_140 = arith.constant 0.000000e+00 : f32
    %366 = vector.broadcast %cst_140 : f32 to vector<16x128xf32>
    %367 = arith.select %365, %363, %366 : vector<16x128xi1>, vector<16x128xf32>
    %cst_141 = arith.constant 0.000000e+00 : f32
    %368 = vector.broadcast %cst_141 : f32 to vector<4x128xf32>
    %369 = vector.extract_strided_slice %312 {offsets = [4, 0], sizes = [12, 128], strides = [1, 1]} : vector<16x128xf32> to vector<12x128xf32>
    %370 = tpu.concatenate %369, %368 in 0 : vector<12x128xf32>, vector<4x128xf32> -> vector<16x128xf32>
    %cst_142 = arith.constant 0.000000e+00 : f32
    %371 = vector.broadcast %cst_142 : f32 to vector<5x128xf32>
    %372 = vector.extract_strided_slice %312 {offsets = [5, 0], sizes = [11, 128], strides = [1, 1]} : vector<16x128xf32> to vector<11x128xf32>
    %373 = tpu.concatenate %372, %371 in 0 : vector<11x128xf32>, vector<5x128xf32> -> vector<16x128xf32>
    %c3_i32_143 = arith.constant 3 : i32
    %374 = vector.broadcast %c3_i32_143 : i32 to vector<16x128xi32>
    %375 = arith.cmpi slt, %329, %374 : vector<16x128xi32>
    %cst_144 = arith.constant 0.000000e+00 : f32
    %376 = vector.broadcast %cst_144 : f32 to vector<16x128xf32>
    %377 = arith.select %375, %373, %376 : vector<16x128xi1>, vector<16x128xf32>
    %378 = tpu.concatenate %336, %339, %346, %353, %312, %360, %367, %370, %377 in 1 : vector<16x128xf32>, vector<16x128xf32>, vector<16x128xf32>, vector<16x128xf32>, vector<16x128xf32>, vector<16x128xf32>, vector<16x128xf32>, vector<16x128xf32>, vector<16x128xf32> -> vector<16x1152xf32>
    %c0_145 = arith.constant 0 : index
    %c0_146 = arith.constant 0 : index
    %379 = vector.load %arg6[%c0_145, %c0_146] : memref<1152x256xf32, #tpu.memory_space<vmem>>, vector<1152x256xf32>
    %cst_147 = arith.constant dense<0.000000e+00> : vector<16x256xf32>
    %380 = tpu.matmul %378, %379, %cst_147 {dimension_numbers = #tpu.dot_dimension_numbers<[1], [0], [0], [1], [0, 0, 1, 1], [], []>} : vector<16x1152xf32>, vector<1152x256xf32>, vector<16x256xf32> -> vector<16x256xf32>
    %cst_148 = arith.constant dense<0.000000e+00> : vector<256xf32>
    %381 = vector.multi_reduction <add>, %380, %cst_148 [0] : vector<16x256xf32> to vector<256xf32>
    %382 = vector.shape_cast %381 : vector<256xf32> to vector<1x256xf32>
    %383 = arith.mulf %380, %380 : vector<16x256xf32>
    %cst_149 = arith.constant dense<0.000000e+00> : vector<256xf32>
    %384 = vector.multi_reduction <add>, %383, %cst_149 [0] : vector<16x256xf32> to vector<256xf32>
    %385 = vector.shape_cast %384 : vector<256xf32> to vector<1x256xf32>
    %386 = vector.extract_strided_slice %382 {offsets = [0, 0], sizes = [1, 64], strides = [1, 1]} : vector<1x256xf32> to vector<1x64xf32>
    %387 = vector.extract_strided_slice %382 {offsets = [0, 64], sizes = [1, 64], strides = [1, 1]} : vector<1x256xf32> to vector<1x64xf32>
    %388 = arith.addf %386, %387 : vector<1x64xf32>
    %389 = vector.extract_strided_slice %382 {offsets = [0, 128], sizes = [1, 64], strides = [1, 1]} : vector<1x256xf32> to vector<1x64xf32>
    %390 = arith.addf %388, %389 : vector<1x64xf32>
    %391 = vector.extract_strided_slice %382 {offsets = [0, 192], sizes = [1, 64], strides = [1, 1]} : vector<1x256xf32> to vector<1x64xf32>
    %392 = arith.addf %390, %391 : vector<1x64xf32>
    %cst_150 = arith.constant 6.400000e+01 : f32
    %393 = vector.broadcast %cst_150 : f32 to vector<1x64xf32>
    %394 = arith.divf %392, %393 : vector<1x64xf32>
    %395 = vector.extract_strided_slice %385 {offsets = [0, 0], sizes = [1, 64], strides = [1, 1]} : vector<1x256xf32> to vector<1x64xf32>
    %396 = vector.extract_strided_slice %385 {offsets = [0, 64], sizes = [1, 64], strides = [1, 1]} : vector<1x256xf32> to vector<1x64xf32>
    %397 = arith.addf %395, %396 : vector<1x64xf32>
    %398 = vector.extract_strided_slice %385 {offsets = [0, 128], sizes = [1, 64], strides = [1, 1]} : vector<1x256xf32> to vector<1x64xf32>
    %399 = arith.addf %397, %398 : vector<1x64xf32>
    %400 = vector.extract_strided_slice %385 {offsets = [0, 192], sizes = [1, 64], strides = [1, 1]} : vector<1x256xf32> to vector<1x64xf32>
    %401 = arith.addf %399, %400 : vector<1x64xf32>
    %cst_151 = arith.constant 6.400000e+01 : f32
    %402 = vector.broadcast %cst_151 : f32 to vector<1x64xf32>
    %403 = arith.divf %401, %402 : vector<1x64xf32>
    %404 = arith.mulf %394, %394 : vector<1x64xf32>
    %405 = arith.subf %403, %404 : vector<1x64xf32>
    %cst_152 = arith.constant 0.000000e+00 : f32
    %406 = vector.broadcast %cst_152 : f32 to vector<1x64xf32>
    %407 = arith.maximumf %405, %406 : vector<1x64xf32>
    %cst_153 = arith.constant 9.99999974E-6 : f32
    %408 = vector.broadcast %cst_153 : f32 to vector<1x64xf32>
    %409 = arith.addf %407, %408 : vector<1x64xf32>
    %410 = math.rsqrt %409 : vector<1x64xf32>
    %411 = tpu.concatenate %394, %394, %394, %394 in 1 : vector<1x64xf32>, vector<1x64xf32>, vector<1x64xf32>, vector<1x64xf32> -> vector<1x256xf32>
    %412 = tpu.concatenate %410, %410, %410, %410 in 1 : vector<1x64xf32>, vector<1x64xf32>, vector<1x64xf32>, vector<1x64xf32> -> vector<1x256xf32>
    %413 = vector.broadcast %411 : vector<1x256xf32> to vector<16x256xf32>
    %414 = arith.subf %380, %413 : vector<16x256xf32>
    %415 = vector.broadcast %412 : vector<1x256xf32> to vector<16x256xf32>
    %416 = arith.mulf %414, %415 : vector<16x256xf32>
    %cst_154 = arith.constant 0.000000e+00 : f32
    %417 = vector.broadcast %cst_154 : f32 to vector<16x256xf32>
    %418 = arith.cmpf oge, %416, %417 : vector<16x256xf32>
    %cst_155 = arith.constant 5.000000e-02 : f32
    %419 = vector.broadcast %cst_155 : f32 to vector<16x256xf32>
    %420 = arith.mulf %419, %416 : vector<16x256xf32>
    %421 = arith.select %418, %416, %420 : vector<16x256xi1>, vector<16x256xf32>
    %422 = vector.extract_strided_slice %421 {offsets = [0, 0], sizes = [1, 256], strides = [1, 1]} : vector<16x256xf32> to vector<1x256xf32>
    %423 = vector.extract_strided_slice %422 {offsets = [0, 0], sizes = [1, 128], strides = [1, 1]} : vector<1x256xf32> to vector<1x128xf32>
    %c0_156 = arith.constant 0 : index
    %c0_157 = arith.constant 0 : index
    %424 = vector.load %arg9[%c0_156, %c0_157] : memref<8x512xf32, #tpu.memory_space<vmem>>, vector<1x128xf32>
    tpu.vector_store %arg9[%c0_156, %c0_157], %423 {strides = array<i32>} : memref<8x512xf32, #tpu.memory_space<vmem>>, vector<1x128xf32>,
    %425 = vector.extract_strided_slice %422 {offsets = [0, 128], sizes = [1, 128], strides = [1, 1]} : vector<1x256xf32> to vector<1x128xf32>
    %c1 = arith.constant 1 : index
    %c0_158 = arith.constant 0 : index
    %426 = vector.load %arg9[%c1, %c0_158] : memref<8x512xf32, #tpu.memory_space<vmem>>, vector<1x128xf32>
    tpu.vector_store %arg9[%c1, %c0_158], %425 {strides = array<i32>} : memref<8x512xf32, #tpu.memory_space<vmem>>, vector<1x128xf32>,
    %427 = vector.extract_strided_slice %421 {offsets = [1, 0], sizes = [1, 256], strides = [1, 1]} : vector<16x256xf32> to vector<1x256xf32>
    %428 = vector.extract_strided_slice %427 {offsets = [0, 0], sizes = [1, 128], strides = [1, 1]} : vector<1x256xf32> to vector<1x128xf32>
    %c0_159 = arith.constant 0 : index
    %c128 = arith.constant 128 : index
    %429 = vector.load %arg9[%c0_159, %c128] : memref<8x512xf32, #tpu.memory_space<vmem>>, vector<1x128xf32>
    tpu.vector_store %arg9[%c0_159, %c128], %428 {strides = array<i32>} : memref<8x512xf32, #tpu.memory_space<vmem>>, vector<1x128xf32>,
    %430 = vector.extract_strided_slice %427 {offsets = [0, 128], sizes = [1, 128], strides = [1, 1]} : vector<1x256xf32> to vector<1x128xf32>
    %c1_160 = arith.constant 1 : index
    %c128_161 = arith.constant 128 : index
    %431 = vector.load %arg9[%c1_160, %c128_161] : memref<8x512xf32, #tpu.memory_space<vmem>>, vector<1x128xf32>
    tpu.vector_store %arg9[%c1_160, %c128_161], %430 {strides = array<i32>} : memref<8x512xf32, #tpu.memory_space<vmem>>, vector<1x128xf32>,
    %432 = vector.extract_strided_slice %421 {offsets = [2, 0], sizes = [1, 256], strides = [1, 1]} : vector<16x256xf32> to vector<1x256xf32>
    %433 = vector.extract_strided_slice %432 {offsets = [0, 0], sizes = [1, 128], strides = [1, 1]} : vector<1x256xf32> to vector<1x128xf32>
    %c0_162 = arith.constant 0 : index
    %c256 = arith.constant 256 : index
    %434 = vector.load %arg9[%c0_162, %c256] : memref<8x512xf32, #tpu.memory_space<vmem>>, vector<1x128xf32>
    tpu.vector_store %arg9[%c0_162, %c256], %433 {strides = array<i32>} : memref<8x512xf32, #tpu.memory_space<vmem>>, vector<1x128xf32>,
    %435 = vector.extract_strided_slice %432 {offsets = [0, 128], sizes = [1, 128], strides = [1, 1]} : vector<1x256xf32> to vector<1x128xf32>
    %c1_163 = arith.constant 1 : index
    %c256_164 = arith.constant 256 : index
    %436 = vector.load %arg9[%c1_163, %c256_164] : memref<8x512xf32, #tpu.memory_space<vmem>>, vector<1x128xf32>
    tpu.vector_store %arg9[%c1_163, %c256_164], %435 {strides = array<i32>} : memref<8x512xf32, #tpu.memory_space<vmem>>, vector<1x128xf32>,
    %437 = vector.extract_strided_slice %421 {offsets = [3, 0], sizes = [1, 256], strides = [1, 1]} : vector<16x256xf32> to vector<1x256xf32>
    %438 = vector.extract_strided_slice %437 {offsets = [0, 0], sizes = [1, 128], strides = [1, 1]} : vector<1x256xf32> to vector<1x128xf32>
    %c0_165 = arith.constant 0 : index
    %c384 = arith.constant 384 : index
    %439 = vector.load %arg9[%c0_165, %c384] : memref<8x512xf32, #tpu.memory_space<vmem>>, vector<1x128xf32>
    tpu.vector_store %arg9[%c0_165, %c384], %438 {strides = array<i32>} : memref<8x512xf32, #tpu.memory_space<vmem>>, vector<1x128xf32>,
    %440 = vector.extract_strided_slice %437 {offsets = [0, 128], sizes = [1, 128], strides = [1, 1]} : vector<1x256xf32> to vector<1x128xf32>
    %c1_166 = arith.constant 1 : index
    %c384_167 = arith.constant 384 : index
    %441 = vector.load %arg9[%c1_166, %c384_167] : memref<8x512xf32, #tpu.memory_space<vmem>>, vector<1x128xf32>
    tpu.vector_store %arg9[%c1_166, %c384_167], %440 {strides = array<i32>} : memref<8x512xf32, #tpu.memory_space<vmem>>, vector<1x128xf32>,
    %442 = vector.extract_strided_slice %421 {offsets = [4, 0], sizes = [1, 256], strides = [1, 1]} : vector<16x256xf32> to vector<1x256xf32>
    %443 = vector.extract_strided_slice %442 {offsets = [0, 0], sizes = [1, 128], strides = [1, 1]} : vector<1x256xf32> to vector<1x128xf32>
    %c2 = arith.constant 2 : index
    %c0_168 = arith.constant 0 : index
    %444 = vector.load %arg9[%c2, %c0_168] : memref<8x512xf32, #tpu.memory_space<vmem>>, vector<1x128xf32>
    tpu.vector_store %arg9[%c2, %c0_168], %443 {strides = array<i32>} : memref<8x512xf32, #tpu.memory_space<vmem>>, vector<1x128xf32>,
    %445 = vector.extract_strided_slice %442 {offsets = [0, 128], sizes = [1, 128], strides = [1, 1]} : vector<1x256xf32> to vector<1x128xf32>
    %c3 = arith.constant 3 : index
    %c0_169 = arith.constant 0 : index
    %446 = vector.load %arg9[%c3, %c0_169] : memref<8x512xf32, #tpu.memory_space<vmem>>, vector<1x128xf32>
    tpu.vector_store %arg9[%c3, %c0_169], %445 {strides = array<i32>} : memref<8x512xf32, #tpu.memory_space<vmem>>, vector<1x128xf32>,
    %447 = vector.extract_strided_slice %421 {offsets = [5, 0], sizes = [1, 256], strides = [1, 1]} : vector<16x256xf32> to vector<1x256xf32>
    %448 = vector.extract_strided_slice %447 {offsets = [0, 0], sizes = [1, 128], strides = [1, 1]} : vector<1x256xf32> to vector<1x128xf32>
    %c2_170 = arith.constant 2 : index
    %c128_171 = arith.constant 128 : index
    %449 = vector.load %arg9[%c2_170, %c128_171] : memref<8x512xf32, #tpu.memory_space<vmem>>, vector<1x128xf32>
    tpu.vector_store %arg9[%c2_170, %c128_171], %448 {strides = array<i32>} : memref<8x512xf32, #tpu.memory_space<vmem>>, vector<1x128xf32>,
    %450 = vector.extract_strided_slice %447 {offsets = [0, 128], sizes = [1, 128], strides = [1, 1]} : vector<1x256xf32> to vector<1x128xf32>
    %c3_172 = arith.constant 3 : index
    %c128_173 = arith.constant 128 : index
    %451 = vector.load %arg9[%c3_172, %c128_173] : memref<8x512xf32, #tpu.memory_space<vmem>>, vector<1x128xf32>
    tpu.vector_store %arg9[%c3_172, %c128_173], %450 {strides = array<i32>} : memref<8x512xf32, #tpu.memory_space<vmem>>, vector<1x128xf32>,
    %452 = vector.extract_strided_slice %421 {offsets = [6, 0], sizes = [1, 256], strides = [1, 1]} : vector<16x256xf32> to vector<1x256xf32>
    %453 = vector.extract_strided_slice %452 {offsets = [0, 0], sizes = [1, 128], strides = [1, 1]} : vector<1x256xf32> to vector<1x128xf32>
    %c2_174 = arith.constant 2 : index
    %c256_175 = arith.constant 256 : index
    %454 = vector.load %arg9[%c2_174, %c256_175] : memref<8x512xf32, #tpu.memory_space<vmem>>, vector<1x128xf32>
    tpu.vector_store %arg9[%c2_174, %c256_175], %453 {strides = array<i32>} : memref<8x512xf32, #tpu.memory_space<vmem>>, vector<1x128xf32>,
    %455 = vector.extract_strided_slice %452 {offsets = [0, 128], sizes = [1, 128], strides = [1, 1]} : vector<1x256xf32> to vector<1x128xf32>
    %c3_176 = arith.constant 3 : index
    %c256_177 = arith.constant 256 : index
    %456 = vector.load %arg9[%c3_176, %c256_177] : memref<8x512xf32, #tpu.memory_space<vmem>>, vector<1x128xf32>
    tpu.vector_store %arg9[%c3_176, %c256_177], %455 {strides = array<i32>} : memref<8x512xf32, #tpu.memory_space<vmem>>, vector<1x128xf32>,
    %457 = vector.extract_strided_slice %421 {offsets = [7, 0], sizes = [1, 256], strides = [1, 1]} : vector<16x256xf32> to vector<1x256xf32>
    %458 = vector.extract_strided_slice %457 {offsets = [0, 0], sizes = [1, 128], strides = [1, 1]} : vector<1x256xf32> to vector<1x128xf32>
    %c2_178 = arith.constant 2 : index
    %c384_179 = arith.constant 384 : index
    %459 = vector.load %arg9[%c2_178, %c384_179] : memref<8x512xf32, #tpu.memory_space<vmem>>, vector<1x128xf32>
    tpu.vector_store %arg9[%c2_178, %c384_179], %458 {strides = array<i32>} : memref<8x512xf32, #tpu.memory_space<vmem>>, vector<1x128xf32>,
    %460 = vector.extract_strided_slice %457 {offsets = [0, 128], sizes = [1, 128], strides = [1, 1]} : vector<1x256xf32> to vector<1x128xf32>
    %c3_180 = arith.constant 3 : index
    %c384_181 = arith.constant 384 : index
    %461 = vector.load %arg9[%c3_180, %c384_181] : memref<8x512xf32, #tpu.memory_space<vmem>>, vector<1x128xf32>
    tpu.vector_store %arg9[%c3_180, %c384_181], %460 {strides = array<i32>} : memref<8x512xf32, #tpu.memory_space<vmem>>, vector<1x128xf32>,
    %462 = vector.extract_strided_slice %421 {offsets = [8, 0], sizes = [1, 256], strides = [1, 1]} : vector<16x256xf32> to vector<1x256xf32>
    %463 = vector.extract_strided_slice %462 {offsets = [0, 0], sizes = [1, 128], strides = [1, 1]} : vector<1x256xf32> to vector<1x128xf32>
    %c4 = arith.constant 4 : index
    %c0_182 = arith.constant 0 : index
    %464 = vector.load %arg9[%c4, %c0_182] : memref<8x512xf32, #tpu.memory_space<vmem>>, vector<1x128xf32>
    tpu.vector_store %arg9[%c4, %c0_182], %463 {strides = array<i32>} : memref<8x512xf32, #tpu.memory_space<vmem>>, vector<1x128xf32>,
    %465 = vector.extract_strided_slice %462 {offsets = [0, 128], sizes = [1, 128], strides = [1, 1]} : vector<1x256xf32> to vector<1x128xf32>
    %c5 = arith.constant 5 : index
    %c0_183 = arith.constant 0 : index
    %466 = vector.load %arg9[%c5, %c0_183] : memref<8x512xf32, #tpu.memory_space<vmem>>, vector<1x128xf32>
    tpu.vector_store %arg9[%c5, %c0_183], %465 {strides = array<i32>} : memref<8x512xf32, #tpu.memory_space<vmem>>, vector<1x128xf32>,
    %467 = vector.extract_strided_slice %421 {offsets = [9, 0], sizes = [1, 256], strides = [1, 1]} : vector<16x256xf32> to vector<1x256xf32>
    %468 = vector.extract_strided_slice %467 {offsets = [0, 0], sizes = [1, 128], strides = [1, 1]} : vector<1x256xf32> to vector<1x128xf32>
    %c4_184 = arith.constant 4 : index
    %c128_185 = arith.constant 128 : index
    %469 = vector.load %arg9[%c4_184, %c128_185] : memref<8x512xf32, #tpu.memory_space<vmem>>, vector<1x128xf32>
    tpu.vector_store %arg9[%c4_184, %c128_185], %468 {strides = array<i32>} : memref<8x512xf32, #tpu.memory_space<vmem>>, vector<1x128xf32>,
    %470 = vector.extract_strided_slice %467 {offsets = [0, 128], sizes = [1, 128], strides = [1, 1]} : vector<1x256xf32> to vector<1x128xf32>
    %c5_186 = arith.constant 5 : index
    %c128_187 = arith.constant 128 : index
    %471 = vector.load %arg9[%c5_186, %c128_187] : memref<8x512xf32, #tpu.memory_space<vmem>>, vector<1x128xf32>
    tpu.vector_store %arg9[%c5_186, %c128_187], %470 {strides = array<i32>} : memref<8x512xf32, #tpu.memory_space<vmem>>, vector<1x128xf32>,
    %472 = vector.extract_strided_slice %421 {offsets = [10, 0], sizes = [1, 256], strides = [1, 1]} : vector<16x256xf32> to vector<1x256xf32>
    %473 = vector.extract_strided_slice %472 {offsets = [0, 0], sizes = [1, 128], strides = [1, 1]} : vector<1x256xf32> to vector<1x128xf32>
    %c4_188 = arith.constant 4 : index
    %c256_189 = arith.constant 256 : index
    %474 = vector.load %arg9[%c4_188, %c256_189] : memref<8x512xf32, #tpu.memory_space<vmem>>, vector<1x128xf32>
    tpu.vector_store %arg9[%c4_188, %c256_189], %473 {strides = array<i32>} : memref<8x512xf32, #tpu.memory_space<vmem>>, vector<1x128xf32>,
    %475 = vector.extract_strided_slice %472 {offsets = [0, 128], sizes = [1, 128], strides = [1, 1]} : vector<1x256xf32> to vector<1x128xf32>
    %c5_190 = arith.constant 5 : index
    %c256_191 = arith.constant 256 : index
    %476 = vector.load %arg9[%c5_190, %c256_191] : memref<8x512xf32, #tpu.memory_space<vmem>>, vector<1x128xf32>
    tpu.vector_store %arg9[%c5_190, %c256_191], %475 {strides = array<i32>} : memref<8x512xf32, #tpu.memory_space<vmem>>, vector<1x128xf32>,
    %477 = vector.extract_strided_slice %421 {offsets = [11, 0], sizes = [1, 256], strides = [1, 1]} : vector<16x256xf32> to vector<1x256xf32>
    %478 = vector.extract_strided_slice %477 {offsets = [0, 0], sizes = [1, 128], strides = [1, 1]} : vector<1x256xf32> to vector<1x128xf32>
    %c4_192 = arith.constant 4 : index
    %c384_193 = arith.constant 384 : index
    %479 = vector.load %arg9[%c4_192, %c384_193] : memref<8x512xf32, #tpu.memory_space<vmem>>, vector<1x128xf32>
    tpu.vector_store %arg9[%c4_192, %c384_193], %478 {strides = array<i32>} : memref<8x512xf32, #tpu.memory_space<vmem>>, vector<1x128xf32>,
    %480 = vector.extract_strided_slice %477 {offsets = [0, 128], sizes = [1, 128], strides = [1, 1]} : vector<1x256xf32> to vector<1x128xf32>
    %c5_194 = arith.constant 5 : index
    %c384_195 = arith.constant 384 : index
    %481 = vector.load %arg9[%c5_194, %c384_195] : memref<8x512xf32, #tpu.memory_space<vmem>>, vector<1x128xf32>
    tpu.vector_store %arg9[%c5_194, %c384_195], %480 {strides = array<i32>} : memref<8x512xf32, #tpu.memory_space<vmem>>, vector<1x128xf32>,
    %482 = vector.extract_strided_slice %421 {offsets = [12, 0], sizes = [1, 256], strides = [1, 1]} : vector<16x256xf32> to vector<1x256xf32>
    %483 = vector.extract_strided_slice %482 {offsets = [0, 0], sizes = [1, 128], strides = [1, 1]} : vector<1x256xf32> to vector<1x128xf32>
    %c6 = arith.constant 6 : index
    %c0_196 = arith.constant 0 : index
    %484 = vector.load %arg9[%c6, %c0_196] : memref<8x512xf32, #tpu.memory_space<vmem>>, vector<1x128xf32>
    tpu.vector_store %arg9[%c6, %c0_196], %483 {strides = array<i32>} : memref<8x512xf32, #tpu.memory_space<vmem>>, vector<1x128xf32>,
    %485 = vector.extract_strided_slice %482 {offsets = [0, 128], sizes = [1, 128], strides = [1, 1]} : vector<1x256xf32> to vector<1x128xf32>
    %c7 = arith.constant 7 : index
    %c0_197 = arith.constant 0 : index
    %486 = vector.load %arg9[%c7, %c0_197] : memref<8x512xf32, #tpu.memory_space<vmem>>, vector<1x128xf32>
    tpu.vector_store %arg9[%c7, %c0_197], %485 {strides = array<i32>} : memref<8x512xf32, #tpu.memory_space<vmem>>, vector<1x128xf32>,
    %487 = vector.extract_strided_slice %421 {offsets = [13, 0], sizes = [1, 256], strides = [1, 1]} : vector<16x256xf32> to vector<1x256xf32>
    %488 = vector.extract_strided_slice %487 {offsets = [0, 0], sizes = [1, 128], strides = [1, 1]} : vector<1x256xf32> to vector<1x128xf32>
    %c6_198 = arith.constant 6 : index
    %c128_199 = arith.constant 128 : index
    %489 = vector.load %arg9[%c6_198, %c128_199] : memref<8x512xf32, #tpu.memory_space<vmem>>, vector<1x128xf32>
    tpu.vector_store %arg9[%c6_198, %c128_199], %488 {strides = array<i32>} : memref<8x512xf32, #tpu.memory_space<vmem>>, vector<1x128xf32>,
    %490 = vector.extract_strided_slice %487 {offsets = [0, 128], sizes = [1, 128], strides = [1, 1]} : vector<1x256xf32> to vector<1x128xf32>
    %c7_200 = arith.constant 7 : index
    %c128_201 = arith.constant 128 : index
    %491 = vector.load %arg9[%c7_200, %c128_201] : memref<8x512xf32, #tpu.memory_space<vmem>>, vector<1x128xf32>
    tpu.vector_store %arg9[%c7_200, %c128_201], %490 {strides = array<i32>} : memref<8x512xf32, #tpu.memory_space<vmem>>, vector<1x128xf32>,
    %492 = vector.extract_strided_slice %421 {offsets = [14, 0], sizes = [1, 256], strides = [1, 1]} : vector<16x256xf32> to vector<1x256xf32>
    %493 = vector.extract_strided_slice %492 {offsets = [0, 0], sizes = [1, 128], strides = [1, 1]} : vector<1x256xf32> to vector<1x128xf32>
    %c6_202 = arith.constant 6 : index
    %c256_203 = arith.constant 256 : index
    %494 = vector.load %arg9[%c6_202, %c256_203] : memref<8x512xf32, #tpu.memory_space<vmem>>, vector<1x128xf32>
    tpu.vector_store %arg9[%c6_202, %c256_203], %493 {strides = array<i32>} : memref<8x512xf32, #tpu.memory_space<vmem>>, vector<1x128xf32>,
    %495 = vector.extract_strided_slice %492 {offsets = [0, 128], sizes = [1, 128], strides = [1, 1]} : vector<1x256xf32> to vector<1x128xf32>
    %c7_204 = arith.constant 7 : index
    %c256_205 = arith.constant 256 : index
    %496 = vector.load %arg9[%c7_204, %c256_205] : memref<8x512xf32, #tpu.memory_space<vmem>>, vector<1x128xf32>
    tpu.vector_store %arg9[%c7_204, %c256_205], %495 {strides = array<i32>} : memref<8x512xf32, #tpu.memory_space<vmem>>, vector<1x128xf32>,
    %497 = vector.extract_strided_slice %421 {offsets = [15, 0], sizes = [1, 256], strides = [1, 1]} : vector<16x256xf32> to vector<1x256xf32>
    %498 = vector.extract_strided_slice %497 {offsets = [0, 0], sizes = [1, 128], strides = [1, 1]} : vector<1x256xf32> to vector<1x128xf32>
    %c6_206 = arith.constant 6 : index
    %c384_207 = arith.constant 384 : index
    %499 = vector.load %arg9[%c6_206, %c384_207] : memref<8x512xf32, #tpu.memory_space<vmem>>, vector<1x128xf32>
    tpu.vector_store %arg9[%c6_206, %c384_207], %498 {strides = array<i32>} : memref<8x512xf32, #tpu.memory_space<vmem>>, vector<1x128xf32>,
    %500 = vector.extract_strided_slice %497 {offsets = [0, 128], sizes = [1, 128], strides = [1, 1]} : vector<1x256xf32> to vector<1x128xf32>
    %c7_208 = arith.constant 7 : index
    %c384_209 = arith.constant 384 : index
    %501 = vector.load %arg9[%c7_208, %c384_209] : memref<8x512xf32, #tpu.memory_space<vmem>>, vector<1x128xf32>
    tpu.vector_store %arg9[%c7_208, %c384_209], %500 {strides = array<i32>} : memref<8x512xf32, #tpu.memory_space<vmem>>, vector<1x128xf32>,
    %c0_210 = arith.constant 0 : index
    %c0_211 = arith.constant 0 : index
    %502 = vector.load %arg9[%c0_210, %c0_211] : memref<8x512xf32, #tpu.memory_space<vmem>>, vector<8x512xf32>
    %cst_212 = arith.constant 0.000000e+00 : f32
    %503 = vector.broadcast %cst_212 : f32 to vector<1x512xf32>
    %504 = vector.extract_strided_slice %502 {offsets = [0, 0], sizes = [7, 512], strides = [1, 1]} : vector<8x512xf32> to vector<7x512xf32>
    %505 = tpu.concatenate %503, %504 in 0 : vector<1x512xf32>, vector<7x512xf32> -> vector<8x512xf32>
    %506 = vector.extract_strided_slice %502 {offsets = [1, 0], sizes = [7, 512], strides = [1, 1]} : vector<8x512xf32> to vector<7x512xf32>
    %507 = tpu.concatenate %506, %503 in 0 : vector<7x512xf32>, vector<1x512xf32> -> vector<8x512xf32>
    %508 = tpu.concatenate %505, %502 in 1 : vector<8x512xf32>, vector<8x512xf32> -> vector<8x1024xf32>
    %c0_213 = arith.constant 0 : index
    %c0_214 = arith.constant 0 : index
    %c0_215 = arith.constant 0 : index
    %509 = vector.load %arg7[%c0_213, %c0_214, %c0_215] : memref<2x1024x16xf32, #tpu.memory_space<vmem>>, vector<1x1024x16xf32>
    %510 = vector.shape_cast %509 : vector<1x1024x16xf32> to vector<1024x16xf32>
    %cst_216 = arith.constant dense<0.000000e+00> : vector<8x16xf32>
    %511 = tpu.matmul %508, %510, %cst_216 {dimension_numbers = #tpu.dot_dimension_numbers<[1], [0], [0], [1], [0, 0, 1, 1], [], []>} : vector<8x1024xf32>, vector<1024x16xf32>, vector<8x16xf32> -> vector<8x16xf32>
    %512 = math.tanh %511 : vector<8x16xf32>
    %513 = tpu.concatenate %502, %507 in 1 : vector<8x512xf32>, vector<8x512xf32> -> vector<8x1024xf32>
    %c1_217 = arith.constant 1 : index
    %c0_218 = arith.constant 0 : index
    %c0_219 = arith.constant 0 : index
    %514 = vector.load %arg7[%c1_217, %c0_218, %c0_219] : memref<2x1024x16xf32, #tpu.memory_space<vmem>>, vector<1x1024x16xf32>
    %515 = vector.shape_cast %514 : vector<1x1024x16xf32> to vector<1024x16xf32>
    %cst_220 = arith.constant dense<0.000000e+00> : vector<8x16xf32>
    %516 = tpu.matmul %513, %515, %cst_220 {dimension_numbers = #tpu.dot_dimension_numbers<[1], [0], [0], [1], [0, 0, 1, 1], [], []>} : vector<8x1024xf32>, vector<1024x16xf32>, vector<8x16xf32> -> vector<8x16xf32>
    %517 = math.tanh %516 : vector<8x16xf32>
    %c0_221 = arith.constant 0 : index
    %c0_222 = arith.constant 0 : index
    %c0_223 = arith.constant 0 : index
    %c0_224 = arith.constant 0 : index
    %518 = vector.load %arg8[%c0_221, %c0_222, %c0_223, %c0_224] : memref<1x2x8x16xf32, #tpu.memory_space<vmem>>, vector<1x1x8x16xf32>
    %519 = vector.shape_cast %518 : vector<1x1x8x16xf32> to vector<8x16xf32>
    %520 = vector.shape_cast %512 : vector<8x16xf32> to vector<1x1x8x16xf32>
    tpu.vector_store %arg8[%c0_221, %c0_222, %c0_223, %c0_224], %520 {strides = array<i32>} : memref<1x2x8x16xf32, #tpu.memory_space<vmem>>, vector<1x1x8x16xf32>,
    %c0_225 = arith.constant 0 : index
    %c1_226 = arith.constant 1 : index
    %c0_227 = arith.constant 0 : index
    %c0_228 = arith.constant 0 : index
    %521 = vector.load %arg8[%c0_225, %c1_226, %c0_227, %c0_228] : memref<1x2x8x16xf32, #tpu.memory_space<vmem>>, vector<1x1x8x16xf32>
    %522 = vector.shape_cast %521 : vector<1x1x8x16xf32> to vector<8x16xf32>
    %523 = vector.shape_cast %517 : vector<8x16xf32> to vector<1x1x8x16xf32>
    tpu.vector_store %arg8[%c0_225, %c1_226, %c0_227, %c0_228], %523 {strides = array<i32>} : memref<1x2x8x16xf32, #tpu.memory_space<vmem>>, vector<1x1x8x16xf32>,
    return
  }
  func.func @transform_0(%arg0: i32) -> (i32, i32, i32) {
    %c0_i32 = arith.constant 0 : i32
    %c0_i32_0 = arith.constant 0 : i32
    %c0_i32_1 = arith.constant 0 : i32
    return %arg0, %c0_i32, %c0_i32_0 : i32, i32, i32
  }
  func.func @transform_1(%arg0: i32) -> (i32, i32) {
    %c0_i32 = arith.constant 0 : i32
    %c0_i32_0 = arith.constant 0 : i32
    %c0_i32_1 = arith.constant 0 : i32
    return %c0_i32, %c0_i32_0 : i32, i32
  }
  func.func @transform_2(%arg0: i32) -> (i32, i32) {
    %c0_i32 = arith.constant 0 : i32
    %c0_i32_0 = arith.constant 0 : i32
    %c0_i32_1 = arith.constant 0 : i32
    return %c0_i32, %c0_i32_0 : i32, i32
  }
  func.func @transform_3(%arg0: i32) -> (i32, i32) {
    %c0_i32 = arith.constant 0 : i32
    %c0_i32_0 = arith.constant 0 : i32
    %c0_i32_1 = arith.constant 0 : i32
    return %c0_i32, %c0_i32_0 : i32, i32
  }
  func.func @transform_4(%arg0: i32) -> (i32, i32) {
    %c0_i32 = arith.constant 0 : i32
    %c0_i32_0 = arith.constant 0 : i32
    %c0_i32_1 = arith.constant 0 : i32
    return %c0_i32, %c0_i32_0 : i32, i32
  }
  func.func @transform_5(%arg0: i32) -> (i32, i32) {
    %c0_i32 = arith.constant 0 : i32
    %c0_i32_0 = arith.constant 0 : i32
    %c0_i32_1 = arith.constant 0 : i32
    return %c0_i32, %c0_i32_0 : i32, i32
  }
  func.func @transform_6(%arg0: i32) -> (i32, i32, i32) {
    %c0_i32 = arith.constant 0 : i32
    %c0_i32_0 = arith.constant 0 : i32
    %c0_i32_1 = arith.constant 0 : i32
    %c0_i32_2 = arith.constant 0 : i32
    return %c0_i32, %c0_i32_0, %c0_i32_1 : i32, i32, i32
  }
  func.func @transform_7(%arg0: i32) -> (i32, i32, i32, i32) {
    %c0_i32 = arith.constant 0 : i32
    %c0_i32_0 = arith.constant 0 : i32
    %c0_i32_1 = arith.constant 0 : i32
    %c0_i32_2 = arith.constant 0 : i32
    return %arg0, %c0_i32, %c0_i32_0, %c0_i32_1 : i32, i32, i32, i32
  }
}

</mosaic_0001>

<bundles_post_ra>
// kernel: g21_forward.1
= control target key start
LH: loop header
LB: loop body
LE: loop exit
PB: predicated region body
PF: predicated region fallthrough
CT: control target
= control target key end

     0   :  { %s4209_s24 = smov 0   ;;  %s8371_s0 = inlined_call_operand.vmem [shape: f32[2,64,16], index: 0, kind: input, shape index: {}]   ;;  %s8372_s1 = inlined_call_operand.vmem [shape: f32[16,64], index: 1, kind: input, shape index: {}]   ;;  %s8373_s2 = inlined_call_operand.vmem [shape: f32[2304,128], index: 2, kind: input, shape index: {}]   ;;  %s8374_s3 = inlined_call_operand.vmem [shape: f32[1152,128], index: 3, kind: input, shape index: {}]   ;;  %s8375_s4 = inlined_call_operand.vmem [shape: f32[1152,128], index: 4, kind: input, shape index: {}]   ;;  %s8376_s5 = inlined_call_operand.vmem [shape: f32[1152,256], index: 5, kind: input, shape index: {}]   ;;  %s8377_s6 = inlined_call_operand.vmem [shape: f32[2,1024,16], index: 6, kind: input, shape index: {}]   ;;  %s8378_s7 = inlined_call_operand.vmem [shape: f32[2,2,8,16], index: 7, kind: output, shape index: {}]  }
   0x1 LB: > { %s3877_s25 = sadd.s32 4294967295, %s4164_s24   ;;  %p3881_p0 = scmp.ge.s32.totalorder %s4164_s24, 1  ;;  %s4164_s24 = sphi %s4209_s24, %s17_s24  }
   0x2   : > { %p237_p1 = scmp.lt.s32.totalorder %s4164_s24, 3 }
   0x4   : > { %p238_p2 = pnand %p3881_p0, %p237_p1 }
   0x5   : > { %p269_p3 = scmp.lt.s32.totalorder (!%p238_p2), %s3877_s25, 1  ;;  %s4167_s23 = smov (!%p238_p2), 64  }
   0x6   : > { %241 = sbr.rel (%p238_p2) target bundleno = 1893 (0x765), region = 48 }
   0xb   : > { %v288_v0 = vld [vmem:[%s8372_s1 + $0x8] sm:$0xff]  ;;  %v287_v1 = vld [vmem:[%s8372_s1] sm:$0xff]  ;;  %s8395_s25 = smov (!%p269_p3, %s3877_s25), 1  ;;  %vm8379_vm0 = vcmask 130048   ;;  %vm355_vm1 = vcmask 523264   ;;  %v4166_v20 = vmov 64.0  }
   0xc   : > { %328 = vmatpush.msra.mxu0 %v288_v0  ;;  %s4127_s30 = sshll.u32 %s8395_s25, 6  ;;  %4140 = vrcp.f32 %v4166_v20  ;;  %vm520_vm13 = vcmask 1044480   ;;  %vm571_vm15 = vcmask 1040384   ;;  %s4128_s26 = sshll.u32 %s8395_s25, 4 }
   0xd   : > { %s273_s10 = scalar_lea.vmem %s8371_s0, %s4127_s30  ;;  %s278_s28 = scalar_lea.vmem %s8378_s7, %s4128_s26 }
   0xe   : > { %329 = vmatpush.msra.mxu0 %v287_v1  ;;  %v279_v2 = vld [vmem:[%s273_s10] sm:$0xff]  ;;  %v280_v3 = vld [vmem:[%s273_s10 + $0x8] sm:$0xff]  ;;  %v281_v4 = vld [vmem:[%s273_s10 + $0x10] sm:$0xff] }
   0xf   : > { %3886 = vmatmul.msk.f32.vlgmr.msra.gmra.mxu0 %vm8379_vm0, %v279_v2  ;;  %v282_v5 = vld [vmem:[%s273_s10 + $0x18] sm:$0xff]  ;;  %v283_v6 = vld [vmem:[%s273_s10 + $0x20] sm:$0xff]  ;;  %v284_v7 = vld [vmem:[%s273_s10 + $0x28] sm:$0xff] }
  0x10   : > { %v285_v8 = vld [vmem:[%s273_s10 + $0x30] sm:$0xff]  ;;  %v286_v9 = vld [vmem:[%s273_s10 + $0x38] sm:$0xff] }
  0x12   : > { %v4141_v36 = vpop.eup %4140 }
  0x13   : > { %v378_v46 = vmul.f32 64.0, %v4141_v36  ;;  %vm382_vm2 = vweird.f32 %v4141_v36 }
  0x15   : > { %v379_v54 = vsub.f32 1.0, %v378_v46  ;;  %v732_v46 = vld [vmem:[%s8373_s2 + $0x358] sm:$0xff] }
  0x17   : > { %3887 = vmatmul.msk.f32.gmra.mxu0 %vm8379_vm0, %v280_v3  ;;  %v380_v61 = vmul.f32 %v4141_v36, %v379_v54  ;;  %v634_v54 = vld [vmem:[%s8373_s2 + $0x48] sm:$0xff] }
  0x19   : > { %v381_v2 = vadd.f32 %v4141_v36, %v380_v61  ;;  %v648_v61 = vld [vmem:[%s8373_s2 + $0xb8] sm:$0xff] }
  0x1f   : > { %3888 = vmatmul.msk.f32.gmra.mxu0 %vm8379_vm0, %v281_v4 }
  0x27   : > { %3889 = vmatmul.msk.f32.gmra.mxu0 %vm8379_vm0, %v282_v5 }
  0x2f   : > { %3890 = vmatmul.msk.f32.gmra.mxu0 %vm8379_vm0, %v283_v6 }
  0x37   : > { %3891 = vmatmul.msk.f32.gmra.mxu0 %vm8379_vm0, %v284_v7  ;;  %v4293_v7 = vsel %vm382_vm2, %v4141_v36, %v381_v2  ;;  %v669_v36 = vld [vmem:[%s8373_s2 + $0x160] sm:$0xff]  ;;  %v647_v2 = vld [vmem:[%s8373_s2 + $0xb0] sm:$0xff]  ;;  %vm552_vm2 = vcmask 1042432  }
  0x3f   : > { %3892 = vmatmul.msk.f32.gmra.mxu0 %vm8379_vm0, %v285_v8 }
  0x47   : > { %3893 = vmatmul.msk.f32.gmra.mxu0 %vm8379_vm0, %v286_v9 }
  0x8c   : > { %v4237_v10 = vpop.f32.mrf.mxu0 }
  0x8d   : > { %v385_v17 = vmul.f32 %v4237_v10, %v4237_v10  ;;  %v356_v21 = vsel %vm355_vm1, %v4237_v10, 0.0 }
  0x8f   : > { %v393_v26 = vsel %vm355_vm1, %v385_v17, 0.0 }
  0x94   : > { %v4239_v11 = vpop.f32.mrf.mxu0 }
  0x95   : > { %v386_v16 = vmul.f32 %v4239_v11, %v4239_v11  ;;  %v357_v18 = vsel %vm355_vm1, %v4239_v11, 0.0 }
  0x96   : > { %v358_v25 = vadd.f32 %v357_v18, %v356_v21 }
  0x97   : > { %v394_v22 = vsel %vm355_vm1, %v386_v16, 0.0 }
  0x98   : > { %v395_v30 = vadd.f32 %v394_v22, %v393_v26  ;;  %v640_v26 = vld [vmem:[%s8373_s2 + $0x78] sm:$0xff] }
  0x99   : > { %913 = vmatpush.msra.mxu1 %v640_v26 }
  0x9c   : > { %v4241_v12 = vpop.f32.mrf.mxu0 }
  0x9d   : > { %v387_v19 = vmul.f32 %v4241_v12, %v4241_v12  ;;  %v359_v23 = vsel %vm355_vm1, %v4241_v12, 0.0 }
  0x9e   : > { %v360_v31 = vadd.f32 %v359_v23, %v358_v25  ;;  %v656_v23 = vld [vmem:[%s8373_s2 + $0xf8] sm:$0xff] }
  0x9f   : > { %v396_v27 = vsel %vm355_vm1, %v387_v19, 0.0  ;;  %936 = vmatpush.msra.mxu2 %v656_v23  ;;  %v672_v25 = vld [vmem:[%s8373_s2 + $0x178] sm:$0xff] }
  0xa0   : > { %v397_v37 = vadd.f32 %v396_v27, %v395_v30  ;;  %v654_v27 = vld [vmem:[%s8373_s2 + $0xe8] sm:$0xff]  ;;  %959 = vmatpush.msra.mxu3 %v672_v25  ;;  %v639_v30 = vld [vmem:[%s8373_s2 + $0x70] sm:$0xff] }
  0xa1   : > { %914 = vmatpush.msra.mxu1 %v639_v30 }
  0xa4   : > { %v4243_v13 = vpop.f32.mrf.mxu0 }
  0xa5   : > { %v388_v24 = vmul.f32 %v4243_v13, %v4243_v13  ;;  %v361_v28 = vsel %vm355_vm1, %v4243_v13, 0.0 }
  0xa6   : > { %v362_v38 = vadd.f32 %v361_v28, %v360_v31  ;;  %v671_v28 = vld [vmem:[%s8373_s2 + $0x170] sm:$0xff]  ;;  %v670_v31 = vld [vmem:[%s8373_s2 + $0x168] sm:$0xff] }
  0xa7   : > { %v398_v33 = vsel %vm355_vm1, %v388_v24, 0.0  ;;  %v655_v24 = vld [vmem:[%s8373_s2 + $0xf0] sm:$0xff]  ;;  %960 = vmatpush.msra.mxu3 %v671_v28  ;;  %v644_v28 = vld [vmem:[%s8373_s2 + $0x98] sm:$0xff] }
  0xa8   : > { %v399_v42 = vadd.f32 %v398_v33, %v397_v37  ;;  %937 = vmatpush.msra.mxu2 %v655_v24  ;;  %v653_v33 = vld [vmem:[%s8373_s2 + $0xe0] sm:$0xff]  ;;  %v734_v37 = vld [vmem:[%s8373_s2 + $0x368] sm:$0xff] }
  0xa9   : > { %961 = vmatpush.msra.mxu3 %v670_v31 }
  0xaa   : > { %938 = vmatpush.msra.mxu2 %v654_v27 }
  0xab   : > { %962 = vmatpush.msra.mxu3 %v669_v36  ;;  %v629_v36 = vld [vmem:[%s8373_s2 + $0x20] sm:$0xff] }
  0xac   : > { %v4245_v14 = vpop.f32.mrf.mxu0  ;;  %939 = vmatpush.msra.mxu2 %v653_v33 }
  0xad   : > { %v389_v29 = vmul.f32 %v4245_v14, %v4245_v14  ;;  %v363_v34 = vsel %vm355_vm1, %v4245_v14, 0.0 }
  0xae   : > { %v364_v43 = vadd.f32 %v363_v34, %v362_v38  ;;  %v735_v34 = vld [vmem:[%s8373_s2 + $0x370] sm:$0xff]  ;;  %v637_v38 = vld [vmem:[%s8373_s2 + $0x60] sm:$0xff] }
  0xaf   : > { %v400_v39 = vsel %vm355_vm1, %v389_v29, 0.0  ;;  %v736_v29 = vld [vmem:[%s8373_s2 + $0x378] sm:$0xff] }
  0xb0   : > { %v401_v47 = vadd.f32 %v400_v39, %v399_v42  ;;  %1051 = vmatpush.msrb.mxu0 %v736_v29  ;;  %v652_v39 = vld [vmem:[%s8373_s2 + $0xd8] sm:$0xff]  ;;  %v661_v29 = vld [vmem:[%s8373_s2 + $0x120] sm:$0xff] }
  0xb1   : > { %v668_v42 = vld [vmem:[%s8373_s2 + $0x158] sm:$0xff]  ;;  %940 = vmatpush.msra.mxu2 %v652_v39 }
  0xb2   : > { %1052 = vmatpush.msrb.mxu0 %v735_v34  ;;  %963 = vmatpush.msra.mxu3 %v668_v42 }
  0xb4   : > { %v4247_v15 = vpop.f32.mrf.mxu0  ;;  %1053 = vmatpush.msrb.mxu0 %v734_v37  ;;  %v725_v37 = vld [vmem:[%s8373_s2 + $0x320] sm:$0xff] }
  0xb5   : > { %v390_v35 = vmul.f32 %v4247_v15, %v4247_v15  ;;  %v365_v40 = vsel %vm355_vm1, %v4247_v15, 0.0 }
  0xb6   : > { %v366_v48 = vadd.f32 %v365_v40, %v364_v43  ;;  %v733_v40 = vld [vmem:[%s8373_s2 + $0x360] sm:$0xff]  ;;  %v636_v43 = vld [vmem:[%s8373_s2 + $0x58] sm:$0xff] }
  0xb7   : > { %v402_v44 = vsel %vm355_vm1, %v390_v35, 0.0  ;;  %v638_v35 = vld [vmem:[%s8373_s2 + $0x68] sm:$0xff]  ;;  %1054 = vmatpush.msrb.mxu0 %v733_v40 }
  0xb8   : > { %v403_v50 = vadd.f32 %v402_v44, %v401_v47  ;;  %915 = vmatpush.msra.mxu1 %v638_v35  ;;  %v667_v47 = vld [vmem:[%s8373_s2 + $0x150] sm:$0xff]  ;;  %v726_v35 = vld [vmem:[%s8373_s2 + $0x328] sm:$0xff] }
  0xb9   : > { %1055 = vmatpush.msrb.mxu0 %v732_v46  ;;  %964 = vmatpush.msra.mxu3 %v667_v47  ;;  %v642_v40 = vld [vmem:[%s8373_s2 + $0x88] sm:$0xff]  ;;  %v641_v46 = vld [vmem:[%s8373_s2 + $0x80] sm:$0xff] }
  0xba   : > { %916 = vmatpush.msra.mxu1 %v637_v38  ;;  %v628_v38 = vld [vmem:[%s8373_s2 + $0x18] sm:$0xff]  ;;  %v658_v47 = vld [vmem:[%s8373_s2 + $0x108] sm:$0xff] }
  0xbc   : > { %v4270_v32 = vpop.f32.mrf.mxu0  ;;  %917 = vmatpush.msra.mxu1 %v636_v43 }
  0xbd   : > { %v391_v41 = vmul.f32 %v4270_v32, %v4270_v32  ;;  %v367_v45 = vsel %vm355_vm1, %v4270_v32, 0.0 }
  0xbe   : > { %v368_v51 = vadd.f32 %v367_v45, %v366_v48  ;;  %v651_v45 = vld [vmem:[%s8373_s2 + $0xd0] sm:$0xff] }
  0xbf   : > { %v404_v49 = vsel %vm355_vm1, %v391_v41, 0.0  ;;  %v635_v48 = vld [vmem:[%s8373_s2 + $0x50] sm:$0xff]  ;;  %941 = vmatpush.msra.mxu2 %v651_v45 }
  0xc0   : > { %v405_v56 = vadd.f32 %v404_v49, %v403_v50  ;;  %v650_v50 = vld [vmem:[%s8373_s2 + $0xc8] sm:$0xff]  ;;  %918 = vmatpush.msra.mxu1 %v635_v48  ;;  %v627_v45 = vld [vmem:[%s8373_s2 + $0x10] sm:$0xff]  ;;  %v704_v48 = vld [vmem:[%s8373_s2 + $0x278] sm:$0xff] }
  0xc1   : > { %942 = vmatpush.msra.mxu2 %v650_v50 }
  0xc2   : > { %919 = vmatpush.msra.mxu1 %v634_v54  ;;  %v657_v54 = vld [vmem:[%s8373_s2 + $0x100] sm:$0xff] }
  0xc4   : > { %v4286_v52 = vpop.f32.mrf.mxu0 }
  0xc5   : > { %v369_v53 = vsel %vm355_vm1, %v4286_v52, 0.0  ;;  %v392_v55 = vmul.f32 %v4286_v52, %v4286_v52 }
  0xc6   : > { %v370_v57 = vadd.f32 %v369_v53, %v368_v51  ;;  %v731_v51 = vld [vmem:[%s8373_s2 + $0x350] sm:$0xff]  ;;  %v666_v53 = vld [vmem:[%s8373_s2 + $0x148] sm:$0xff] }
  0xc7   : > { %v406_v58 = vsel %vm355_vm1, %v392_v55, 0.0  ;;  %1056 = vmatpush.msrb.mxu0 %v731_v51  ;;  %965 = vmatpush.msra.mxu3 %v666_v53  ;;  %v626_v53 = vld [vmem:[%s8373_s2 + $0x8] sm:$0xff] }
  0xc8   : > { %v371_v59 = vrot.slane %v370_v57, 4  ;;  %v407_v60 = vadd.f32 %v406_v58, %v405_v56  ;;  %v649_v56 = vld [vmem:[%s8373_s2 + $0xc0] sm:$0xff] }
  0xc9   : > { %v665_v58 = vld [vmem:[%s8373_s2 + $0x140] sm:$0xff]  ;;  %943 = vmatpush.msra.mxu2 %v649_v56  ;;  %v722_v56 = vld [vmem:[%s8373_s2 + $0x308] sm:$0xff] }
  0xca   : > { %v372_v62 = vadd.f32 %v371_v59, %v370_v57  ;;  %v408_v63 = vrot.slane %v407_v60, 4  ;;  %v730_v57 = vld [vmem:[%s8373_s2 + $0x348] sm:$0xff]  ;;  %v633_v59 = vld [vmem:[%s8373_s2 + $0x40] sm:$0xff]  ;;  %966 = vmatpush.msra.mxu3 %v665_v58  ;;  %v720_v58 = vld [vmem:[%s8373_s2 + $0x2f8] sm:$0xff] }
  0xcb   : > { %1057 = vmatpush.msrb.mxu0 %v730_v57  ;;  %920 = vmatpush.msra.mxu1 %v633_v59  ;;  %v625_v57 = vld [vmem:[%s8373_s2] sm:$0xff]  ;;  %v702_v59 = vld [vmem:[%s8373_s2 + $0x268] sm:$0xff] }
  0xcc   : > { %v373_v0 = vrot.slane %v372_v62, 2  ;;  %v409_v1 = vadd.f32 %v408_v63, %v407_v60  ;;  %v664_v63 = vld [vmem:[%s8373_s2 + $0x138] sm:$0xff]  ;;  %944 = vmatpush.msra.mxu2 %v648_v61  ;;  %v721_v61 = vld [vmem:[%s8373_s2 + $0x300] sm:$0xff] }
  0xcd   : > { %967 = vmatpush.msra.mxu3 %v664_v63  ;;  %v701_v63 = vld [vmem:[%s8373_s2 + $0x260] sm:$0xff] }
  0xce   : > { %v374_v3 = vadd.f32 %v373_v0, %v372_v62  ;;  %v410_v4 = vrot.slane %v409_v1, 2  ;;  %v729_v62 = vld [vmem:[%s8373_s2 + $0x340] sm:$0xff]  ;;  %v632_v0 = vld [vmem:[%s8373_s2 + $0x38] sm:$0xff]  ;;  %945 = vmatpush.msra.mxu2 %v647_v2  ;;  %v718_v2 = vld [vmem:[%s8373_s2 + $0x2e8] sm:$0xff] }
  0xcf   : > { %1058 = vmatpush.msrb.mxu0 %v729_v62  ;;  %921 = vmatpush.msra.mxu1 %v632_v0  ;;  %v719_v62 = vld [vmem:[%s8373_s2 + $0x2f0] sm:$0xff]  ;;  %v800_v0 = vld [vmem:[%s8373_s2 + $0x578] sm:$0xff] }
  0xd0   : > { %v375_v5 = vrot.slane %v374_v3, 1  ;;  %v411_v6 = vadd.f32 %v410_v4, %v409_v1 }
  0xd2   : > { %v376_v8 = vadd.f32 %v375_v5, %v374_v3  ;;  %v412_v9 = vrot.slane %v411_v6, 1  ;;  %v663_v5 = vld [vmem:[%s8373_s2 + $0x130] sm:$0xff] }
  0xd3   : > { %968 = vmatpush.msra.mxu3 %v663_v5  ;;  %v686_v5 = vld [vmem:[%s8373_s2 + $0x1e8] sm:$0xff] }
  0xd4   : > { %v4296_v16 = vmul.f32 %v4293_v7, %v376_v8  ;;  %v413_v17 = vadd.f32 %v412_v9, %v411_v6  ;;  %v728_v6 = vld [vmem:[%s8373_s2 + $0x338] sm:$0xff] }
  0xd5   : > { %1059 = vmatpush.msrb.mxu0 %v728_v6  ;;  %v717_v6 = vld [vmem:[%s8373_s2 + $0x2e0] sm:$0xff] }
  0xd6   : > { %v414_v18 = vmul.f32 %v413_v17, %v4293_v7  ;;  %v415_v19 = vmul.f32 %v4296_v16, %v4296_v16  ;;  %v425_v3 = vsub.f32 %v4286_v52, %v4296_v16  ;;  %v424_v4 = vsub.f32 %v4270_v32, %v4296_v16  ;;  %v646_v52 = vld [vmem:[%s8373_s2 + $0xa8] sm:$0xff]  ;;  %v631_v32 = vld [vmem:[%s8373_s2 + $0x30] sm:$0xff] }
  0xd7   : > { %v423_v8 = vsub.f32 %v4247_v15, %v4296_v16  ;;  %v422_v17 = vsub.f32 %v4245_v14, %v4296_v16  ;;  %v421_v15 = vsub.f32 %v4243_v13, %v4296_v16  ;;  %v727_v14 = vld [vmem:[%s8373_s2 + $0x330] sm:$0xff]  ;;  %v630_v13 = vld [vmem:[%s8373_s2 + $0x28] sm:$0xff]  ;;  %946 = vmatpush.msra.mxu2 %v646_v52  ;;  %922 = vmatpush.msra.mxu1 %v631_v32  ;;  %v685_v52 = vld [vmem:[%s8373_s2 + $0x1e0] sm:$0xff] }
  0xd8   : > { %v416_v20 = vsub.f32 %v414_v18, %v415_v19  ;;  %v419_v18 = vsub.f32 %v4239_v11, %v4296_v16  ;;  %v645_v11 = vld [vmem:[%s8373_s2 + $0xa0] sm:$0xff]  ;;  %1060 = vmatpush.msrb.mxu0 %v727_v14  ;;  %v418_v30 = vsub.f32 %v4237_v10, %v4296_v16  ;;  %v643_v10 = vld [vmem:[%s8373_s2 + $0x90] sm:$0xff]  ;;  %v716_v32 = vld [vmem:[%s8373_s2 + $0x2d8] sm:$0xff] }
  0xd9   : > { %947 = vmatpush.msra.mxu2 %v645_v11  ;;  %923 = vmatpush.msra.mxu1 %v630_v13  ;;  %v714_v14 = vld [vmem:[%s8373_s2 + $0x2c8] sm:$0xff]  ;;  %v696_v11 = vld [vmem:[%s8373_s2 + $0x238] sm:$0xff]  ;;  %v795_v13 = vld [vmem:[%s8373_s2 + $0x550] sm:$0xff] }
  0xda   : > { %v417_v21 = vmax.f32 %v416_v20, 0.0  ;;  %1061 = vmatpush.msrb.mxu0 %v726_v35  ;;  %v711_v35 = vld [vmem:[%s8373_s2 + $0x2b0] sm:$0xff] }
  0xdb   : > { %948 = vmatpush.msra.mxu2 %v644_v28  ;;  %924 = vmatpush.msra.mxu1 %v629_v36  ;;  %v794_v28 = vld [vmem:[%s8373_s2 + $0x548] sm:$0xff]  ;;  %v693_v36 = vld [vmem:[%s8373_s2 + $0x220] sm:$0xff] }
  0xdc   : > { %v4301_v22 = vadd.f32 1e-05, %v417_v21  ;;  %v420_v21 = vsub.f32 %v4241_v12, %v4296_v16  ;;  %v660_v16 = vld [vmem:[%s8373_s2 + $0x118] sm:$0xff]  ;;  %1062 = vmatpush.msrb.mxu0 %v725_v37 }
  0xdd   : > { %949 = vmatpush.msra.mxu2 %v643_v10  ;;  %925 = vmatpush.msra.mxu1 %v628_v38  ;;  %v792_v10 = vld [vmem:[%s8373_s2 + $0x538] sm:$0xff]  ;;  %v691_v38 = vld [vmem:[%s8373_s2 + $0x210] sm:$0xff] }
  0xde   : > { %4142 = vrsqrt.f32 %v4301_v22  ;;  %vm433_vm4 = vweird.f32 %v4301_v22  ;;  %v692_v37 = vld [vmem:[%s8373_s2 + $0x218] sm:$0xff] }
  0xdf   : > { %950 = vmatpush.msra.mxu2 %v642_v40  ;;  %926 = vmatpush.msra.mxu1 %v627_v45  ;;  %v710_v40 = vld [vmem:[%s8373_s2 + $0x2a8] sm:$0xff] }
  0xe0   : > { %v790_v45 = vld [vmem:[%s8373_s2 + $0x528] sm:$0xff] }
  0xe1   : > { %951 = vmatpush.msra.mxu2 %v641_v46  ;;  %927 = vmatpush.msra.mxu1 %v626_v53  ;;  %v677_v46 = vld [vmem:[%s8373_s2 + $0x1a0] sm:$0xff]  ;;  %v788_v53 = vld [vmem:[%s8373_s2 + $0x518] sm:$0xff] }
  0xe3   : > { %1005 = vmatpush.msrb.mxu2 %v704_v48  ;;  %928 = vmatpush.msra.mxu1 %v625_v57  ;;  %v708_v48 = vld [vmem:[%s8373_s2 + $0x298] sm:$0xff]  ;;  %v674_v57 = vld [vmem:[%s8373_s2 + $0x188] sm:$0xff] }
  0xe4   : > { %v4143_v41 = vpop.eup %4142 }
  0xe5   : > { %v428_v44 = vmul.f32 %v4143_v41, %v4301_v22  ;;  %vm434_vm3 = vweird.f32 %v4143_v41  ;;  %v662_v22 = vld [vmem:[%s8373_s2 + $0x128] sm:$0xff] }
  0xe6   : > { %vm435_vm5 = vmor %vm433_vm4, %vm434_vm3  ;;  %969 = vmatpush.msra.mxu3 %v662_v22  ;;  %v683_v22 = vld [vmem:[%s8373_s2 + $0x1d0] sm:$0xff]  ;;  %vm588_vm4 = vcmask 1046528  }
  0xe7   : > { %v429_v49 = vmul.f32 %v4143_v41, %v428_v44  ;;  %v724_v44 = vld [vmem:[%s8373_s2 + $0x318] sm:$0xff] }
  0xe8   : > { %970 = vmatpush.msra.mxu3 %v661_v29  ;;  %1063 = vmatpush.msrb.mxu0 %v724_v44  ;;  %v681_v29 = vld [vmem:[%s8373_s2 + $0x1c0] sm:$0xff] }
  0xe9   : > { %v430_v55 = vmul.f32 0.5, %v429_v49  ;;  %v723_v49 = vld [vmem:[%s8373_s2 + $0x310] sm:$0xff]  ;;  %v709_v44 = vld [vmem:[%s8373_s2 + $0x2a0] sm:$0xff] }
  0xea   : > { %971 = vmatpush.msra.mxu3 %v660_v16  ;;  %1064 = vmatpush.msrb.mxu0 %v723_v49  ;;  %v679_v16 = vld [vmem:[%s8373_s2 + $0x1b0] sm:$0xff]  ;;  %v789_v49 = vld [vmem:[%s8373_s2 + $0x520] sm:$0xff] }
  0xeb   : > { %v431_v60 = vsub.f32 1.5, %v430_v55  ;;  %v703_v55 = vld [vmem:[%s8373_s2 + $0x270] sm:$0xff] }
  0xec   : > { %1006 = vmatpush.msrb.mxu2 %v703_v55  ;;  %1065 = vmatpush.msrb.mxu0 %v722_v56  ;;  %v706_v55 = vld [vmem:[%s8373_s2 + $0x288] sm:$0xff]  ;;  %v787_v56 = vld [vmem:[%s8373_s2 + $0x510] sm:$0xff] }
  0xed   : > { %v432_v1 = vmul.f32 %v4143_v41, %v431_v60  ;;  %v688_v60 = vld [vmem:[%s8373_s2 + $0x1f8] sm:$0xff] }
  0xee   : > { %1007 = vmatpush.msrb.mxu2 %v702_v59  ;;  %982 = vmatpush.msrb.mxu1 %v688_v60  ;;  %v786_v59 = vld [vmem:[%s8373_s2 + $0x508] sm:$0xff]  ;;  %v673_v60 = vld [vmem:[%s8373_s2 + $0x180] sm:$0xff] }
  0xef   : > { %v436_v9 = vsel %vm435_vm5, %v4143_v41, %v432_v1  ;;  %v659_v41 = vld [vmem:[%s8373_s2 + $0x110] sm:$0xff]  ;;  %1066 = vmatpush.msrb.mxu0 %v721_v61  ;;  %v785_v61 = vld [vmem:[%s8373_s2 + $0x500] sm:$0xff]  ;;  %vm539_vm5 = vcmask 1043456  }
  0xf0   : > { %v444_v19 = vmul.f32 %v436_v9, %v425_v3  ;;  %v443_v20 = vmul.f32 %v436_v9, %v424_v4  ;;  %v4453_v12 = vmul.f32 %v436_v9, %v423_v8  ;;  %v4455_v23 = vmul.f32 %v436_v9, %v422_v17  ;;  %972 = vmatpush.msra.mxu3 %v659_v41  ;;  %v687_v1 = vld [vmem:[%s8373_s2 + $0x1f0] sm:$0xff]  ;;  %v700_v3 = vld [vmem:[%s8373_s2 + $0x258] sm:$0xff]  ;;  %v698_v17 = vld [vmem:[%s8373_s2 + $0x248] sm:$0xff] }
  0xf1   : > { %v4457_v24 = vmul.f32 %v436_v9, %v419_v18  ;;  %v440_v27 = vmul.f32 %v436_v9, %v421_v15  ;;  %v439_v34 = vmul.f32 %v436_v9, %v420_v21  ;;  %v4487_v39 = vmul.f32 %v436_v9, %v418_v30  ;;  %v799_v4 = vld [vmem:[%s8373_s2 + $0x570] sm:$0xff]  ;;  %1008 = vmatpush.msrb.mxu2 %v701_v63  ;;  %v798_v9 = vld [vmem:[%s8373_s2 + $0x568] sm:$0xff]  ;;  %v797_v18 = vld [vmem:[%s8373_s2 + $0x560] sm:$0xff] }
  0xf2   : > { %vm452_vm6 = vcmp.ge.f32.partialorder %v444_v19, 0.0  ;;  %v460_v25 = vmul.f32 0.05, %v444_v19  ;;  %vm451_vm7 = vcmp.ge.f32.partialorder %v443_v20, 0.0  ;;  %v459_v26 = vmul.f32 0.05, %v443_v20  ;;  %973 = vmatpush.msra.mxu3 %v658_v47  ;;  %1143 = vmatpush.msra.mxu0 %v800_v0 }
  0xf3   : > { %v456_v42 = vmul.f32 0.05, %v440_v27  ;;  %v455_v43 = vmul.f32 0.05, %v439_v34  ;;  %vm448_vm8 = vcmp.ge.f32.partialorder %v440_v27, 0.0  ;;  %vm447_vm9 = vcmp.ge.f32.partialorder %v439_v34, 0.0  ;;  %983 = vmatpush.msrb.mxu1 %v687_v1  ;;  %1009 = vmatpush.msrb.mxu2 %v700_v3 }
  0xf4   : > { %v468_v31 = vsel %vm452_vm6, %v444_v19, %v460_v25  ;;  %v467_v33 = vsel %vm451_vm7, %v443_v20, %v459_v26  ;;  %974 = vmatpush.msra.mxu3 %v657_v54  ;;  %v699_v8 = vld [vmem:[%s8373_s2 + $0x250] sm:$0xff]  ;;  %1144 = vmatpush.msra.mxu0 %v799_v4  ;;  %v684_v19 = vld [vmem:[%s8373_s2 + $0x1d8] sm:$0xff]  ;;  %v697_v15 = vld [vmem:[%s8373_s2 + $0x240] sm:$0xff]  ;;  %v458_v0 = vmul.f32 0.05, %v4453_v12  ;;  %vm450_vm10 = vcmp.ge.f32.partialorder %v4453_v12, 0.0 }
  0xf5   : > { %481 = vrot.lane.b32.xlu1 %v468_v31, %s4167_s23  ;;  %479 = vrot.lane.b32.xlu0 %v467_v33, %s4167_s23  ;;  %v464_v50 = vsel %vm448_vm8, %v440_v27, %v456_v42  ;;  %v463_v51 = vsel %vm447_vm9, %v439_v34, %v455_v43  ;;  %v715_v20 = vld [vmem:[%s8373_s2 + $0x2d0] sm:$0xff]  ;;  %v796_v21 = vld [vmem:[%s8373_s2 + $0x558] sm:$0xff]  ;;  %v457_v1 = vmul.f32 0.05, %v4455_v23  ;;  %vm449_vm11 = vcmp.ge.f32.partialorder %v4455_v23, 0.0  ;;  %vm4806_vm6 = vmneg %vm539_vm5 }
  0xf6   : > { %1028 = vmatpush.msrb.mxu3 %v720_v58  ;;  %984 = vmatpush.msrb.mxu1 %v686_v5  ;;  %v682_v25 = vld [vmem:[%s8373_s2 + $0x1c8] sm:$0xff]  ;;  %v713_v26 = vld [vmem:[%s8373_s2 + $0x2c0] sm:$0xff]  ;;  %v695_v27 = vld [vmem:[%s8373_s2 + $0x230] sm:$0xff]  ;;  %v466_v3 = vsel %vm450_vm10, %v4453_v12, %v458_v0  ;;  %vm446_vm12 = vcmp.ge.f32.partialorder %v4457_v24, 0.0  ;;  %vm445_vm3 = vcmp.ge.f32.partialorder %v4487_v39, 0.0 }
  0xf7   : > { %1010 = vmatpush.msrb.mxu2 %v699_v8  ;;  %1145 = vmatpush.msra.mxu0 %v798_v9  ;;  %v712_v30 = vld [vmem:[%s8373_s2 + $0x2b8] sm:$0xff]  ;;  %v694_v31 = vld [vmem:[%s8373_s2 + $0x228] sm:$0xff]  ;;  %v793_v33 = vld [vmem:[%s8373_s2 + $0x540] sm:$0xff]  ;;  %v454_v9 = vmul.f32 0.05, %v4457_v24 }
  0xf8   : > { %1029 = vmatpush.msrb.mxu3 %v719_v62  ;;  %985 = vmatpush.msrb.mxu1 %v685_v52  ;;  %v680_v34 = vld [vmem:[%s8373_s2 + $0x1b8] sm:$0xff]  ;;  %v791_v41 = vld [vmem:[%s8373_s2 + $0x530] sm:$0xff]  ;;  %v678_v42 = vld [vmem:[%s8373_s2 + $0x1a8] sm:$0xff]  ;;  %v489_v62 = vlaneseq }
  0xf9   : > { %1011 = vmatpush.msrb.mxu2 %v698_v17  ;;  %1146 = vmatpush.msra.mxu0 %v797_v18  ;;  %v690_v43 = vld [vmem:[%s8373_s2 + $0x208] sm:$0xff]  ;;  %v689_v47 = vld [vmem:[%s8373_s2 + $0x200] sm:$0xff]  ;;  %v675_v54 = vld [vmem:[%s8373_s2 + $0x190] sm:$0xff] }
  0xfa   : > { %1030 = vmatpush.msrb.mxu3 %v718_v2  ;;  %986 = vmatpush.msrb.mxu1 %v684_v19  ;;  %v705_v58 = vld [vmem:[%s8373_s2 + $0x280] sm:$0xff]  ;;  %v4719_v63 = vshrl.u32 %v489_v62, 7  ;;  %v768_v19 = vld [vmem:[%s8373_s2 + $0x478] sm:$0xff]  ;;  %v782_v0 = vld [vmem:[%s8373_s2 + $0x4e8] sm:$0xff] }
  0xfb   : > { %1012 = vmatpush.msrb.mxu2 %v697_v15  ;;  %1147 = vmatpush.msra.mxu0 %v796_v21  ;;  %v2561_v8 = vld [vmem:[%s8376_s5 + $0x7c8] sm:$0xff] }
  0xfc   : > { %1031 = vmatpush.msrb.mxu3 %v717_v6  ;;  %987 = vmatpush.msrb.mxu1 %v683_v22  ;;  %v496_v2 = vand.u32 3, %v4719_v63  ;;  %v465_v6 = vsel %vm449_vm11, %v4455_v23, %v457_v1  ;;  %v863_v1 = vld [vmem:[%s8373_s2 + $0x770] sm:$0xff] }
  0xfd   : > { %473 = vrot.lane.b32.xlu1 %v464_v50, %s4167_s23  ;;  %471 = vrot.lane.b32.xlu0 %v463_v51, %s4167_s23  ;;  %v676_v50 = vld [vmem:[%s8373_s2 + $0x198] sm:$0xff]  ;;  %v707_v51 = vld [vmem:[%s8373_s2 + $0x290] sm:$0xff] }
  0xfe   : > { %1032 = vmatpush.msrb.mxu3 %v716_v32  ;;  %1013 = vmatpush.msrb.mxu2 %v696_v11  ;;  %vm4731_vm14 = vcmp.ge.s32.totalorder %v496_v2, 1  ;;  %v4743_v32 = vadd.s32 8, %v4719_v63  ;;  %vm4911_vm8 = vcmp.lt.s32.totalorder %v496_v2, 3  ;;  %v779_v2 = vld [vmem:[%s8373_s2 + $0x4d0] sm:$0xff] }
  0xff   : > { %1148 = vmatpush.msra.mxu0 %v795_v13  ;;  %988 = vmatpush.msrb.mxu1 %v682_v25  ;;  %v767_v25 = vld [vmem:[%s8373_s2 + $0x470] sm:$0xff] }
 0x100   : > { %1033 = vmatpush.msrb.mxu3 %v715_v20  ;;  %1014 = vmatpush.msrb.mxu2 %v695_v27 }
 0x101   : > { %1149 = vmatpush.msra.mxu0 %v794_v28  ;;  %989 = vmatpush.msrb.mxu1 %v681_v29 }
 0x102   : > { %1034 = vmatpush.msrb.mxu3 %v714_v14  ;;  %1015 = vmatpush.msrb.mxu2 %v694_v31  ;;  %v453_v14 = vmul.f32 0.05, %v4487_v39 }
 0x103   : > { %1150 = vmatpush.msra.mxu0 %v793_v33  ;;  %990 = vmatpush.msrb.mxu1 %v680_v34  ;;  %v462_v33 = vsel %vm446_vm12, %v4457_v24, %v454_v9  ;;  %v765_v24 = vld [vmem:[%s8373_s2 + $0x460] sm:$0xff]  ;;  %v862_v9 = vld [vmem:[%s8373_s2 + $0x768] sm:$0xff] }
 0x104   : > { %1035 = vmatpush.msrb.mxu3 %v713_v26  ;;  %1016 = vmatpush.msrb.mxu2 %v693_v36  ;;  %v503_v26 = vand.u32 3, %v4743_v32  ;;  %v775_v32 = vld [vmem:[%s8373_s2 + $0x4b0] sm:$0xff] }
 0x105   : > { %1151 = vmatpush.msra.mxu0 %v792_v10  ;;  %991 = vmatpush.msrb.mxu1 %v679_v16 }
 0x106   : > { %1036 = vmatpush.msrb.mxu3 %v712_v30  ;;  %1017 = vmatpush.msrb.mxu2 %v692_v37  ;;  %v766_v30 = vld [vmem:[%s8373_s2 + $0x468] sm:$0xff]  ;;  %vm4812_vm7 = vcmp.ge.s32.totalorder %v503_v26, 1  ;;  %vm4978_vm9 = vcmp.lt.s32.totalorder %v503_v26, 3  ;;  %v856_v26 = vld [vmem:[%s8373_s2 + $0x738] sm:$0xff] }
 0x107   : > { %1152 = vmatpush.msra.mxu0 %v791_v41  ;;  %992 = vmatpush.msrb.mxu1 %v678_v42  ;;  %v2499_v37 = vld [vmem:[%s8376_s5 + $0x5d8] sm:$0xff] }
 0x108   : > { %1037 = vmatpush.msrb.mxu3 %v711_v35  ;;  %1018 = vmatpush.msrb.mxu2 %v691_v38  ;;  %v461_v35 = vsel %vm445_vm3, %v4487_v39, %v453_v14  ;;  %v2553_v39 = vld [vmem:[%s8376_s5 + $0x788] sm:$0xff] }
 0x109   : > { %1153 = vmatpush.msra.mxu0 %v790_v45  ;;  %993 = vmatpush.msrb.mxu1 %v677_v46 }
 0x10a   : > { %1038 = vmatpush.msrb.mxu3 %v710_v40  ;;  %1019 = vmatpush.msrb.mxu2 %v690_v43  ;;  %v784_v40 = vld [vmem:[%s8373_s2 + $0x4f8] sm:$0xff] }
 0x10b   : > { %1154 = vmatpush.msra.mxu0 %v789_v49  ;;  %994 = vmatpush.msrb.mxu1 %v676_v50  ;;  %v752_v50 = vld [vmem:[%s8373_s2 + $0x3f8] sm:$0xff] }
 0x10c   : > { %1039 = vmatpush.msrb.mxu3 %v709_v44  ;;  %1020 = vmatpush.msrb.mxu2 %v689_v47 }
 0x10d   : > { %1155 = vmatpush.msra.mxu0 %v788_v53  ;;  %995 = vmatpush.msrb.mxu1 %v675_v54 }
 0x10e   : > { %1040 = vmatpush.msrb.mxu3 %v708_v48 }
 0x10f   : > { %1156 = vmatpush.msra.mxu0 %v787_v56  ;;  %996 = vmatpush.msrb.mxu1 %v674_v57  ;;  %v864_v56 = vld [vmem:[%s8373_s2 + $0x778] sm:$0xff] }
 0x110   : > { %1041 = vmatpush.msrb.mxu3 %v707_v51  ;;  %v764_v51 = vld [vmem:[%s8373_s2 + $0x458] sm:$0xff] }
 0x111   : > { %1157 = vmatpush.msra.mxu0 %v786_v59  ;;  %997 = vmatpush.msrb.mxu1 %v673_v60  ;;  %v751_v60 = vld [vmem:[%s8373_s2 + $0x3f0] sm:$0xff] }
 0x112   : > { %1042 = vmatpush.msrb.mxu3 %v706_v55  ;;  %v783_v55 = vld [vmem:[%s8373_s2 + $0x4f0] sm:$0xff] }
 0x113   : > { %1158 = vmatpush.msra.mxu0 %v785_v61  ;;  %v763_v61 = vld [vmem:[%s8373_s2 + $0x450] sm:$0xff] }
 0x114   : > { %1043 = vmatpush.msrb.mxu3 %v705_v58 }
 0x167   : > { %v482_v4 = vpop.permute.xlu1 %481  ;;  %v480_v5 = vpop.permute.xlu0 %479 }
 0x168   : > { %v4737_v52 = vsel %vm355_vm1, %v466_v3, %v482_v4  ;;  %v4740_v12 = vsel %vm355_vm1, %v465_v6, %v480_v5  ;;  %v750_v3 = vld [vmem:[%s8373_s2 + $0x3e8] sm:$0xff]  ;;  %v781_v6 = vld [vmem:[%s8373_s2 + $0x4e0] sm:$0xff] }
 0x169   : > { %v522_v23 = vrot.slane %v4740_v12, 3  ;;  %v525_v17 = vrot.slane %v4737_v52, 3  ;;  %v554_v18 = vrot.slane %v4740_v12, 5  ;;  %v557_v20 = vrot.slane %v4737_v52, 5  ;;  %v762_v4 = vld [vmem:[%s8373_s2 + $0x448] sm:$0xff] }
 0x16a   : > { %v573_v15 = vrot.slane %v4740_v12, 7  ;;  %v576_v21 = vrot.slane %v4737_v52, 7  ;;  %v592_v13 = vrot.slane %v4740_v12, 1  ;;  %v593_v29 = vrot.slane %v4737_v52, 1 }
 0x16b   : > { %v532_v22 = vsel %vm520_vm13, 0.0, %v522_v23  ;;  %v4760_v11 = vsel %vm520_vm13, %v522_v23, %v525_v17  ;;  %v4774_v27 = vsel %vm552_vm2, %v554_v18, %v557_v20  ;;  %v749_v23 = vld [vmem:[%s8373_s2 + $0x3e0] sm:$0xff] }
 0x16c   : > { %3896 = vmatmul.msk.f32.vlgmr.msra.gmra.mxu2 %vm4731_vm14, %v532_v22  ;;  %v4779_v28 = vsel %vm571_vm15, %v573_v15, %v576_v21  ;;  %v4794_v36 = vsel %vm588_vm4, %v592_v13, %v593_v29  ;;  %v861_v21 = vld [vmem:[%s8373_s2 + $0x760] sm:$0xff]  ;;  %v780_v22 = vld [vmem:[%s8373_s2 + $0x4d8] sm:$0xff] }
 0x16d   : > { %1097 = vmatpush.msra.mxu2 %v768_v19  ;;  %v761_v19 = vld [vmem:[%s8373_s2 + $0x440] sm:$0xff]  ;;  %v748_v13 = vld [vmem:[%s8373_s2 + $0x3d8] sm:$0xff] }
 0x16f   : > { %1098 = vmatpush.msra.mxu2 %v767_v25  ;;  %v474_v31 = vpop.permute.xlu1 %473  ;;  %v472_v34 = vpop.permute.xlu0 %471  ;;  %v760_v25 = vld [vmem:[%s8373_s2 + $0x438] sm:$0xff] }
 0x170   : > { %v4797_v10 = vsel %vm355_vm1, %v462_v33, %v474_v31  ;;  %v4800_v16 = vsel %vm355_vm1, %v461_v35, %v472_v34  ;;  %v747_v31 = vld [vmem:[%s8373_s2 + $0x3d0] sm:$0xff]  ;;  %v778_v34 = vld [vmem:[%s8373_s2 + $0x4c8] sm:$0xff] }
 0x171   : > { %1099 = vmatpush.msra.mxu2 %v766_v30  ;;  %v540_v38 = vrot.slane %v4800_v16, 4  ;;  %v521_v41 = vrot.slane %v4800_v16, 3  ;;  %v572_v42 = vrot.slane %v4800_v16, 7  ;;  %v542_v43 = vrot.slane %v4797_v10, 4  ;;  %v860_v30 = vld [vmem:[%s8373_s2 + $0x758] sm:$0xff]  ;;  %v759_v33 = vld [vmem:[%s8373_s2 + $0x430] sm:$0xff] }
 0x172   : > { %v523_v44 = vrot.slane %v4797_v10, 3  ;;  %v553_v45 = vrot.slane %v4800_v16, 5  ;;  %v574_v46 = vrot.slane %v4797_v10, 7  ;;  %v555_v47 = vrot.slane %v4797_v10, 5  ;;  %v859_v35 = vld [vmem:[%s8373_s2 + $0x750] sm:$0xff] }
 0x173   : > { %1100 = vmatpush.msra.mxu2 %v765_v24  ;;  %3899 = vmatmul.msk.f32.vlgmr.msra.gmra.mxu3 %vm4806_vm6, %v540_v38  ;;  %v531_v48 = vsel %vm520_vm13, 0.0, %v521_v41  ;;  %v582_v49 = vsel %vm571_vm15, 0.0, %v572_v42  ;;  %v4840_v53 = vsel %vm539_vm5, %v540_v38, %v542_v43  ;;  %v589_v54 = vrot.slane %v4800_v16, 1  ;;  %v746_v24 = vld [vmem:[%s8373_s2 + $0x3c8] sm:$0xff] }
 0x174   : > { %1120 = vmatpush.msra.mxu3 %v784_v40  ;;  %3894 = vmatmul.msk.f32.vlgmr.msra.gmra.mxu1 %vm4731_vm14, %v531_v48  ;;  %v4854_v57 = vsel %vm520_vm13, %v521_v41, %v523_v44  ;;  %v575_v58 = vsel %vm571_vm15, %v572_v42, %v574_v46  ;;  %v4860_v59 = vsel %vm552_vm2, %v553_v45, %v555_v47  ;;  %v590_v62 = vrot.slane %v4797_v10, 1  ;;  %v758_v38 = vld [vmem:[%s8373_s2 + $0x428] sm:$0xff]  ;;  %v777_v40 = vld [vmem:[%s8373_s2 + $0x4c0] sm:$0xff]  ;;  %v776_v48 = vld [vmem:[%s8373_s2 + $0x4b8] sm:$0xff] }
 0x175   : > { %3897 = vmatmul.msk.f32.gmra.mxu2 %vm4812_vm7, %v4760_v11  ;;  %3906 = vmatmul.msk.f32.vlgmr.msrb.gmra.mxu0 %vm4731_vm14, %v582_v49  ;;  %v563_v63 = vsel %vm552_vm2, 0.0, %v553_v45  ;;  %v858_v41 = vld [vmem:[%s8373_s2 + $0x748] sm:$0xff]  ;;  %v745_v42 = vld [vmem:[%s8373_s2 + $0x3c0] sm:$0xff]  ;;  %v564_v49 = vsel %vm552_vm2, 0.0, %v554_v18  ;;  %v756_v18 = vld [vmem:[%s8373_s2 + $0x418] sm:$0xff] }
 0x176   : > { %1074 = vmatpush.msra.mxu1 %v752_v50  ;;  %1101 = vmatpush.msra.mxu2 %v764_v51  ;;  %v4889_v5 = vsel %vm588_vm4, %v589_v54, %v590_v62  ;;  %v757_v45 = vld [vmem:[%s8373_s2 + $0x420] sm:$0xff]  ;;  %v541_v50 = vrot.slane %v4740_v12, 4  ;;  %v744_v54 = vld [vmem:[%s8373_s2 + $0x3b8] sm:$0xff] }
 0x177   : > { %1121 = vmatpush.msra.mxu3 %v783_v55  ;;  %1235 = vmatpush.msrb.mxu0 %v864_v56  ;;  %v857_v46 = vld [vmem:[%s8373_s2 + $0x740] sm:$0xff]  ;;  %v743_v55 = vld [vmem:[%s8373_s2 + $0x3b0] sm:$0xff] }
 0x178   : > { %1075 = vmatpush.msra.mxu1 %v751_v60  ;;  %1102 = vmatpush.msra.mxu2 %v763_v61  ;;  %v755_v56 = vld [vmem:[%s8373_s2 + $0x410] sm:$0xff]  ;;  %v742_v61 = vld [vmem:[%s8373_s2 + $0x3a8] sm:$0xff] }
 0x179   : > { %1122 = vmatpush.msra.mxu3 %v782_v0  ;;  %1236 = vmatpush.msrb.mxu0 %v863_v1  ;;  %v855_v60 = vld [vmem:[%s8373_s2 + $0x730] sm:$0xff]  ;;  %v754_v0 = vld [vmem:[%s8373_s2 + $0x408] sm:$0xff]  ;;  %v773_v1 = vld [vmem:[%s8373_s2 + $0x4a0] sm:$0xff] }
 0x17a   : > { %1076 = vmatpush.msra.mxu1 %v750_v3  ;;  %1103 = vmatpush.msra.mxu2 %v762_v4  ;;  %v854_v3 = vld [vmem:[%s8373_s2 + $0x728] sm:$0xff]  ;;  %v741_v4 = vld [vmem:[%s8373_s2 + $0x3a0] sm:$0xff] }
 0x17b   : > { %1123 = vmatpush.msra.mxu3 %v781_v6  ;;  %1237 = vmatpush.msrb.mxu0 %v862_v9  ;;  %v832_v6 = vld [vmem:[%s8373_s2 + $0x678] sm:$0xff]  ;;  %v544_v9 = vrot.slane %v4737_v52, 4 }
 0x17c   : > { %1077 = vmatpush.msra.mxu1 %v749_v23  ;;  %1104 = vmatpush.msra.mxu2 %v761_v19  ;;  %v772_v23 = vld [vmem:[%s8373_s2 + $0x498] sm:$0xff]  ;;  %v853_v19 = vld [vmem:[%s8373_s2 + $0x720] sm:$0xff] }
 0x17d   : > { %978 = vmatmul.f32.gmra.mxu3 %v4840_v53  ;;  %1238 = vmatpush.msrb.mxu0 %v861_v21  ;;  %v740_v21 = vld [vmem:[%s8373_s2 + $0x398] sm:$0xff] }
 0x17e   : > { %1124 = vmatpush.msra.mxu3 %v780_v22  ;;  %3895 = vmatmul.msk.f32.gmra.mxu1 %vm4812_vm7, %v4854_v57  ;;  %v5053_v22 = vsel %vm539_vm5, %v541_v50, %v544_v9 }
 0x17f   : > { %3902 = vmatmul.msk.f32.vlgmr.msrb.gmra.mxu2 %vm4911_vm8, %v563_v63  ;;  %3907 = vmatmul.msk.f32.gmra.mxu0 %vm4812_vm7, %v575_v58  ;;  %v774_v58 = vld [vmem:[%s8373_s2 + $0x4a8] sm:$0xff]  ;;  %v599_v63 = vsel %vm588_vm4, %v590_v62, 0.0 }
 0x180   : > { %1078 = vmatpush.msra.mxu1 %v748_v13  ;;  %1105 = vmatpush.msra.mxu2 %v760_v25  ;;  %v771_v13 = vld [vmem:[%s8373_s2 + $0x490] sm:$0xff]  ;;  %v830_v62 = vld [vmem:[%s8373_s2 + $0x668] sm:$0xff] }
 0x181   : > { %1125 = vmatpush.msra.mxu3 %v779_v2  ;;  %1239 = vmatpush.msrb.mxu0 %v860_v30  ;;  %v831_v25 = vld [vmem:[%s8373_s2 + $0x670] sm:$0xff]  ;;  %v852_v2 = vld [vmem:[%s8373_s2 + $0x718] sm:$0xff] }
 0x182   : > { %1079 = vmatpush.msra.mxu1 %v747_v31  ;;  %1106 = vmatpush.msra.mxu2 %v759_v33  ;;  %v739_v30 = vld [vmem:[%s8373_s2 + $0x390] sm:$0xff]  ;;  %v738_v33 = vld [vmem:[%s8373_s2 + $0x388] sm:$0xff] }
 0x183   : > { %1126 = vmatpush.msra.mxu3 %v778_v34  ;;  %1240 = vmatpush.msrb.mxu0 %v859_v35  ;;  %v851_v31 = vld [vmem:[%s8373_s2 + $0x710] sm:$0xff]  ;;  %v769_v34 = vld [vmem:[%s8373_s2 + $0x480] sm:$0xff] }
 0x184   : > { %1080 = vmatpush.msra.mxu1 %v746_v24  ;;  %1107 = vmatpush.msra.mxu2 %v758_v38  ;;  %v829_v35 = vld [vmem:[%s8373_s2 + $0x660] sm:$0xff]  ;;  %v850_v24 = vld [vmem:[%s8373_s2 + $0x708] sm:$0xff] }
 0x185   : > { %1127 = vmatpush.msra.mxu3 %v777_v40  ;;  %1241 = vmatpush.msrb.mxu0 %v858_v41  ;;  %v737_v38 = vld [vmem:[%s8373_s2 + $0x380] sm:$0xff]  ;;  %v848_v40 = vld [vmem:[%s8373_s2 + $0x6f8] sm:$0xff] }
 0x186   : > { %1081 = vmatpush.msra.mxu1 %v745_v42  ;;  %1108 = vmatpush.msra.mxu2 %v757_v45  ;;  %v816_v41 = vld [vmem:[%s8373_s2 + $0x5f8] sm:$0xff]  ;;  %v849_v45 = vld [vmem:[%s8373_s2 + $0x700] sm:$0xff] }
 0x187   : > { %3904 = vmatmul.msk.f32.vlgmr.msrb.gmra.mxu3 %vm4911_vm8, %v564_v49  ;;  %1242 = vmatpush.msrb.mxu0 %v857_v46  ;;  %v828_v42 = vld [vmem:[%s8373_s2 + $0x658] sm:$0xff]  ;;  %v847_v46 = vld [vmem:[%s8373_s2 + $0x6f0] sm:$0xff] }
 0x188   : > { %1128 = vmatpush.msra.mxu3 %v776_v48  ;;  %3901 = vmatmul.msk.f32.vlgmr.msrb.gmra.mxu1 %vm4806_vm6, %v541_v50  ;;  %v583_v48 = vsel %vm571_vm15, 0.0, %v573_v15  ;;  %v815_v49 = vld [vmem:[%s8373_s2 + $0x5f0] sm:$0xff]  ;;  %v826_v15 = vld [vmem:[%s8373_s2 + $0x648] sm:$0xff] }
 0x189   : > { %3903 = vmatmul.msk.f32.gmra.mxu2 %vm4978_vm9, %v4860_v59  ;;  %1082 = vmatpush.msra.mxu1 %v744_v54  ;;  %v827_v50 = vld [vmem:[%s8373_s2 + $0x650] sm:$0xff]  ;;  %v846_v54 = vld [vmem:[%s8373_s2 + $0x6e8] sm:$0xff] }
 0x18a   : > { %1109 = vmatpush.msra.mxu2 %v756_v18  ;;  %3910 = vmatmul.msk.f32.vlgmr.msra.gmra.mxu0 %vm4911_vm8, %v4889_v5  ;;  %v753_v5 = vld [vmem:[%s8373_s2 + $0x400] sm:$0xff] }
 0x18b   : > { %1129 = vmatpush.msra.mxu3 %v775_v32  ;;  %1243 = vmatpush.msrb.mxu0 %v856_v26  ;;  %v845_v18 = vld [vmem:[%s8373_s2 + $0x6e0] sm:$0xff]  ;;  %v844_v26 = vld [vmem:[%s8373_s2 + $0x6d8] sm:$0xff] }
 0x18c   : > { %1083 = vmatpush.msra.mxu1 %v743_v55  ;;  %1110 = vmatpush.msra.mxu2 %v755_v56  ;;  %v813_v32 = vld [vmem:[%s8373_s2 + $0x5e0] sm:$0xff]  ;;  %v812_v55 = vld [vmem:[%s8373_s2 + $0x5d8] sm:$0xff] }
 0x18d   : > { %1130 = vmatpush.msra.mxu3 %v774_v58  ;;  %1244 = vmatpush.msrb.mxu0 %v855_v60  ;;  %v824_v56 = vld [vmem:[%s8373_s2 + $0x638] sm:$0xff]  ;;  %v843_v58 = vld [vmem:[%s8373_s2 + $0x6d0] sm:$0xff] }
 0x18e   : > { %1084 = vmatpush.msra.mxu1 %v742_v61  ;;  %1111 = vmatpush.msra.mxu2 %v754_v0  ;;  %v811_v60 = vld [vmem:[%s8373_s2 + $0x5d0] sm:$0xff]  ;;  %v842_v0 = vld [vmem:[%s8373_s2 + $0x6c8] sm:$0xff] }
 0x18f   : > { %1131 = vmatpush.msra.mxu3 %v773_v1  ;;  %1245 = vmatpush.msrb.mxu0 %v854_v3  ;;  %v823_v61 = vld [vmem:[%s8373_s2 + $0x630] sm:$0xff]  ;;  %v810_v1 = vld [vmem:[%s8373_s2 + $0x5c8] sm:$0xff] }
 0x190   : > { %1085 = vmatpush.msra.mxu1 %v741_v4  ;;  %1112 = vmatpush.msra.mxu2 %v753_v5  ;;  %v822_v3 = vld [vmem:[%s8373_s2 + $0x628] sm:$0xff]  ;;  %v809_v4 = vld [vmem:[%s8373_s2 + $0x5c0] sm:$0xff]  ;;  %v840_v5 = vld [vmem:[%s8373_s2 + $0x6b8] sm:$0xff] }
 0x191   : > { %3905 = vmatmul.msk.f32.gmra.mxu3 %vm4978_vm9, %v4774_v27  ;;  %1246 = vmatpush.msrb.mxu0 %v853_v19  ;;  %v839_v19 = vld [vmem:[%s8373_s2 + $0x6b0] sm:$0xff] }
 0x192   : > { %1189 = vmatpush.msrb.mxu2 %v832_v6  ;;  %1132 = vmatpush.msra.mxu3 %v772_v23  ;;  %v808_v6 = vld [vmem:[%s8373_s2 + $0x5b8] sm:$0xff] }
 0x193   : > { %1001 = vmatmul.f32.gmra.mxu1 %v5053_v22  ;;  %1113 = vmatmul.f32.vlgmr.msra.gmra.mxu2 %v4800_v16  ;;  %v770_v16 = vld [vmem:[%s8373_s2 + $0x488] sm:$0xff]  ;;  %v820_v23 = vld [vmem:[%s8373_s2 + $0x618] sm:$0xff] }
 0x194   : > { %1086 = vmatpush.msra.mxu1 %v740_v21  ;;  %3911 = vmatmul.msk.f32.gmra.mxu0 %vm4978_vm9, %v599_v63  ;;  %v807_v21 = vld [vmem:[%s8373_s2 + $0x5b0] sm:$0xff]  ;;  %v806_v63 = vld [vmem:[%s8373_s2 + $0x5a8] sm:$0xff] }
 0x195   : > { %1133 = vmatpush.msra.mxu3 %v771_v13  ;;  %1190 = vmatpush.msrb.mxu2 %v831_v25  ;;  %v819_v13 = vld [vmem:[%s8373_s2 + $0x610] sm:$0xff]  ;;  %v838_v25 = vld [vmem:[%s8373_s2 + $0x6a8] sm:$0xff] }
 0x196   : > { %1247 = vmatpush.msrb.mxu0 %v852_v2  ;;  %1087 = vmatpush.msra.mxu1 %v739_v30  ;;  %v818_v2 = vld [vmem:[%s8373_s2 + $0x608] sm:$0xff]  ;;  %v837_v30 = vld [vmem:[%s8373_s2 + $0x6a0] sm:$0xff] }
 0x197   : > { %1134 = vmatpush.msra.mxu3 %v770_v16  ;;  %1191 = vmatpush.msrb.mxu2 %v830_v62  ;;  %v805_v16 = vld [vmem:[%s8373_s2 + $0x5a0] sm:$0xff] }
 0x198   : > { %1248 = vmatpush.msrb.mxu0 %v851_v31  ;;  %1088 = vmatpush.msra.mxu1 %v738_v33  ;;  %v817_v62 = vld [vmem:[%s8373_s2 + $0x600] sm:$0xff]  ;;  %v836_v31 = vld [vmem:[%s8373_s2 + $0x698] sm:$0xff] }
 0x199   : > { %1135 = vmatpush.msra.mxu3 %v769_v34  ;;  %1192 = vmatpush.msrb.mxu2 %v829_v35  ;;  %v896_v33 = vld [vmem:[%s8373_s2 + $0x878] sm:$0xff]  ;;  %v835_v35 = vld [vmem:[%s8373_s2 + $0x690] sm:$0xff] }
 0x19a   : > { %1249 = vmatpush.msrb.mxu0 %v850_v24  ;;  %1089 = vmatpush.msra.mxu1 %v737_v38  ;;  %v804_v34 = vld [vmem:[%s8373_s2 + $0x598] sm:$0xff]  ;;  %v895_v24 = vld [vmem:[%s8373_s2 + $0x870] sm:$0xff] }
 0x19b   : > { %1212 = vmatpush.msrb.mxu3 %v848_v40  ;;  %1193 = vmatpush.msrb.mxu2 %v828_v42  ;;  %v803_v38 = vld [vmem:[%s8373_s2 + $0x590] sm:$0xff]  ;;  %v834_v40 = vld [vmem:[%s8373_s2 + $0x688] sm:$0xff]  ;;  %v833_v42 = vld [vmem:[%s8373_s2 + $0x680] sm:$0xff] }
 0x19c   : > { %1166 = vmatpush.msrb.mxu1 %v816_v41  ;;  %1136 = vmatmul.f32.vlgmr.msra.gmra.mxu3 %v4740_v12  ;;  %v814_v12 = vld [vmem:[%s8373_s2 + $0x5e8] sm:$0xff] }
 0x19d   : > { %1250 = vmatpush.msrb.mxu0 %v849_v45  ;;  %3908 = vmatmul.msk.f32.vlgmr.msra.gmra.mxu1 %vm4731_vm14, %v583_v48  ;;  %v802_v41 = vld [vmem:[%s8373_s2 + $0x588] sm:$0xff]  ;;  %v893_v45 = vld [vmem:[%s8373_s2 + $0x860] sm:$0xff]  ;;  %v912_v48 = vld [vmem:[%s8373_s2 + $0x8f8] sm:$0xff] }
 0x19e   : > { %1116 = vmatmul.f32.gmra.mxu2 %v4797_v10  ;;  %1213 = vmatpush.msrb.mxu3 %v847_v46  ;;  %v801_v46 = vld [vmem:[%s8373_s2 + $0x580] sm:$0xff] }
 0x19f   : > { %1251 = vmatmul.f32.vlgmr.msrb.gmra.mxu0 %v4840_v53  ;;  %1167 = vmatpush.msrb.mxu1 %v815_v49  ;;  %v825_v53 = vld [vmem:[%s8373_s2 + $0x640] sm:$0xff]  ;;  %v880_v49 = vld [vmem:[%s8373_s2 + $0x7f8] sm:$0xff] }
 0x1a0   : > { %1194 = vmatpush.msrb.mxu2 %v827_v50  ;;  %1214 = vmatpush.msrb.mxu3 %v846_v54  ;;  %v892_v50 = vld [vmem:[%s8373_s2 + $0x858] sm:$0xff]  ;;  %v607_v54 = vsel %vm520_vm13, %v523_v44, 0.0  ;;  %v910_v44 = vld [vmem:[%s8373_s2 + $0x8e8] sm:$0xff] }
 0x1a1   : > { %1168 = vmatpush.msrb.mxu1 %v814_v12  ;;  %v911_v12 = vld [vmem:[%s8373_s2 + $0x8f0] sm:$0xff] }
 0x1a2   : > { %1195 = vmatpush.msrb.mxu2 %v826_v15  ;;  %1215 = vmatpush.msrb.mxu3 %v845_v18  ;;  %v878_v15 = vld [vmem:[%s8373_s2 + $0x7e8] sm:$0xff] }
 0x1a3   : > { %1169 = vmatpush.msrb.mxu1 %v813_v32  ;;  %v890_v18 = vld [vmem:[%s8373_s2 + $0x848] sm:$0xff]  ;;  %v909_v32 = vld [vmem:[%s8373_s2 + $0x8e0] sm:$0xff] }
 0x1a4   : > { %1196 = vmatpush.msrb.mxu2 %v825_v53  ;;  %1216 = vmatpush.msrb.mxu3 %v844_v26  ;;  %v877_v53 = vld [vmem:[%s8373_s2 + $0x7e0] sm:$0xff] }
 0x1a5   : > { %1139 = vmatmul.f32.gmra.mxu3 %v4737_v52  ;;  %1170 = vmatpush.msrb.mxu1 %v812_v55  ;;  %v889_v26 = vld [vmem:[%s8373_s2 + $0x840] sm:$0xff]  ;;  %v908_v55 = vld [vmem:[%s8373_s2 + $0x8d8] sm:$0xff] }
 0x1a6   : > { %1197 = vmatpush.msrb.mxu2 %v824_v56  ;;  %3909 = vmatmul.msk.f32.gmra.mxu1 %vm4812_vm7, %v4779_v28  ;;  %v841_v28 = vld [vmem:[%s8373_s2 + $0x6c0] sm:$0xff]  ;;  %v876_v56 = vld [vmem:[%s8373_s2 + $0x7d8] sm:$0xff] }
 0x1a7   : > { %1217 = vmatpush.msrb.mxu3 %v843_v58  ;;  %3918 = vmatmul.msk.f32.gmra.mxu0 %vm539_vm5, %v542_v43  ;;  %v821_v43 = vld [vmem:[%s8373_s2 + $0x620] sm:$0xff]  ;;  %v608_v58 = vsel %vm520_vm13, %v525_v17, 0.0  ;;  %v875_v17 = vld [vmem:[%s8373_s2 + $0x7d0] sm:$0xff] }
 0x1a8   : > { %1171 = vmatpush.msrb.mxu1 %v811_v60  ;;  %1198 = vmatpush.msrb.mxu2 %v823_v61  ;;  %v600_v60 = vsel %vm588_vm4, %v593_v29, 0.0  ;;  %v888_v61 = vld [vmem:[%s8373_s2 + $0x838] sm:$0xff]  ;;  %v887_v29 = vld [vmem:[%s8373_s2 + $0x830] sm:$0xff] }
 0x1a9   : > { %1218 = vmatpush.msrb.mxu3 %v842_v0  ;;  %v907_v0 = vld [vmem:[%s8373_s2 + $0x8d0] sm:$0xff] }
 0x1aa   : > { %1172 = vmatpush.msrb.mxu1 %v810_v1  ;;  %1199 = vmatpush.msrb.mxu2 %v822_v3  ;;  %v906_v1 = vld [vmem:[%s8373_s2 + $0x8c8] sm:$0xff] }
 0x1ab   : > { %1219 = vmatpush.msrb.mxu3 %v841_v28  ;;  %v874_v3 = vld [vmem:[%s8373_s2 + $0x7c8] sm:$0xff] }
 0x1ac   : > { %1173 = vmatpush.msrb.mxu1 %v809_v4  ;;  %1200 = vmatpush.msrb.mxu2 %v821_v43  ;;  %v886_v28 = vld [vmem:[%s8373_s2 + $0x828] sm:$0xff]  ;;  %v905_v4 = vld [vmem:[%s8373_s2 + $0x8c0] sm:$0xff] }
 0x1ad   : > { %1220 = vmatpush.msrb.mxu3 %v840_v5  ;;  %v873_v43 = vld [vmem:[%s8373_s2 + $0x7c0] sm:$0xff] }
 0x1ae   : > { %1174 = vmatpush.msrb.mxu1 %v808_v6  ;;  %1201 = vmatpush.msrb.mxu2 %v820_v23  ;;  %v885_v5 = vld [vmem:[%s8373_s2 + $0x820] sm:$0xff]  ;;  %v904_v6 = vld [vmem:[%s8373_s2 + $0x8b8] sm:$0xff] }
 0x1af   : > { %1221 = vmatpush.msrb.mxu3 %v839_v19  ;;  %v872_v23 = vld [vmem:[%s8373_s2 + $0x7b8] sm:$0xff] }
 0x1b0   : > { %1175 = vmatpush.msrb.mxu1 %v807_v21  ;;  %1202 = vmatpush.msrb.mxu2 %v819_v13  ;;  %v884_v19 = vld [vmem:[%s8373_s2 + $0x818] sm:$0xff]  ;;  %v903_v21 = vld [vmem:[%s8373_s2 + $0x8b0] sm:$0xff] }
 0x1b1   : > { %1222 = vmatpush.msrb.mxu3 %v838_v25  ;;  %v871_v13 = vld [vmem:[%s8373_s2 + $0x7b0] sm:$0xff] }
 0x1b2   : > { %1176 = vmatpush.msrb.mxu1 %v806_v63  ;;  %1203 = vmatpush.msrb.mxu2 %v818_v2  ;;  %v883_v25 = vld [vmem:[%s8373_s2 + $0x810] sm:$0xff]  ;;  %v902_v63 = vld [vmem:[%s8373_s2 + $0x8a8] sm:$0xff] }
 0x1b3   : > { %1223 = vmatpush.msrb.mxu3 %v837_v30  ;;  %v870_v2 = vld [vmem:[%s8373_s2 + $0x7a8] sm:$0xff] }
 0x1b4   : > { %1177 = vmatpush.msrb.mxu1 %v805_v16  ;;  %1204 = vmatpush.msrb.mxu2 %v817_v62  ;;  %v882_v30 = vld [vmem:[%s8373_s2 + $0x808] sm:$0xff]  ;;  %v901_v16 = vld [vmem:[%s8373_s2 + $0x8a0] sm:$0xff] }
 0x1b5   : > { %3914 = vmatmul.msk.f32.vlgmr.msrb.gmra.mxu2 %vm4731_vm14, %v4854_v57  ;;  %1224 = vmatpush.msrb.mxu3 %v836_v31  ;;  %v894_v57 = vld [vmem:[%s8373_s2 + $0x868] sm:$0xff]  ;;  %v869_v62 = vld [vmem:[%s8373_s2 + $0x7a0] sm:$0xff] }
 0x1b6   : > { %1281 = vmatpush.msra.mxu2 %v896_v33  ;;  %1178 = vmatpush.msrb.mxu1 %v804_v34  ;;  %v881_v31 = vld [vmem:[%s8373_s2 + $0x800] sm:$0xff]  ;;  %v900_v33 = vld [vmem:[%s8373_s2 + $0x898] sm:$0xff] }
 0x1b7   : > { %1225 = vmatpush.msrb.mxu3 %v835_v35  ;;  %v868_v34 = vld [vmem:[%s8373_s2 + $0x798] sm:$0xff]  ;;  %v899_v35 = vld [vmem:[%s8373_s2 + $0x890] sm:$0xff] }
 0x1b8   : > { %1282 = vmatpush.msra.mxu2 %v895_v24  ;;  %1179 = vmatpush.msrb.mxu1 %v803_v38  ;;  %v867_v24 = vld [vmem:[%s8373_s2 + $0x790] sm:$0xff]  ;;  %v898_v38 = vld [vmem:[%s8373_s2 + $0x888] sm:$0xff] }
 0x1b9   : > { %1226 = vmatpush.msrb.mxu3 %v834_v40  ;;  %v866_v40 = vld [vmem:[%s8373_s2 + $0x788] sm:$0xff] }
 0x1ba   : > { %1283 = vmatpush.msra.mxu2 %v894_v57  ;;  %1180 = vmatpush.msrb.mxu1 %v802_v41  ;;  %v865_v57 = vld [vmem:[%s8373_s2 + $0x780] sm:$0xff]  ;;  %v619_v41 = vsel %vm552_vm2, %v555_v47, 0.0 }
 0x1bb   : > { %1227 = vmatpush.msrb.mxu3 %v833_v42  ;;  %v620_v42 = vsel %vm552_vm2, %v557_v20, 0.0 }
 0x1bc   : > { %1284 = vmatpush.msra.mxu2 %v893_v45  ;;  %1181 = vmatpush.msrb.mxu1 %v801_v46 }
 0x1bd   : > { %3916 = vmatmul.msk.f32.vlgmr.msrb.gmra.mxu3 %vm4731_vm14, %v4760_v11  ;;  %3912 = vmatmul.msk.f32.vlgmr.msrb.gmra.mxu1 %vm4911_vm8, %v4794_v36  ;;  %v879_v11 = vld [vmem:[%s8373_s2 + $0x7f0] sm:$0xff] }
 0x1be   : > { %1304 = vmatpush.msra.mxu3 %v912_v48  ;;  %3915 = vmatmul.msk.f32.gmra.mxu2 %vm4812_vm7, %v607_v54  ;;  %v891_v36 = vld [vmem:[%s8373_s2 + $0x850] sm:$0xff] }
 0x1bf   : > { %1258 = vmatpush.msra.mxu1 %v880_v49  ;;  %1285 = vmatpush.msra.mxu2 %v892_v50 }
 0x1c0   : > { %1305 = vmatpush.msra.mxu3 %v911_v12 }
 0x1c1   : > { %1259 = vmatpush.msra.mxu1 %v879_v11  ;;  %1286 = vmatpush.msra.mxu2 %v891_v36 }
 0x1c2   : > { %1306 = vmatpush.msra.mxu3 %v910_v44 }
 0x1c3   : > { %1260 = vmatpush.msra.mxu1 %v878_v15  ;;  %1287 = vmatpush.msra.mxu2 %v890_v18 }
 0x1c4   : > { %1307 = vmatpush.msra.mxu3 %v909_v32 }
 0x1c5   : > { %1261 = vmatpush.msra.mxu1 %v877_v53  ;;  %1288 = vmatpush.msra.mxu2 %v889_v26 }
 0x1c6   : > { %3917 = vmatmul.msk.f32.gmra.mxu3 %vm4812_vm7, %v608_v58  ;;  %3913 = vmatmul.msk.f32.gmra.mxu1 %vm4978_vm9, %v600_v60 }
 0x1c7   : > { %1308 = vmatpush.msra.mxu3 %v908_v55  ;;  %1262 = vmatpush.msra.mxu1 %v876_v56 }
 0x1c8   : > { %1289 = vmatpush.msra.mxu2 %v888_v61  ;;  %v1441_v61 = vld [vmem:[%s8374_s3 + $0x78] sm:$0xff] }
 0x1c9   : > { %1309 = vmatpush.msra.mxu3 %v907_v0  ;;  %1263 = vmatpush.msra.mxu1 %v875_v17 }
 0x1ca   : > { %1290 = vmatpush.msra.mxu2 %v887_v29  ;;  %1570 = vmatpush.msra.mxu0 %v1441_v61  ;;  %v1428_v61 = vld [vmem:[%s8374_s3 + $0x10] sm:$0xff] }
 0x1cb   : > { %1310 = vmatpush.msra.mxu3 %v906_v1  ;;  %1264 = vmatpush.msra.mxu1 %v874_v3  ;;  %v1440_v1 = vld [vmem:[%s8374_s3 + $0x70] sm:$0xff] }
 0x1cc   : > { %1291 = vmatpush.msra.mxu2 %v886_v28  ;;  %1571 = vmatpush.msra.mxu0 %v1440_v1  ;;  %v1483_v1 = vld [vmem:[%s8374_s3 + $0x1c8] sm:$0xff] }
 0x1cd   : > { %1311 = vmatpush.msra.mxu3 %v905_v4  ;;  %1265 = vmatpush.msra.mxu1 %v873_v43  ;;  %v1439_v43 = vld [vmem:[%s8374_s3 + $0x68] sm:$0xff] }
 0x1ce   : > { %1292 = vmatpush.msra.mxu2 %v885_v5  ;;  %1572 = vmatpush.msra.mxu0 %v1439_v43  ;;  %v1438_v5 = vld [vmem:[%s8374_s3 + $0x60] sm:$0xff] }
 0x1cf   : > { %1312 = vmatpush.msra.mxu3 %v904_v6  ;;  %1266 = vmatpush.msra.mxu1 %v872_v23  ;;  %v1450_v43 = vld [vmem:[%s8374_s3 + $0xc0] sm:$0xff] }
 0x1d0   : > { %1293 = vmatpush.msra.mxu2 %v884_v19  ;;  %1573 = vmatpush.msra.mxu0 %v1438_v5  ;;  %v1466_v5 = vld [vmem:[%s8374_s3 + $0x140] sm:$0xff] }
 0x1d1   : > { %1313 = vmatpush.msra.mxu3 %v903_v21  ;;  %1267 = vmatpush.msra.mxu1 %v871_v13  ;;  %v1437_v21 = vld [vmem:[%s8374_s3 + $0x58] sm:$0xff] }
 0x1d2   : > { %1294 = vmatpush.msra.mxu2 %v883_v25  ;;  %1574 = vmatpush.msra.mxu0 %v1437_v21  ;;  %v1426_v21 = vld [vmem:[%s8374_s3] sm:$0xff] }
 0x1d3   : > { %1314 = vmatpush.msra.mxu3 %v902_v63  ;;  %1268 = vmatpush.msra.mxu1 %v870_v2  ;;  %v1436_v2 = vld [vmem:[%s8374_s3 + $0x50] sm:$0xff] }
 0x1d4   : > { %1295 = vmatpush.msra.mxu2 %v882_v30  ;;  %1575 = vmatpush.msra.mxu0 %v1436_v2  ;;  %v1481_v2 = vld [vmem:[%s8374_s3 + $0x1b8] sm:$0xff] }
 0x1d5   : > { %1315 = vmatpush.msra.mxu3 %v901_v16  ;;  %1269 = vmatpush.msra.mxu1 %v869_v62  ;;  %v1435_v16 = vld [vmem:[%s8374_s3 + $0x48] sm:$0xff] }
 0x1d6   : > { %1296 = vmatpush.msra.mxu2 %v881_v31  ;;  %1576 = vmatpush.msra.mxu0 %v1435_v16 }
 0x1d7   : > { %3920 = vmatmul.msk.f32.vlgmr.msra.gmra.mxu2 %vm4911_vm8, %v4860_v59  ;;  %1316 = vmatpush.msra.mxu3 %v900_v33  ;;  %v897_v59 = vld [vmem:[%s8373_s2 + $0x880] sm:$0xff] }
 0x1d8   : > { %1270 = vmatpush.msra.mxu1 %v868_v34  ;;  %v1434_v33 = vld [vmem:[%s8374_s3 + $0x40] sm:$0xff]  ;;  %v1457_v34 = vld [vmem:[%s8374_s3 + $0xf8] sm:$0xff] }
 0x1d9   : > { %1317 = vmatpush.msra.mxu3 %v899_v35  ;;  %1577 = vmatpush.msra.mxu0 %v1434_v33  ;;  %v1464_v33 = vld [vmem:[%s8374_s3 + $0x130] sm:$0xff] }
 0x1da   : > { %1271 = vmatpush.msra.mxu1 %v867_v24  ;;  %v1473_v24 = vld [vmem:[%s8374_s3 + $0x178] sm:$0xff] }
 0x1db   : > { %1318 = vmatpush.msra.mxu3 %v898_v38  ;;  %v1489_v38 = vld [vmem:[%s8374_s3 + $0x1f8] sm:$0xff]  ;;  %1616 = vmatpush.msrb.mxu2 %v1473_v24 }
 0x1dc   : > { %1272 = vmatpush.msra.mxu1 %v866_v40 }
 0x1dd   : > { %1319 = vmatpush.msra.mxu3 %v897_v59  ;;  %v1433_v59 = vld [vmem:[%s8374_s3 + $0x38] sm:$0xff] }
 0x1de   : > { %1273 = vmatpush.msra.mxu1 %v865_v57  ;;  %3922 = vmatmul.msk.f32.vlgmr.msra.gmra.mxu3 %vm4911_vm8, %v4774_v27  ;;  %v1456_v57 = vld [vmem:[%s8374_s3 + $0xf0] sm:$0xff] }
 0x1df   : > { %1274 = vmatmul.f32.vlgmr.msra.gmra.mxu1 %v5053_v22  ;;  %3921 = vmatmul.msk.f32.gmra.mxu2 %vm4978_vm9, %v619_v41 }
 0x1e0   : > { %1593 = vmatpush.msrb.mxu1 %v1457_v34  ;;  %1639 = vmatpush.msrb.mxu3 %v1489_v38  ;;  %v1480_v34 = vld [vmem:[%s8374_s3 + $0x1b0] sm:$0xff]  ;;  %v1447_v38 = vld [vmem:[%s8374_s3 + $0xa8] sm:$0xff] }
 0x1e1   : > { %1578 = vmatpush.msra.mxu0 %v1433_v59  ;;  %v1463_v59 = vld [vmem:[%s8374_s3 + $0x128] sm:$0xff] }
 0x1e2   : > { %1594 = vmatpush.msrb.mxu1 %v1456_v57  ;;  %v1479_v57 = vld [vmem:[%s8374_s3 + $0x1a8] sm:$0xff] }
 0x1e6   : > { %3923 = vmatmul.msk.f32.gmra.mxu3 %vm4978_vm9, %v620_v42  ;;  %v1472_v42 = vld [vmem:[%s8374_s3 + $0x170] sm:$0xff] }
 0x1e7   : > { %3919 = vmatmul.msk.f32.gmra.mxu1 %vm539_vm5, %v544_v9  ;;  %1617 = vmatpush.msrb.mxu2 %v1472_v42 }
 0x1ef   : > { %v953_v27 = vpop.f32.mrf.mxu2 }
 0x1f1   : > { %v930_v10 = vpop.f32.mrf.mxu1 }
 0x1f2   : > { %v1068_v11 = vpop.f32.mrf.mxu0  ;;  %v954_v20 = vadd.f32 %v953_v27, %v930_v10  ;;  %v1488_v27 = vld [vmem:[%s8374_s3 + $0x1f0] sm:$0xff] }
 0x1f3   : > { %1640 = vmatpush.msrb.mxu3 %v1488_v27 }
 0x1f6   : > { %v976_v45 = vpop.f32.mrf.mxu3 }
 0x1f7   : > { %v977_v44 = vadd.f32 %v976_v45, %v954_v20  ;;  %v1432_v45 = vld [vmem:[%s8374_s3 + $0x30] sm:$0xff]  ;;  %v1486_v20 = vld [vmem:[%s8374_s3 + $0x1e0] sm:$0xff] }
 0x1f8   : > { %v956_v47 = vpop.f32.mrf.mxu2  ;;  %1579 = vmatpush.msra.mxu0 %v1432_v45  ;;  %v1446_v45 = vld [vmem:[%s8374_s3 + $0xa0] sm:$0xff] }
 0x1fb   : > { %v933_v46 = vpop.f32.mrf.mxu1 }
 0x1fc   : > { %v957_v18 = vadd.f32 %v956_v47, %v933_v46  ;;  %v1071_v53 = vpop.f32.mrf.mxu0  ;;  %v1455_v47 = vld [vmem:[%s8374_s3 + $0xe8] sm:$0xff] }
 0x1fd   : > { %1595 = vmatpush.msrb.mxu1 %v1455_v47  ;;  %v1471_v46 = vld [vmem:[%s8374_s3 + $0x168] sm:$0xff] }
 0x1fe   : > { %1618 = vmatpush.msrb.mxu2 %v1471_v46  ;;  %v1462_v46 = vld [vmem:[%s8374_s3 + $0x120] sm:$0xff] }
 0x200   : > { %v979_v22 = vpop.f32.mrf.mxu3 }
 0x201   : > { %v980_v9 = vadd.f32 %v979_v22, %v957_v18  ;;  %v1487_v22 = vld [vmem:[%s8374_s3 + $0x1e8] sm:$0xff] }
 0x202   : > { %v1022_v48 = vpop.f32.mrf.mxu2  ;;  %1641 = vmatpush.msrb.mxu3 %v1487_v22  ;;  %v1478_v22 = vld [vmem:[%s8374_s3 + $0x1a0] sm:$0xff] }
 0x204   : > { %1642 = vmatpush.msrb.mxu3 %v1486_v20  ;;  %v1477_v20 = vld [vmem:[%s8374_s3 + $0x198] sm:$0xff] }
 0x205   : > { %v999_v49 = vpop.f32.mrf.mxu1 }
 0x206   : > { %v1000_v15 = vadd.f32 %v999_v49, %v977_v44  ;;  %v1430_v44 = vld [vmem:[%s8374_s3 + $0x20] sm:$0xff] }
 0x207   : > { %v1160_v28 = vpop.f32.mrf.mxu0 }
 0x208   : > { %v1023_v26 = vadd.f32 %v1022_v48, %v1000_v15  ;;  %v1453_v15 = vld [vmem:[%s8374_s3 + $0xd8] sm:$0xff] }
 0x20a   : > { %v1045_v50 = vpop.f32.mrf.mxu3 }
 0x20b   : > { %v1046_v58 = vadd.f32 %v1045_v50, %v1023_v26  ;;  %v1431_v50 = vld [vmem:[%s8374_s3 + $0x28] sm:$0xff]  ;;  %v1452_v26 = vld [vmem:[%s8374_s3 + $0xd0] sm:$0xff] }
 0x20c   : > { %v1025_v54 = vpop.f32.mrf.mxu2  ;;  %1580 = vmatpush.msra.mxu0 %v1431_v50  ;;  %v1445_v50 = vld [vmem:[%s8374_s3 + $0x98] sm:$0xff] }
 0x20d   : > { %v1069_v0 = vadd.f32 %v1068_v11, %v1046_v58  ;;  %v1470_v11 = vld [vmem:[%s8374_s3 + $0x160] sm:$0xff]  ;;  %v1484_v58 = vld [vmem:[%s8374_s3 + $0x1d0] sm:$0xff] }
 0x20e   : > { %1619 = vmatpush.msrb.mxu2 %v1470_v11  ;;  %1581 = vmatpush.msra.mxu0 %v1430_v44  ;;  %v1461_v11 = vld [vmem:[%s8374_s3 + $0x118] sm:$0xff] }
 0x210   : > { %v1002_v12 = vpop.f32.mrf.mxu1 }
 0x211   : > { %v1003_v55 = vadd.f32 %v1002_v12, %v980_v9  ;;  %v1163_v31 = vpop.f32.mrf.mxu0 }
 0x213   : > { %v1026_v60 = vadd.f32 %v1025_v54, %v1003_v55  ;;  %v1454_v54 = vld [vmem:[%s8374_s3 + $0xe0] sm:$0xff] }
 0x214   : > { %v1048_v36 = vpop.f32.mrf.mxu3  ;;  %1596 = vmatpush.msrb.mxu1 %v1454_v54 }
 0x215   : > { %v1049_v3 = vadd.f32 %v1048_v36, %v1026_v60 }
 0x216   : > { %v1114_v52 = vpop.f32.mrf.mxu2  ;;  %1597 = vmatpush.msrb.mxu1 %v1453_v15  ;;  %v1444_v15 = vld [vmem:[%s8374_s3 + $0x90] sm:$0xff] }
 0x217   : > { %v1072_v6 = vadd.f32 %v1071_v53, %v1049_v3  ;;  %v1429_v53 = vld [vmem:[%s8374_s3 + $0x18] sm:$0xff] }
 0x218   : > { %1582 = vmatpush.msra.mxu0 %v1429_v53  ;;  %1598 = vmatpush.msrb.mxu1 %v1452_v26  ;;  %v1443_v26 = vld [vmem:[%s8374_s3 + $0x88] sm:$0xff] }
 0x21a   : > { %v1091_v32 = vpop.f32.mrf.mxu1  ;;  %1583 = vmatpush.msra.mxu0 %v1428_v61 }
 0x21b   : > { %v1092_v4 = vadd.f32 %v1091_v32, %v1069_v0  ;;  %v1485_v32 = vld [vmem:[%s8374_s3 + $0x1d8] sm:$0xff]  ;;  %v1451_v0 = vld [vmem:[%s8374_s3 + $0xc8] sm:$0xff] }
 0x21c   : > { %v1252_v9 = vpop.f32.mrf.mxu0  ;;  %1643 = vmatpush.msrb.mxu3 %v1485_v32  ;;  %1599 = vmatpush.msrb.mxu1 %v1451_v0  ;;  %v1476_v32 = vld [vmem:[%s8374_s3 + $0x190] sm:$0xff] }
 0x21d   : > { %v1115_v19 = vadd.f32 %v1114_v52, %v1092_v4  ;;  %v1469_v52 = vld [vmem:[%s8374_s3 + $0x158] sm:$0xff]  ;;  %v1427_v4 = vld [vmem:[%s8374_s3 + $0x8] sm:$0xff] }
 0x21e   : > { %1620 = vmatpush.msrb.mxu2 %v1469_v52  ;;  %1644 = vmatpush.msrb.mxu3 %v1484_v58  ;;  %v1460_v52 = vld [vmem:[%s8374_s3 + $0x110] sm:$0xff]  ;;  %v1475_v58 = vld [vmem:[%s8374_s3 + $0x188] sm:$0xff] }
 0x21f   : > { %v1137_v56 = vpop.f32.mrf.mxu3  ;;  %1584 = vmatpush.msra.mxu0 %v1427_v4  ;;  %1600 = vmatpush.msrb.mxu1 %v1450_v43 }
 0x220   : > { %v1138_v30 = vadd.f32 %v1137_v56, %v1115_v19  ;;  %v1468_v56 = vld [vmem:[%s8374_s3 + $0x150] sm:$0xff]  ;;  %1645 = vmatpush.msrb.mxu3 %v1483_v1  ;;  %v4168_v19 = vmov 16.0   ;;  %v1458_v1 = vld [vmem:[%s8374_s3 + $0x100] sm:$0xff] }
 0x221   : > { %v1117_v17 = vpop.f32.mrf.mxu2  ;;  %1621 = vmatpush.msrb.mxu2 %v1468_v56  ;;  %4144 = vrcp.f32 %v4168_v19  ;;  %1585 = vmatpush.msra.mxu0 %v1426_v21  ;;  %v1459_v56 = vld [vmem:[%s8374_s3 + $0x108] sm:$0xff]  ;;  %v1497_v21 = vld [vmem:[%s8374_s3 + $0x238] sm:$0xff] }
 0x222   : > { %v1161_v40 = vadd.f32 %v1160_v28, %v1138_v30  ;;  %v1505_v30 = vld [vmem:[%s8374_s3 + $0x278] sm:$0xff] }
 0x223   : > { %v1094_v29 = vpop.f32.mrf.mxu1  ;;  %1662 = vmatpush.msrb.mxu0 %v1505_v30  ;;  %v1552_v30 = vld [vmem:[%s8374_s3 + $0x3f0] sm:$0xff] }
 0x224   : > { %v1095_v13 = vadd.f32 %v1094_v29, %v1072_v6  ;;  %v1467_v29 = vld [vmem:[%s8374_s3 + $0x148] sm:$0xff]  ;;  %v1482_v6 = vld [vmem:[%s8374_s3 + $0x1c0] sm:$0xff]  ;;  %v1255_v24 = vpop.f32.mrf.mxu0 }
 0x225   : > { %1622 = vmatpush.msrb.mxu2 %v1467_v29  ;;  %1646 = vmatpush.msrb.mxu3 %v1482_v6  ;;  %v1442_v29 = vld [vmem:[%s8374_s3 + $0x80] sm:$0xff]  ;;  %v1537_v6 = vld [vmem:[%s8374_s3 + $0x378] sm:$0xff] }
 0x226   : > { %v1118_v62 = vadd.f32 %v1117_v17, %v1095_v13  ;;  %v1449_v13 = vld [vmem:[%s8374_s3 + $0xb8] sm:$0xff] }
 0x227   : > { %1623 = vmatpush.msrb.mxu2 %v1466_v5  ;;  %1601 = vmatpush.msrb.mxu1 %v1449_v13  ;;  %v5592_v42 = vpop.eup %4144  ;;  %v1521_v5 = vld [vmem:[%s8374_s3 + $0x2f8] sm:$0xff]  ;;  %v1520_v13 = vld [vmem:[%s8374_s3 + $0x2f0] sm:$0xff] }
 0x228   : > { %v1140_v23 = vpop.f32.mrf.mxu3  ;;  %1647 = vmatpush.msrb.mxu3 %v1481_v2  ;;  %v1536_v2 = vld [vmem:[%s8374_s3 + $0x370] sm:$0xff]  ;;  %vm1339_vm10 = vweird.f32 %v5592_v42 }
 0x229   : > { %v1141_v41 = vadd.f32 %v1140_v23, %v1118_v62  ;;  %v1448_v62 = vld [vmem:[%s8374_s3 + $0xb0] sm:$0xff] }
 0x22a   : > { %1602 = vmatpush.msrb.mxu1 %v1448_v62  ;;  %1648 = vmatpush.msrb.mxu3 %v1480_v34  ;;  %v1519_v62 = vld [vmem:[%s8374_s3 + $0x2e8] sm:$0xff] }
 0x22b   : > { %v1164_v12 = vadd.f32 %v1163_v31, %v1141_v41  ;;  %v1503_v41 = vld [vmem:[%s8374_s3 + $0x268] sm:$0xff] }
 0x22c   : > { %1603 = vmatpush.msrb.mxu1 %v1447_v38  ;;  %1649 = vmatpush.msrb.mxu3 %v1479_v57  ;;  %v1535_v34 = vld [vmem:[%s8374_s3 + $0x368] sm:$0xff] }
 0x22d   : > { %v1495_v38 = vld [vmem:[%s8374_s3 + $0x228] sm:$0xff] }
 0x22e   : > { %1604 = vmatpush.msrb.mxu1 %v1446_v45  ;;  %1650 = vmatpush.msrb.mxu3 %v1478_v22  ;;  %v1517_v45 = vld [vmem:[%s8374_s3 + $0x2d8] sm:$0xff] }
 0x22f   : > { %v1533_v22 = vld [vmem:[%s8374_s3 + $0x358] sm:$0xff] }
 0x230   : > { %1605 = vmatpush.msrb.mxu1 %v1445_v50  ;;  %1651 = vmatpush.msrb.mxu3 %v1477_v20  ;;  %v1493_v50 = vld [vmem:[%s8374_s3 + $0x218] sm:$0xff]  ;;  %v1532_v20 = vld [vmem:[%s8374_s3 + $0x350] sm:$0xff] }
 0x232   : > { %1606 = vmatpush.msrb.mxu1 %v1444_v15  ;;  %1652 = vmatpush.msrb.mxu3 %v1476_v32  ;;  %v1515_v15 = vld [vmem:[%s8374_s3 + $0x2c8] sm:$0xff] }
 0x233   : > { %v1531_v32 = vld [vmem:[%s8374_s3 + $0x348] sm:$0xff] }
 0x234   : > { %1607 = vmatpush.msrb.mxu1 %v1443_v26  ;;  %1653 = vmatpush.msrb.mxu3 %v1475_v58  ;;  %v1491_v26 = vld [vmem:[%s8374_s3 + $0x208] sm:$0xff] }
 0x236   : > { %1608 = vmatpush.msrb.mxu1 %v1442_v29  ;;  %v1513_v29 = vld [vmem:[%s8374_s3 + $0x2b8] sm:$0xff] }
 0x238   : > { %v1206_v25 = vpop.f32.mrf.mxu2  ;;  %1685 = vmatpush.msra.mxu1 %v1521_v5  ;;  %v1544_v5 = vld [vmem:[%s8374_s3 + $0x3b0] sm:$0xff] }
 0x23a   : > { %v1183_v63 = vpop.f32.mrf.mxu1  ;;  %1686 = vmatpush.msra.mxu1 %v1520_v13  ;;  %v1510_v13 = vld [vmem:[%s8374_s3 + $0x2a0] sm:$0xff] }
 0x23b   : > { %v1184_v10 = vadd.f32 %v1183_v63, %v1161_v40  ;;  %v1465_v63 = vld [vmem:[%s8374_s3 + $0x138] sm:$0xff] }
 0x23c   : > { %1624 = vmatpush.msrb.mxu2 %v1465_v63  ;;  %1687 = vmatpush.msra.mxu1 %v1519_v62  ;;  %v1508_v62 = vld [vmem:[%s8374_s3 + $0x290] sm:$0xff] }
 0x23d   : > { %v1207_v36 = vadd.f32 %v1206_v25, %v1184_v10 }
 0x23e   : > { %1625 = vmatpush.msrb.mxu2 %v1464_v33 }
 0x240   : > { %v1229_v35 = vpop.f32.mrf.mxu3  ;;  %1626 = vmatpush.msrb.mxu2 %v1463_v59 }
 0x241   : > { %v1209_v48 = vpop.f32.mrf.mxu2  ;;  %v1230_v60 = vadd.f32 %v1229_v35, %v1207_v36  ;;  %v1504_v35 = vld [vmem:[%s8374_s3 + $0x270] sm:$0xff]  ;;  %v1501_v36 = vld [vmem:[%s8374_s3 + $0x258] sm:$0xff] }
 0x242   : > { %1663 = vmatpush.msrb.mxu0 %v1504_v35  ;;  %1627 = vmatpush.msrb.mxu2 %v1462_v46  ;;  %v1551_v35 = vld [vmem:[%s8374_s3 + $0x3e8] sm:$0xff] }
 0x243   : > { %v1186_v49 = vpop.f32.mrf.mxu1  ;;  %v1253_v23 = vadd.f32 %v1252_v9, %v1230_v60  ;;  %v1500_v9 = vld [vmem:[%s8374_s3 + $0x250] sm:$0xff]  ;;  %v1499_v60 = vld [vmem:[%s8374_s3 + $0x248] sm:$0xff] }
 0x244   : > { %v1187_v18 = vadd.f32 %v1186_v49, %v1164_v12  ;;  %1664 = vmatpush.msrb.mxu0 %v1503_v41  ;;  %v1335_v12 = vmul.f32 16.0, %v5592_v42  ;;  %1628 = vmatpush.msrb.mxu2 %v1461_v11  ;;  %v1534_v41 = vld [vmem:[%s8374_s3 + $0x360] sm:$0xff] }
 0x246   : > { %v1210_v17 = vadd.f32 %v1209_v48, %v1187_v18  ;;  %v1502_v48 = vld [vmem:[%s8374_s3 + $0x260] sm:$0xff]  ;;  %1629 = vmatpush.msrb.mxu2 %v1460_v52 }
 0x247   : > { %1665 = vmatpush.msrb.mxu0 %v1502_v48  ;;  %v1549_v48 = vld [vmem:[%s8374_s3 + $0x3d8] sm:$0xff] }
 0x248   : > { %1630 = vmatpush.msrb.mxu2 %v1459_v56 }
 0x249   : > { %v1232_v55 = vpop.f32.mrf.mxu3  ;;  %1666 = vmatpush.msrb.mxu0 %v1501_v36  ;;  %v1492_v36 = vld [vmem:[%s8374_s3 + $0x210] sm:$0xff] }
 0x24a   : > { %v1233_v25 = vadd.f32 %v1232_v55, %v1210_v17  ;;  %v1336_v55 = vsub.f32 1.0, %v1335_v12  ;;  %1631 = vmatpush.msrb.mxu2 %v1458_v1  ;;  %v1529_v1 = vld [vmem:[%s8374_s3 + $0x338] sm:$0xff] }
 0x24b   : > { %1667 = vmatpush.msrb.mxu0 %v1500_v9  ;;  %v1547_v9 = vld [vmem:[%s8374_s3 + $0x3c8] sm:$0xff] }
 0x24c   : > { %v1256_v40 = vadd.f32 %v1255_v24, %v1233_v25  ;;  %v1337_v19 = vmul.f32 %v5592_v42, %v1336_v55  ;;  %1708 = vmatpush.msra.mxu2 %v1537_v6  ;;  %v1514_v55 = vld [vmem:[%s8374_s3 + $0x2c0] sm:$0xff]  ;;  %v1511_v6 = vld [vmem:[%s8374_s3 + $0x2a8] sm:$0xff] }
 0x24d   : > { %1668 = vmatpush.msrb.mxu0 %v1499_v60  ;;  %v1530_v60 = vld [vmem:[%s8374_s3 + $0x340] sm:$0xff] }
 0x24e   : > { %1709 = vmatpush.msra.mxu2 %v1536_v2  ;;  %v1338_v24 = vadd.f32 %v5592_v42, %v1337_v19  ;;  %v1509_v2 = vld [vmem:[%s8374_s3 + $0x298] sm:$0xff] }
 0x250   : > { %1710 = vmatpush.msra.mxu2 %v1535_v34  ;;  %v1507_v34 = vld [vmem:[%s8374_s3 + $0x288] sm:$0xff] }
 0x252   : > { %1711 = vmatpush.msra.mxu2 %v1534_v41  ;;  %v1522_v41 = vld [vmem:[%s8374_s3 + $0x300] sm:$0xff] }
 0x254   : > { %1712 = vmatpush.msra.mxu2 %v1533_v22 }
 0x256   : > { %1713 = vmatpush.msra.mxu2 %v1532_v20 }
 0x258   : > { %1714 = vmatpush.msra.mxu2 %v1531_v32 }
 0x25a   : > { %v1298_v3 = vpop.f32.mrf.mxu2  ;;  %1715 = vmatpush.msra.mxu2 %v1530_v60 }
 0x25c   : > { %v1275_v28 = vpop.f32.mrf.mxu1  ;;  %1716 = vmatpush.msra.mxu2 %v1529_v1 }
 0x25d   : > { %v1276_v16 = vadd.f32 %v1275_v28, %v1253_v23  ;;  %v1498_v28 = vld [vmem:[%s8374_s3 + $0x240] sm:$0xff]  ;;  %v1553_v23 = vld [vmem:[%s8374_s3 + $0x3f8] sm:$0xff] }
 0x25e   : > { %1669 = vmatpush.msrb.mxu0 %v1498_v28 }
 0x25f   : > { %v1299_v27 = vadd.f32 %v1298_v3, %v1276_v16  ;;  %v1474_v3 = vld [vmem:[%s8374_s3 + $0x180] sm:$0xff]  ;;  %v1496_v16 = vld [vmem:[%s8374_s3 + $0x230] sm:$0xff] }
 0x260   : > { %1654 = vmatpush.msrb.mxu3 %v1474_v3  ;;  %1670 = vmatpush.msrb.mxu0 %v1497_v21  ;;  %v1545_v3 = vld [vmem:[%s8374_s3 + $0x3b8] sm:$0xff]  ;;  %v1543_v21 = vld [vmem:[%s8374_s3 + $0x3a8] sm:$0xff] }
 0x261   : > { %v1321_v31 = vpop.f32.mrf.mxu3 }
 0x262   : > { %v1301_v49 = vpop.f32.mrf.mxu2  ;;  %v5619_v44 = vadd.f32 %v1321_v31, %v1299_v27  ;;  %1731 = vmatpush.msra.mxu3 %v1553_v23  ;;  %1671 = vmatpush.msrb.mxu0 %v1496_v16  ;;  %v1550_v27 = vld [vmem:[%s8374_s3 + $0x3e0] sm:$0xff]  ;;  %v1527_v23 = vld [vmem:[%s8374_s3 + $0x328] sm:$0xff]  ;;  %v1541_v16 = vld [vmem:[%s8374_s3 + $0x398] sm:$0xff] }
 0x264   : > { %v1278_v10 = vpop.f32.mrf.mxu1  ;;  %v1342_v61 = vmul.f32 %v5619_v44, %v5619_v44  ;;  %1732 = vmatpush.msra.mxu3 %v1552_v30  ;;  %1672 = vmatpush.msrb.mxu0 %v1495_v38  ;;  %v1525_v30 = vld [vmem:[%s8374_s3 + $0x318] sm:$0xff]  ;;  %v1539_v38 = vld [vmem:[%s8374_s3 + $0x388] sm:$0xff] }
 0x265   : > { %v1279_v47 = vadd.f32 %v1278_v10, %v1256_v40  ;;  %v1518_v40 = vld [vmem:[%s8374_s3 + $0x2e0] sm:$0xff] }
 0x266   : > { %1733 = vmatpush.msra.mxu3 %v1551_v35  ;;  %1688 = vmatpush.msra.mxu1 %v1518_v40  ;;  %v1494_v10 = vld [vmem:[%s8374_s3 + $0x220] sm:$0xff] }
 0x267   : > { %v1302_v54 = vadd.f32 %v1301_v49, %v1279_v47  ;;  %v5728_v49 = vsel %vm1339_vm10, %v5592_v42, %v1338_v24  ;;  %1673 = vmatpush.msrb.mxu0 %v1494_v10  ;;  %v1548_v42 = vld [vmem:[%s8374_s3 + $0x3d0] sm:$0xff]  ;;  %v1523_v24 = vld [vmem:[%s8374_s3 + $0x308] sm:$0xff] }
 0x268   : > { %1734 = vmatpush.msra.mxu3 %v1550_v27  ;;  %1689 = vmatpush.msra.mxu1 %v1517_v45  ;;  %v1538_v27 = vld [vmem:[%s8374_s3 + $0x380] sm:$0xff] }
 0x269   : > { %v1324_v18 = vpop.f32.mrf.mxu3  ;;  %1674 = vmatpush.msrb.mxu0 %v1493_v50 }
 0x26a   : > { %v5633_v53 = vadd.f32 %v1324_v18, %v1302_v54  ;;  %v1516_v54 = vld [vmem:[%s8374_s3 + $0x2d0] sm:$0xff]  ;;  %1735 = vmatpush.msra.mxu3 %v1549_v48 }
 0x26b   : > { %1690 = vmatpush.msra.mxu1 %v1516_v54  ;;  %1675 = vmatpush.msrb.mxu0 %v1492_v36 }
 0x26c   : > { %v1327_v0 = vadd.f32 %v5633_v53, %v5619_v44  ;;  %v1343_v17 = vmul.f32 %v5633_v53, %v5633_v53  ;;  %1736 = vmatpush.msra.mxu3 %v1548_v42 }
 0x26d   : > { %1691 = vmatpush.msra.mxu1 %v1515_v15  ;;  %1676 = vmatpush.msrb.mxu0 %v1491_v26  ;;  %v1568_v26 = vld [vmem:[%s8374_s3 + $0x470] sm:$0xff] }
 0x26e   : > { %v1328_v4 = vrot.slane %v1327_v0, 4  ;;  %v1344_v43 = vadd.f32 %v1343_v17, %v1342_v61  ;;  %v1546_v61 = vld [vmem:[%s8374_s3 + $0x3c0] sm:$0xff]  ;;  %1737 = vmatpush.msra.mxu3 %v1547_v9 }
 0x26f   : > { %1692 = vmatpush.msra.mxu1 %v1514_v55  ;;  %v1490_v17 = vld [vmem:[%s8374_s3 + $0x200] sm:$0xff]  ;;  %v1567_v55 = vld [vmem:[%s8374_s3 + $0x468] sm:$0xff] }
 0x270   : > { %v1329_v25 = vadd.f32 %v1328_v4, %v1327_v0  ;;  %v1345_v63 = vrot.slane %v1344_v43, 4  ;;  %1738 = vmatpush.msra.mxu3 %v1546_v61  ;;  %1677 = vmatpush.msrb.mxu0 %v1490_v17  ;;  %v1512_v4 = vld [vmem:[%s8374_s3 + $0x2b0] sm:$0xff]  ;;  %v1566_v61 = vld [vmem:[%s8374_s3 + $0x460] sm:$0xff] }
 0x271   : > { %1693 = vmatpush.msra.mxu1 %v1513_v29  ;;  %v1565_v29 = vld [vmem:[%s8374_s3 + $0x458] sm:$0xff] }
 0x272   : > { %v1330_v31 = vrot.slane %v1329_v25, 2  ;;  %v1346_v33 = vadd.f32 %v1345_v63, %v1344_v43  ;;  %v1528_v43 = vld [vmem:[%s8374_s3 + $0x330] sm:$0xff]  ;;  %1739 = vmatpush.msra.mxu3 %v1545_v3  ;;  %v1542_v63 = vld [vmem:[%s8374_s3 + $0x3a0] sm:$0xff] }
 0x273   : > { %1694 = vmatpush.msra.mxu1 %v1512_v4  ;;  %1717 = vmatpush.msra.mxu2 %v1528_v43  ;;  %v1564_v4 = vld [vmem:[%s8374_s3 + $0x450] sm:$0xff]  ;;  %v1563_v43 = vld [vmem:[%s8374_s3 + $0x448] sm:$0xff] }
 0x274   : > { %v1331_v59 = vadd.f32 %v1330_v31, %v1329_v25  ;;  %v1347_v57 = vrot.slane %v1346_v33, 2  ;;  %1740 = vmatpush.msra.mxu3 %v1544_v5  ;;  %v1526_v25 = vld [vmem:[%s8374_s3 + $0x320] sm:$0xff]  ;;  %v1524_v31 = vld [vmem:[%s8374_s3 + $0x310] sm:$0xff] }
 0x275   : > { %1695 = vmatpush.msra.mxu1 %v1511_v6  ;;  %1718 = vmatpush.msra.mxu2 %v1527_v23  ;;  %v1562_v23 = vld [vmem:[%s8374_s3 + $0x440] sm:$0xff] }
 0x276   : > { %v1332_v47 = vrot.slane %v1331_v59, 1  ;;  %v1348_v46 = vadd.f32 %v1347_v57, %v1346_v33  ;;  %1741 = vmatpush.msra.mxu3 %v1543_v21  ;;  %v1540_v33 = vld [vmem:[%s8374_s3 + $0x390] sm:$0xff]  ;;  %v1561_v21 = vld [vmem:[%s8374_s3 + $0x438] sm:$0xff] }
 0x277   : > { %1696 = vmatpush.msra.mxu1 %v1510_v13  ;;  %1719 = vmatpush.msra.mxu2 %v1526_v25  ;;  %v1560_v13 = vld [vmem:[%s8374_s3 + $0x430] sm:$0xff]  ;;  %v1559_v25 = vld [vmem:[%s8374_s3 + $0x428] sm:$0xff] }
 0x278   : > { %v1333_v12 = vadd.f32 %v1332_v47, %v1331_v59  ;;  %v1349_v11 = vrot.slane %v1348_v46, 1  ;;  %1742 = vmatpush.msra.mxu3 %v1542_v63  ;;  %v1506_v59 = vld [vmem:[%s8374_s3 + $0x280] sm:$0xff] }
 0x279   : > { %1697 = vmatpush.msra.mxu1 %v1509_v2  ;;  %1720 = vmatpush.msra.mxu2 %v1525_v30  ;;  %v1558_v63 = vld [vmem:[%s8374_s3 + $0x420] sm:$0xff]  ;;  %v1557_v30 = vld [vmem:[%s8374_s3 + $0x418] sm:$0xff] }
 0x27a   : > { %v5749_v18 = vmul.f32 %v5728_v49, %v1333_v12  ;;  %v1350_v52 = vadd.f32 %v1349_v11, %v1348_v46  ;;  %1743 = vmatpush.msra.mxu3 %v1541_v16 }
 0x27b   : > { %1698 = vmatpush.msra.mxu1 %v1508_v62  ;;  %1721 = vmatpush.msra.mxu2 %v1524_v31  ;;  %v1556_v62 = vld [vmem:[%s8374_s3 + $0x410] sm:$0xff]  ;;  %v1555_v31 = vld [vmem:[%s8374_s3 + $0x408] sm:$0xff] }
 0x27c   : > { %v1351_v56 = vmul.f32 %v1350_v52, %v5728_v49  ;;  %v1352_v58 = vmul.f32 %v5749_v18, %v5749_v18  ;;  %1744 = vmatpush.msra.mxu3 %v1540_v33  ;;  %v1355_v46 = vsub.f32 %v5619_v44, %v5749_v18  ;;  %v1356_v22 = vsub.f32 %v5633_v53, %v5749_v18  ;;  %v1569_v44 = vld [vmem:[%s8374_s3 + $0x478] sm:$0xff]  ;;  %v1554_v33 = vld [vmem:[%s8374_s3 + $0x400] sm:$0xff] }
 0x27d   : > { %1699 = vmatpush.msra.mxu1 %v1507_v34  ;;  %1722 = vmatpush.msra.mxu2 %v1523_v24 }
 0x27e   : > { %v1353_v0 = vsub.f32 %v1351_v56, %v1352_v58  ;;  %1745 = vmatpush.msra.mxu3 %v1539_v38  ;;  %v1884_v38 = vld [vmem:[%s8375_s4 + $0x78] sm:$0xff] }
 0x27f   : > { %1700 = vmatpush.msra.mxu1 %v1506_v59  ;;  %1723 = vmatpush.msra.mxu2 %v1522_v41  ;;  %v1882_v59 = vld [vmem:[%s8375_s4 + $0x68] sm:$0xff]  ;;  %v1881_v41 = vld [vmem:[%s8375_s4 + $0x60] sm:$0xff] }
 0x280   : > { %v1354_v28 = vmax.f32 %v1353_v0, 0.0  ;;  %1746 = vmatpush.msra.mxu3 %v1538_v27 }
 0x282   : > { %v1357_v19 = vadd.f32 1e-05, %v1354_v28 }
 0x284   : > { %4146 = vrsqrt.f32 %v1357_v19  ;;  %vm1364_vm12 = vweird.f32 %v1357_v19 }
 0x28a   : > { %v4147_v35 = vpop.eup %4146 }
 0x28b   : > { %v1359_v40 = vmul.f32 %v4147_v35, %v1357_v19  ;;  %vm1365_vm11 = vweird.f32 %v4147_v35 }
 0x28c   : > { %vm1366_vm3 = vmor %vm1364_vm12, %vm1365_vm11 }
 0x28d   : > { %v1360_v57 = vmul.f32 %v4147_v35, %v1359_v40  ;;  %v1883_v40 = vld [vmem:[%s8375_s4 + $0x70] sm:$0xff] }
 0x28f   : > { %v1361_v10 = vmul.f32 0.5, %v1360_v57 }
 0x291   : > { %v1362_v45 = vsub.f32 1.5, %v1361_v10 }
 0x293   : > { %v1363_v47 = vmul.f32 %v4147_v35, %v1362_v45  ;;  %v1880_v45 = vld [vmem:[%s8375_s4 + $0x58] sm:$0xff] }
 0x295   : > { %v1367_v48 = vsel %vm1366_vm3, %v4147_v35, %v1363_v47 }
 0x296   : > { %v1368_v50 = vmul.f32 %v1367_v48, %v1355_v46  ;;  %v1369_v54 = vmul.f32 %v1367_v48, %v1356_v22  ;;  %v1879_v46 = vld [vmem:[%s8375_s4 + $0x50] sm:$0xff]  ;;  %v1878_v48 = vld [vmem:[%s8375_s4 + $0x48] sm:$0xff] }
 0x298   : > { %vm1370_vm10 = vcmp.ge.f32.partialorder %v1368_v50, 0.0  ;;  %v1372_v12 = vmul.f32 0.05, %v1368_v50  ;;  %v1373_v11 = vmul.f32 0.05, %v1369_v54  ;;  %vm1371_vm0 = vcmp.ge.f32.partialorder %v1369_v54, 0.0 }
 0x29a   : > { %v1374_v20 = vsel %vm1370_vm10, %v1368_v50, %v1372_v12  ;;  %v5854_v32 = vsel %vm1371_vm0, %v1369_v54, %v1373_v11  ;;  %v1877_v54 = vld [vmem:[%s8375_s4 + $0x40] sm:$0xff]  ;;  %v1900_v12 = vld [vmem:[%s8375_s4 + $0xf8] sm:$0xff] }
 0x29b   : > { %v1386_v42 = vrot.slane %v1374_v20, 4  ;;  %v1378_v36 = vrot.slane %v1374_v20, 3  ;;  %v1392_v15 = vrot.slane %v1374_v20, 5  ;;  %v1400_v52 = vrot.slane %v1374_v20, 7  ;;  %v1916_v11 = vld [vmem:[%s8375_s4 + $0x178] sm:$0xff] }
 0x29c   : > { %v1387_v56 = vrot.slane %v5854_v32, 4  ;;  %v1379_v58 = vrot.slane %v5854_v32, 3  ;;  %v1393_v60 = vrot.slane %v5854_v32, 5  ;;  %v1401_v0 = vrot.slane %v5854_v32, 7 }
 0x29d   : > { %3927 = vmatmul.msk.f32.vlgmr.msrb.gmra.mxu1 %vm4806_vm6, %v1386_v42  ;;  %v1383_v53 = vsel %vm520_vm13, 0.0, %v1378_v36  ;;  %v1397_v18 = vsel %vm552_vm2, 0.0, %v1392_v15  ;;  %v1405_v9 = vsel %vm571_vm15, 0.0, %v1400_v52  ;;  %v1408_v5 = vrot.slane %v1374_v20, 1 }
 0x29e   : > { %3924 = vmatmul.msk.f32.vlgmr.msra.gmra.mxu0 %vm4731_vm14, %v1383_v53  ;;  %3928 = vmatmul.msk.f32.vlgmr.msrb.gmra.mxu2 %vm4911_vm8, %v1397_v18  ;;  %v1388_v17 = vsel %vm539_vm5, %v1386_v42, %v1387_v56  ;;  %v1380_v1 = vsel %vm520_vm13, %v1378_v36, %v1379_v58  ;;  %v1394_v3 = vsel %vm552_vm2, %v1392_v15, %v1393_v60  ;;  %v1409_v6 = vrot.slane %v5854_v32, 1  ;;  %v1876_v36 = vld [vmem:[%s8375_s4 + $0x38] sm:$0xff]  ;;  %v1899_v15 = vld [vmem:[%s8375_s4 + $0xf0] sm:$0xff]  ;;  %v1898_v18 = vld [vmem:[%s8375_s4 + $0xe8] sm:$0xff] }
 0x29f   : > { %3930 = vmatmul.msk.f32.vlgmr.msrb.gmra.mxu3 %vm4731_vm14, %v1405_v9  ;;  %1754 = vmatpush.msra.mxu0 %v1569_v44  ;;  %v1402_v28 = vsel %vm571_vm15, %v1400_v52, %v1401_v0  ;;  %v1417_v16 = vsel %vm520_vm13, %v1379_v58, 0.0  ;;  %v1423_v34 = vsel %vm552_vm2, %v1393_v60, 0.0  ;;  %v1915_v44 = vld [vmem:[%s8375_s4 + $0x170] sm:$0xff]  ;;  %v1930_v58 = vld [vmem:[%s8375_s4 + $0x1e8] sm:$0xff]  ;;  %v1897_v0 = vld [vmem:[%s8375_s4 + $0xe0] sm:$0xff] }
 0x2a0   : > { %v1410_v19 = vsel %vm588_vm4, %v1408_v5, %v1409_v6  ;;  %v1413_v2 = vsel %vm588_vm4, %v1409_v6, 0.0  ;;  %2013 = vmatpush.msrb.mxu1 %v1884_v38  ;;  %2036 = vmatpush.msrb.mxu2 %v1900_v12  ;;  %v1875_v53 = vld [vmem:[%s8375_s4 + $0x30] sm:$0xff]  ;;  %v1912_v5 = vld [vmem:[%s8375_s4 + $0x158] sm:$0xff] }
 0x2a1   : > { %1755 = vmatpush.msra.mxu0 %v1568_v26  ;;  %2059 = vmatpush.msrb.mxu3 %v1916_v11  ;;  %v1928_v6 = vld [vmem:[%s8375_s4 + $0x1d8] sm:$0xff]  ;;  %v1907_v12 = vld [vmem:[%s8375_s4 + $0x130] sm:$0xff] }
 0x2a2   : > { %2014 = vmatpush.msrb.mxu1 %v1883_v40  ;;  %2037 = vmatpush.msrb.mxu2 %v1899_v15  ;;  %v1909_v40 = vld [vmem:[%s8375_s4 + $0x140] sm:$0xff]  ;;  %v1923_v11 = vld [vmem:[%s8375_s4 + $0x1b0] sm:$0xff]  ;;  %v1906_v15 = vld [vmem:[%s8375_s4 + $0x128] sm:$0xff] }
 0x2a3   : > { %1756 = vmatpush.msra.mxu0 %v1567_v55  ;;  %2060 = vmatpush.msrb.mxu3 %v1915_v44  ;;  %v1946_v44 = vld [vmem:[%s8375_s4 + $0x268] sm:$0xff] }
 0x2a4   : > { %2015 = vmatpush.msrb.mxu1 %v1882_v59  ;;  %2038 = vmatpush.msrb.mxu2 %v1898_v18  ;;  %v1925_v59 = vld [vmem:[%s8375_s4 + $0x1c0] sm:$0xff] }
 0x2a5   : > { %1612 = vmatmul.f32.gmra.mxu1 %v1388_v17  ;;  %1757 = vmatpush.msra.mxu0 %v1566_v61  ;;  %v1874_v61 = vld [vmem:[%s8375_s4 + $0x28] sm:$0xff] }
 0x2a6   : > { %3925 = vmatmul.msk.f32.gmra.mxu0 %vm4812_vm7, %v1380_v1  ;;  %3929 = vmatmul.msk.f32.gmra.mxu2 %vm4978_vm9, %v1394_v3 }
 0x2a7   : > { %3931 = vmatmul.msk.f32.gmra.mxu3 %vm4812_vm7, %v1402_v28  ;;  %1758 = vmatpush.msra.mxu0 %v1565_v29  ;;  %v1913_v29 = vld [vmem:[%s8375_s4 + $0x160] sm:$0xff] }
 0x2a8   : > { %2016 = vmatpush.msrb.mxu1 %v1881_v41  ;;  %2039 = vmatpush.msrb.mxu2 %v1897_v0  ;;  %v1873_v28 = vld [vmem:[%s8375_s4 + $0x20] sm:$0xff]  ;;  %v1904_v0 = vld [vmem:[%s8375_s4 + $0x118] sm:$0xff] }
 0x2a9   : > { %1759 = vmatpush.msra.mxu0 %v1564_v4  ;;  %v1896_v4 = vld [vmem:[%s8375_s4 + $0xd8] sm:$0xff] }
 0x2aa   : > { %2017 = vmatpush.msrb.mxu1 %v1880_v45  ;;  %2040 = vmatpush.msrb.mxu2 %v1896_v4 }
 0x2ab   : > { %1760 = vmatpush.msra.mxu0 %v1563_v43 }
 0x2ac   : > { %2018 = vmatpush.msrb.mxu1 %v1879_v46  ;;  %v1908_v46 = vld [vmem:[%s8375_s4 + $0x138] sm:$0xff] }
 0x2ad   : > { %3932 = vmatmul.msk.f32.vlgmr.msra.gmra.mxu1 %vm4911_vm8, %v1410_v19  ;;  %1761 = vmatpush.msra.mxu0 %v1562_v23  ;;  %v1872_v23 = vld [vmem:[%s8375_s4 + $0x18] sm:$0xff]  ;;  %v1895_v19 = vld [vmem:[%s8375_s4 + $0xd0] sm:$0xff] }
 0x2ae   : > { %1678 = vmatmul.f32.vlgmr.msrb.gmra.mxu0 %v1374_v20  ;;  %3934 = vmatmul.msk.f32.vlgmr.msra.gmra.mxu2 %vm4731_vm14, %v1380_v1  ;;  %v1932_v20 = vld [vmem:[%s8375_s4 + $0x1f8] sm:$0xff]  ;;  %v1929_v1 = vld [vmem:[%s8375_s4 + $0x1e0] sm:$0xff] }
 0x2af   : > { %1747 = vmatmul.f32.vlgmr.msra.gmra.mxu3 %v1388_v17  ;;  %1762 = vmatpush.msra.mxu0 %v1561_v21 }
 0x2b0   : > { %2019 = vmatpush.msrb.mxu1 %v1878_v48  ;;  %2041 = vmatpush.msrb.mxu2 %v1895_v19  ;;  %v1948_v48 = vld [vmem:[%s8375_s4 + $0x278] sm:$0xff] }
 0x2b1   : > { %1763 = vmatpush.msra.mxu0 %v1560_v13 }
 0x2b2   : > { %2020 = vmatpush.msrb.mxu1 %v1877_v54 }
 0x2b3   : > { %1764 = vmatpush.msra.mxu0 %v1559_v25  ;;  %v1911_v25 = vld [vmem:[%s8375_s4 + $0x150] sm:$0xff] }
 0x2b4   : > { %2021 = vmatpush.msrb.mxu1 %v1876_v36 }
 0x2b5   : > { %3933 = vmatmul.msk.f32.gmra.mxu1 %vm4978_vm9, %v1413_v2  ;;  %1765 = vmatpush.msra.mxu0 %v1558_v63  ;;  %v1927_v63 = vld [vmem:[%s8375_s4 + $0x1d0] sm:$0xff] }
 0x2b6   : > { %1681 = vmatmul.f32.gmra.mxu0 %v5854_v32  ;;  %3935 = vmatmul.msk.f32.gmra.mxu2 %vm4812_vm7, %v1417_v16  ;;  %v1931_v32 = vld [vmem:[%s8375_s4 + $0x1f0] sm:$0xff]  ;;  %v1894_v16 = vld [vmem:[%s8375_s4 + $0xc8] sm:$0xff] }
 0x2b7   : > { %3936 = vmatmul.msk.f32.gmra.mxu3 %vm539_vm5, %v1387_v56  ;;  %1766 = vmatpush.msra.mxu0 %v1557_v30  ;;  %v1914_v56 = vld [vmem:[%s8375_s4 + $0x168] sm:$0xff]  ;;  %v1871_v30 = vld [vmem:[%s8375_s4 + $0x10] sm:$0xff] }
 0x2b8   : > { %2022 = vmatpush.msrb.mxu1 %v1875_v53  ;;  %2061 = vmatpush.msrb.mxu3 %v1914_v56  ;;  %v1889_v53 = vld [vmem:[%s8375_s4 + $0xa0] sm:$0xff] }
 0x2b9   : > { %1767 = vmatpush.msra.mxu0 %v1556_v62  ;;  %2042 = vmatpush.msrb.mxu2 %v1894_v16  ;;  %v1945_v56 = vld [vmem:[%s8375_s4 + $0x260] sm:$0xff] }
 0x2ba   : > { %2023 = vmatpush.msrb.mxu1 %v1874_v61  ;;  %2062 = vmatpush.msrb.mxu3 %v1913_v29  ;;  %v1944_v29 = vld [vmem:[%s8375_s4 + $0x258] sm:$0xff] }
 0x2bb   : > { %1768 = vmatpush.msra.mxu0 %v1555_v31  ;;  %v1910_v31 = vld [vmem:[%s8375_s4 + $0x148] sm:$0xff] }
 0x2bc   : > { %2024 = vmatpush.msrb.mxu1 %v1873_v28  ;;  %2063 = vmatpush.msrb.mxu3 %v1912_v5  ;;  %v1919_v5 = vld [vmem:[%s8375_s4 + $0x190] sm:$0xff] }
 0x2bd   : > { %1769 = vmatpush.msra.mxu0 %v1554_v33  ;;  %v1926_v33 = vld [vmem:[%s8375_s4 + $0x1c8] sm:$0xff] }
 0x2be   : > { %3937 = vmatmul.msk.f32.vlgmr.msra.gmra.mxu0 %vm4911_vm8, %v1394_v3  ;;  %2025 = vmatpush.msrb.mxu1 %v1872_v23  ;;  %v1886_v23 = vld [vmem:[%s8375_s4 + $0x88] sm:$0xff] }
 0x2bf   : > { %2082 = vmatpush.msrb.mxu0 %v1932_v20  ;;  %2064 = vmatpush.msrb.mxu3 %v1911_v25  ;;  %v1947_v20 = vld [vmem:[%s8375_s4 + $0x270] sm:$0xff]  ;;  %v1918_v25 = vld [vmem:[%s8375_s4 + $0x188] sm:$0xff] }
 0x2c0   : > { %2026 = vmatpush.msrb.mxu1 %v1871_v30 }
 0x2c1   : > { %2083 = vmatpush.msrb.mxu0 %v1931_v32  ;;  %2065 = vmatpush.msrb.mxu3 %v1910_v31  ;;  %v1917_v31 = vld [vmem:[%s8375_s4 + $0x180] sm:$0xff] }
 0x2c3   : > { %2084 = vmatpush.msrb.mxu0 %v1930_v58  ;;  %2066 = vmatpush.msrb.mxu3 %v1909_v40 }
 0x2c5   : > { %2085 = vmatpush.msrb.mxu0 %v1929_v1  ;;  %2067 = vmatpush.msrb.mxu3 %v1908_v46  ;;  %v1887_v1 = vld [vmem:[%s8375_s4 + $0x90] sm:$0xff]  ;;  %v1962_v46 = vld [vmem:[%s8375_s4 + $0x2e8] sm:$0xff] }
 0x2c6   : > { %3938 = vmatmul.msk.f32.gmra.mxu0 %vm4978_vm9, %v1423_v34  ;;  %v1870_v34 = vld [vmem:[%s8375_s4 + $0x8] sm:$0xff] }
 0x2c7   : > { %2086 = vmatpush.msrb.mxu0 %v1928_v6  ;;  %2027 = vmatpush.msrb.mxu1 %v1870_v34  ;;  %v1943_v6 = vld [vmem:[%s8375_s4 + $0x250] sm:$0xff]  ;;  %v1964_v34 = vld [vmem:[%s8375_s4 + $0x2f8] sm:$0xff] }
 0x2c8   : > { %2068 = vmatpush.msrb.mxu3 %v1907_v12  ;;  %v1938_v12 = vld [vmem:[%s8375_s4 + $0x228] sm:$0xff] }
 0x2c9   : > { %2087 = vmatpush.msrb.mxu0 %v1927_v63  ;;  %v1942_v63 = vld [vmem:[%s8375_s4 + $0x248] sm:$0xff] }
 0x2ca   : > { %2069 = vmatpush.msrb.mxu3 %v1906_v15 }
 0x2cb   : > { %2088 = vmatpush.msrb.mxu0 %v1926_v33  ;;  %v1941_v33 = vld [vmem:[%s8375_s4 + $0x240] sm:$0xff] }
 0x2cd   : > { %2089 = vmatpush.msrb.mxu0 %v1925_v59  ;;  %v1940_v59 = vld [vmem:[%s8375_s4 + $0x238] sm:$0xff] }
 0x31a   : > { %v1610_v24 = vpop.f32.mrf.mxu1 }
 0x31b   : > { %v1587_v35 = vpop.f32.mrf.mxu0 }
 0x31c   : > { %v1611_v52 = vadd.f32 %v1610_v24, %v1587_v35  ;;  %v1893_v35 = vld [vmem:[%s8375_s4 + $0xc0] sm:$0xff] }
 0x31d   : > { %2043 = vmatpush.msrb.mxu2 %v1893_v35  ;;  %v1980_v35 = vld [vmem:[%s8375_s4 + $0x378] sm:$0xff] }
 0x321   : > { %v1633_v57 = vpop.f32.mrf.mxu2 }
 0x322   : > { %v1656_v27 = vpop.f32.mrf.mxu3  ;;  %v1613_v47 = vpop.f32.mrf.mxu1  ;;  %v1634_v9 = vadd.f32 %v1633_v57, %v1611_v52  ;;  %v1922_v52 = vld [vmem:[%s8375_s4 + $0x1a8] sm:$0xff] }
 0x323   : > { %v1590_v10 = vpop.f32.mrf.mxu0 }
 0x324   : > { %v1614_v26 = vadd.f32 %v1613_v47, %v1590_v10  ;;  %v1657_v43 = vadd.f32 %v1656_v27, %v1634_v9  ;;  %v1869_v27 = vld [vmem:[%s8375_s4] sm:$0xff]  ;;  %v1892_v10 = vld [vmem:[%s8375_s4 + $0xb8] sm:$0xff] }
 0x325   : > { %2028 = vmatpush.msrb.mxu1 %v1869_v27  ;;  %2044 = vmatpush.msrb.mxu2 %v1892_v10  ;;  %v1995_v27 = vld [vmem:[%s8375_s4 + $0x3f0] sm:$0xff] }
 0x327   : > { %2105 = vmatpush.msra.mxu1 %v1948_v48  ;;  %v1994_v48 = vld [vmem:[%s8375_s4 + $0x3e8] sm:$0xff] }
 0x329   : > { %v1636_v22 = vpop.f32.mrf.mxu2  ;;  %2106 = vmatpush.msra.mxu1 %v1947_v20  ;;  %v1977_v20 = vld [vmem:[%s8375_s4 + $0x360] sm:$0xff] }
 0x32a   : > { %v1659_v42 = vpop.f32.mrf.mxu3  ;;  %v1702_v55 = vpop.f32.mrf.mxu1  ;;  %v1637_v17 = vadd.f32 %v1636_v22, %v1614_v26  ;;  %v1924_v22 = vld [vmem:[%s8375_s4 + $0x1b8] sm:$0xff]  ;;  %v1905_v26 = vld [vmem:[%s8375_s4 + $0x120] sm:$0xff] }
 0x32b   : > { %v1679_v50 = vpop.f32.mrf.mxu0  ;;  %2090 = vmatpush.msrb.mxu0 %v1924_v22  ;;  %2107 = vmatpush.msra.mxu1 %v1946_v44  ;;  %v1978_v22 = vld [vmem:[%s8375_s4 + $0x368] sm:$0xff]  ;;  %v1960_v44 = vld [vmem:[%s8375_s4 + $0x2d8] sm:$0xff] }
 0x32c   : > { %v1660_v21 = vadd.f32 %v1659_v42, %v1637_v17  ;;  %v1680_v13 = vadd.f32 %v1679_v50, %v1657_v43  ;;  %v1891_v50 = vld [vmem:[%s8375_s4 + $0xb0] sm:$0xff]  ;;  %v1890_v42 = vld [vmem:[%s8375_s4 + $0xa8] sm:$0xff]  ;;  %2070 = vmatpush.msrb.mxu3 %v1905_v26  ;;  %v1920_v17 = vld [vmem:[%s8375_s4 + $0x198] sm:$0xff] }
 0x32d   : > { %2045 = vmatpush.msrb.mxu2 %v1891_v50  ;;  %2091 = vmatpush.msrb.mxu0 %v1923_v11  ;;  %v1903_v43 = vld [vmem:[%s8375_s4 + $0x110] sm:$0xff]  ;;  %v1961_v11 = vld [vmem:[%s8375_s4 + $0x2e0] sm:$0xff] }
 0x32e   : > { %v1703_v24 = vadd.f32 %v1702_v55, %v1680_v13  ;;  %v1921_v55 = vld [vmem:[%s8375_s4 + $0x1a0] sm:$0xff]  ;;  %2108 = vmatpush.msra.mxu1 %v1945_v56  ;;  %2071 = vmatpush.msrb.mxu3 %v1904_v0  ;;  %v1902_v13 = vld [vmem:[%s8375_s4 + $0x108] sm:$0xff]  ;;  %v1959_v56 = vld [vmem:[%s8375_s4 + $0x2d0] sm:$0xff] }
 0x32f   : > { %2046 = vmatpush.msrb.mxu2 %v1890_v42  ;;  %2092 = vmatpush.msrb.mxu0 %v1922_v52  ;;  %v1993_v42 = vld [vmem:[%s8375_s4 + $0x3e0] sm:$0xff]  ;;  %v1935_v0 = vld [vmem:[%s8375_s4 + $0x210] sm:$0xff] }
 0x330   : > { %2109 = vmatpush.msra.mxu1 %v1944_v29  ;;  %2072 = vmatpush.msrb.mxu3 %v1903_v43  ;;  %v1937_v52 = vld [vmem:[%s8375_s4 + $0x220] sm:$0xff] }
 0x331   : > { %v1725_v60 = vpop.f32.mrf.mxu2  ;;  %2047 = vmatpush.msrb.mxu2 %v1889_v53  ;;  %2093 = vmatpush.msrb.mxu0 %v1921_v55  ;;  %v1992_v53 = vld [vmem:[%s8375_s4 + $0x3d8] sm:$0xff] }
 0x332   : > { %v1748_v2 = vpop.f32.mrf.mxu3  ;;  %v1705_v38 = vpop.f32.mrf.mxu1  ;;  %v1726_v45 = vadd.f32 %v1725_v60, %v1703_v24  ;;  %v1888_v60 = vld [vmem:[%s8375_s4 + $0x98] sm:$0xff]  ;;  %2110 = vmatpush.msra.mxu1 %v1943_v6  ;;  %2073 = vmatpush.msrb.mxu3 %v1902_v13  ;;  %v1973_v6 = vld [vmem:[%s8375_s4 + $0x340] sm:$0xff] }
 0x333   : > { %v1682_v3 = vpop.f32.mrf.mxu0  ;;  %2048 = vmatpush.msrb.mxu2 %v1888_v60  ;;  %2094 = vmatpush.msrb.mxu0 %v1920_v17  ;;  %v1996_v24 = vld [vmem:[%s8375_s4 + $0x3f8] sm:$0xff]  ;;  %v1991_v60 = vld [vmem:[%s8375_s4 + $0x3d0] sm:$0xff] }
 0x334   : > { %v1683_v62 = vadd.f32 %v1682_v3, %v1660_v21  ;;  %v1749_v36 = vadd.f32 %v1748_v2, %v1726_v45  ;;  %v1885_v2 = vld [vmem:[%s8375_s4 + $0x80] sm:$0xff]  ;;  %2111 = vmatpush.msra.mxu1 %v1942_v63  ;;  %v1936_v55 = vld [vmem:[%s8375_s4 + $0x218] sm:$0xff] }
 0x335   : > { %2049 = vmatpush.msrb.mxu2 %v1887_v1  ;;  %2095 = vmatpush.msrb.mxu0 %v1919_v5  ;;  %v1958_v1 = vld [vmem:[%s8375_s4 + $0x2c8] sm:$0xff]  ;;  %v1957_v5 = vld [vmem:[%s8375_s4 + $0x2c0] sm:$0xff]  ;;  %v1956_v13 = vld [vmem:[%s8375_s4 + $0x2b8] sm:$0xff] }
 0x336   : > { %v1706_v47 = vadd.f32 %v1705_v38, %v1683_v62  ;;  %v1901_v62 = vld [vmem:[%s8375_s4 + $0x100] sm:$0xff]  ;;  %2112 = vmatpush.msra.mxu1 %v1941_v33  ;;  %v1988_v63 = vld [vmem:[%s8375_s4 + $0x3b8] sm:$0xff]  ;;  %v1970_v33 = vld [vmem:[%s8375_s4 + $0x328] sm:$0xff] }
 0x337   : > { %2050 = vmatpush.msrb.mxu2 %v1886_v23  ;;  %2096 = vmatpush.msrb.mxu0 %v1918_v25  ;;  %v1989_v23 = vld [vmem:[%s8375_s4 + $0x3c0] sm:$0xff]  ;;  %v1972_v25 = vld [vmem:[%s8375_s4 + $0x338] sm:$0xff] }
 0x338   : > { %2074 = vmatpush.msrb.mxu3 %v1901_v62  ;;  %2113 = vmatpush.msra.mxu1 %v1940_v59  ;;  %v1987_v62 = vld [vmem:[%s8375_s4 + $0x3b0] sm:$0xff]  ;;  %v1968_v59 = vld [vmem:[%s8375_s4 + $0x318] sm:$0xff] }
 0x339   : > { %v1728_v57 = vpop.f32.mrf.mxu2  ;;  %2051 = vmatpush.msrb.mxu2 %v1885_v2  ;;  %2097 = vmatpush.msrb.mxu0 %v1917_v31  ;;  %v1954_v31 = vld [vmem:[%s8375_s4 + $0x2a8] sm:$0xff] }
 0x33a   : > { %v1729_v54 = vadd.f32 %v1728_v57, %v1706_v47  ;;  %v1751_v32 = vpop.f32.mrf.mxu3  ;;  %v1963_v57 = vld [vmem:[%s8375_s4 + $0x2f0] sm:$0xff]  ;;  %2151 = vmatpush.msra.mxu3 %v1980_v35  ;;  %v1953_v35 = vld [vmem:[%s8375_s4 + $0x2a0] sm:$0xff] }
 0x33b   : > { %v1771_v41 = vpop.f32.mrf.mxu0  ;;  %2128 = vmatpush.msra.mxu2 %v1964_v34  ;;  %2174 = vmatpush.msra.mxu0 %v1996_v24  ;;  %v1939_v47 = vld [vmem:[%s8375_s4 + $0x230] sm:$0xff]  ;;  %v1986_v34 = vld [vmem:[%s8375_s4 + $0x3a8] sm:$0xff]  ;;  %v1969_v24 = vld [vmem:[%s8375_s4 + $0x320] sm:$0xff] }
 0x33c   : > { %v1752_v18 = vadd.f32 %v1751_v32, %v1729_v54  ;;  %v6104_v9 = vadd.f32 %v1771_v41, %v1749_v36  ;;  %v1979_v41 = vld [vmem:[%s8375_s4 + $0x370] sm:$0xff]  ;;  %2114 = vmatpush.msra.mxu1 %v1939_v47  ;;  %v1976_v32 = vld [vmem:[%s8375_s4 + $0x358] sm:$0xff] }
 0x33d   : > { %2129 = vmatpush.msra.mxu2 %v1963_v57  ;;  %2152 = vmatpush.msra.mxu3 %v1979_v41  ;;  %v1984_v57 = vld [vmem:[%s8375_s4 + $0x398] sm:$0xff]  ;;  %v1983_v47 = vld [vmem:[%s8375_s4 + $0x390] sm:$0xff] }
 0x33e   : > { %v1785_v3 = vmul.f32 %v6104_v9, %v6104_v9  ;;  %2175 = vmatpush.msra.mxu0 %v1995_v27  ;;  %2115 = vmatpush.msra.mxu1 %v1938_v12  ;;  %v1951_v27 = vld [vmem:[%s8375_s4 + $0x290] sm:$0xff]  ;;  %v1965_v12 = vld [vmem:[%s8375_s4 + $0x300] sm:$0xff] }
 0x33f   : > { %2130 = vmatpush.msra.mxu2 %v1962_v46  ;;  %2153 = vmatpush.msra.mxu3 %v1978_v22  ;;  %v1950_v46 = vld [vmem:[%s8375_s4 + $0x288] sm:$0xff] }
 0x340   : > { %2176 = vmatpush.msra.mxu0 %v1994_v48  ;;  %2116 = vmatpush.msra.mxu1 %v1937_v52  ;;  %v1966_v22 = vld [vmem:[%s8375_s4 + $0x308] sm:$0xff] }
 0x341   : > { %2131 = vmatpush.msra.mxu2 %v1961_v11  ;;  %2154 = vmatpush.msra.mxu3 %v1977_v20  ;;  %v1981_v20 = vld [vmem:[%s8375_s4 + $0x380] sm:$0xff] }
 0x342   : > { %2177 = vmatpush.msra.mxu0 %v1993_v42  ;;  %2117 = vmatpush.msra.mxu1 %v1936_v55 }
 0x343   : > { %v1774_v58 = vpop.f32.mrf.mxu0  ;;  %2132 = vmatpush.msra.mxu2 %v1960_v44  ;;  %2155 = vmatpush.msra.mxu3 %v1976_v32 }
 0x344   : > { %v6118_v61 = vadd.f32 %v1774_v58, %v1752_v18  ;;  %v1975_v58 = vld [vmem:[%s8375_s4 + $0x350] sm:$0xff]  ;;  %2178 = vmatpush.msra.mxu0 %v1992_v53  ;;  %2118 = vmatpush.msra.mxu1 %v1935_v0 }
 0x345   : > { %2133 = vmatpush.msra.mxu2 %v1959_v56  ;;  %2156 = vmatpush.msra.mxu3 %v1975_v58 }
 0x346   : > { %v1777_v28 = vadd.f32 %v6118_v61, %v6104_v9  ;;  %v1786_v4 = vmul.f32 %v6118_v61, %v6118_v61  ;;  %2179 = vmatpush.msra.mxu0 %v1991_v60 }
 0x347   : > { %2134 = vmatpush.msra.mxu2 %v1958_v1 }
 0x348   : > { %v1778_v19 = vrot.slane %v1777_v28, 4  ;;  %v1787_v21 = vadd.f32 %v1786_v4, %v1785_v3  ;;  %v1974_v3 = vld [vmem:[%s8375_s4 + $0x348] sm:$0xff] }
 0x349   : > { %v1934_v4 = vld [vmem:[%s8375_s4 + $0x208] sm:$0xff]  ;;  %2157 = vmatpush.msra.mxu3 %v1974_v3  ;;  %2135 = vmatpush.msra.mxu2 %v1957_v5  ;;  %v2011_v3 = vld [vmem:[%s8375_s4 + $0x470] sm:$0xff] }
 0x34a   : > { %v1779_v30 = vadd.f32 %v1778_v19, %v1777_v28  ;;  %v1788_v16 = vrot.slane %v1787_v21, 4  ;;  %v1990_v28 = vld [vmem:[%s8375_s4 + $0x3c8] sm:$0xff]  ;;  %v1933_v19 = vld [vmem:[%s8375_s4 + $0x200] sm:$0xff]  ;;  %2119 = vmatpush.msra.mxu1 %v1934_v4 }
 0x34b   : > { %2180 = vmatpush.msra.mxu0 %v1990_v28  ;;  %2158 = vmatpush.msra.mxu3 %v1973_v6  ;;  %v2010_v28 = vld [vmem:[%s8375_s4 + $0x468] sm:$0xff]  ;;  %v2009_v6 = vld [vmem:[%s8375_s4 + $0x460] sm:$0xff] }
 0x34c   : > { %v1780_v38 = vrot.slane %v1779_v30, 2  ;;  %v1789_v40 = vadd.f32 %v1788_v16, %v1787_v21  ;;  %2120 = vmatpush.msra.mxu1 %v1933_v19  ;;  %v1971_v16 = vld [vmem:[%s8375_s4 + $0x330] sm:$0xff]  ;;  %2136 = vmatpush.msra.mxu2 %v1956_v13 }
 0x34d   : > { %2181 = vmatpush.msra.mxu0 %v1989_v23  ;;  %2159 = vmatpush.msra.mxu3 %v1972_v25 }
 0x34e   : > { %v1781_v10 = vadd.f32 %v1780_v38, %v1779_v30  ;;  %v1790_v45 = vrot.slane %v1789_v40, 2  ;;  %v1955_v30 = vld [vmem:[%s8375_s4 + $0x2b0] sm:$0xff]  ;;  %v1985_v38 = vld [vmem:[%s8375_s4 + $0x3a0] sm:$0xff] }
 0x34f   : > { %2182 = vmatpush.msra.mxu0 %v1988_v63  ;;  %2137 = vmatpush.msra.mxu2 %v1955_v30  ;;  %v2006_v30 = vld [vmem:[%s8375_s4 + $0x448] sm:$0xff] }
 0x350   : > { %v1782_v50 = vrot.slane %v1781_v10, 1  ;;  %v1791_v54 = vadd.f32 %v1790_v45, %v1789_v40  ;;  %2160 = vmatpush.msra.mxu3 %v1971_v16  ;;  %v1952_v40 = vld [vmem:[%s8375_s4 + $0x298] sm:$0xff] }
 0x351   : > { %2183 = vmatpush.msra.mxu0 %v1987_v62  ;;  %2138 = vmatpush.msra.mxu2 %v1954_v31  ;;  %v2005_v31 = vld [vmem:[%s8375_s4 + $0x440] sm:$0xff] }
 0x352   : > { %v1783_v36 = vadd.f32 %v1782_v50, %v1781_v10  ;;  %v1792_v15 = vrot.slane %v1791_v54, 1  ;;  %2161 = vmatpush.msra.mxu3 %v1970_v33  ;;  %v1967_v10 = vld [vmem:[%s8375_s4 + $0x310] sm:$0xff]  ;;  %v1982_v50 = vld [vmem:[%s8375_s4 + $0x388] sm:$0xff] }
 0x353   : > { %2184 = vmatpush.msra.mxu0 %v1986_v34  ;;  %2139 = vmatpush.msra.mxu2 %v1953_v35  ;;  %v2004_v34 = vld [vmem:[%s8375_s4 + $0x438] sm:$0xff]  ;;  %v2003_v35 = vld [vmem:[%s8375_s4 + $0x430] sm:$0xff] }
 0x354   : > { %v6229_v18 = vmul.f32 %v1783_v36, %v5728_v49  ;;  %v1793_v26 = vadd.f32 %v1792_v15, %v1791_v54  ;;  %2162 = vmatpush.msra.mxu3 %v1969_v24  ;;  %v1949_v54 = vld [vmem:[%s8375_s4 + $0x280] sm:$0xff]  ;;  %v2002_v24 = vld [vmem:[%s8375_s4 + $0x428] sm:$0xff] }
 0x355   : > { %2185 = vmatpush.msra.mxu0 %v1985_v38  ;;  %2140 = vmatpush.msra.mxu2 %v1952_v40  ;;  %v2001_v38 = vld [vmem:[%s8375_s4 + $0x420] sm:$0xff] }
 0x356   : > { %v1794_v17 = vmul.f32 %v1793_v26, %v5728_v49  ;;  %v1795_v29 = vmul.f32 %v6229_v18, %v6229_v18  ;;  %2163 = vmatpush.msra.mxu3 %v1968_v59  ;;  %v1798_v15 = vsub.f32 %v6104_v9, %v6229_v18  ;;  %v1799_v52 = vsub.f32 %v6118_v61, %v6229_v18  ;;  %v2012_v9 = vld [vmem:[%s8375_s4 + $0x478] sm:$0xff] }
 0x357   : > { %2186 = vmatpush.msra.mxu0 %v1984_v57  ;;  %2141 = vmatpush.msra.mxu2 %v1951_v27  ;;  %v2000_v59 = vld [vmem:[%s8375_s4 + $0x418] sm:$0xff]  ;;  %v1998_v27 = vld [vmem:[%s8375_s4 + $0x408] sm:$0xff] }
 0x358   : > { %v1796_v43 = vsub.f32 %v1794_v17, %v1795_v29  ;;  %2164 = vmatpush.msra.mxu3 %v1967_v10  ;;  %v1997_v10 = vld [vmem:[%s8375_s4 + $0x400] sm:$0xff] }
 0x359   : > { %2187 = vmatpush.msra.mxu0 %v1983_v47  ;;  %2142 = vmatpush.msra.mxu2 %v1950_v46  ;;  %v2374_v46 = vld [vmem:[%s8376_s5 + $0x1f0] sm:$0xff] }
 0x35a   : > { %v1797_v21 = vmax.f32 %v1796_v43, 0.0  ;;  %2165 = vmatpush.msra.mxu3 %v1966_v22  ;;  %v2342_v22 = vld [vmem:[%s8376_s5 + $0xf0] sm:$0xff] }
 0x35b   : > { %2188 = vmatpush.msra.mxu0 %v1982_v50  ;;  %2143 = vmatpush.msra.mxu2 %v1949_v54  ;;  %v2438_v50 = vld [vmem:[%s8376_s5 + $0x3f0] sm:$0xff]  ;;  %v2372_v54 = vld [vmem:[%s8376_s5 + $0x1e0] sm:$0xff] }
 0x35c   : > { %v1800_v2 = vadd.f32 1e-05, %v1797_v21  ;;  %2166 = vmatpush.msra.mxu3 %v1965_v12  ;;  %v2008_v21 = vld [vmem:[%s8375_s4 + $0x458] sm:$0xff]  ;;  %v2340_v12 = vld [vmem:[%s8376_s5 + $0xe0] sm:$0xff] }
 0x35d   : > { %2189 = vmatpush.msra.mxu0 %v1981_v20  ;;  %v2436_v20 = vld [vmem:[%s8376_s5 + $0x3e0] sm:$0xff] }
 0x35e   : > { %4148 = vrsqrt.f32 %v1800_v2  ;;  %vm1807_vm11 = vweird.f32 %v1800_v2 }
 0x364   : > { %v4149_v41 = vpop.eup %4148 }
 0x365   : > { %v1802_v45 = vmul.f32 %v4149_v41, %v1800_v2  ;;  %vm1808_vm0 = vweird.f32 %v4149_v41  ;;  %v2007_v2 = vld [vmem:[%s8375_s4 + $0x450] sm:$0xff] }
 0x366   : > { %vm1809_vm12 = vmor %vm1807_vm11, %vm1808_vm0 }
 0x367   : > { %v1803_v48 = vmul.f32 %v4149_v41, %v1802_v45 }
 0x369   : > { %v1804_v11 = vmul.f32 0.5, %v1803_v48  ;;  %v2406_v48 = vld [vmem:[%s8376_s5 + $0x2f0] sm:$0xff] }
 0x36b   : > { %v1805_v42 = vsub.f32 1.5, %v1804_v11  ;;  %v2404_v11 = vld [vmem:[%s8376_s5 + $0x2e0] sm:$0xff] }
 0x36d   : > { %v1806_v36 = vmul.f32 %v4149_v41, %v1805_v42  ;;  %v2370_v42 = vld [vmem:[%s8376_s5 + $0x1d0] sm:$0xff] }
 0x36f   : > { %v1810_v44 = vsel %vm1809_vm12, %v4149_v41, %v1806_v36  ;;  %v1999_v41 = vld [vmem:[%s8375_s4 + $0x410] sm:$0xff] }
 0x370   : > { %v1811_v32 = vmul.f32 %v1810_v44, %v1798_v15  ;;  %v1812_v53 = vmul.f32 %v1810_v44, %v1799_v52  ;;  %v2338_v36 = vld [vmem:[%s8376_s5 + $0xd0] sm:$0xff] }
 0x371   : > { %v2402_v15 = vld [vmem:[%s8376_s5 + $0x2d0] sm:$0xff] }
 0x372   : > { %vm1813_vm3 = vcmp.ge.f32.partialorder %v1811_v32, 0.0  ;;  %v1815_v26 = vmul.f32 0.05, %v1811_v32  ;;  %v1816_v55 = vmul.f32 0.05, %v1812_v53  ;;  %vm1814_vm10 = vcmp.ge.f32.partialorder %v1812_v53, 0.0 }
 0x373   : > { %v2434_v44 = vld [vmem:[%s8376_s5 + $0x3d0] sm:$0xff] }
 0x374   : > { %v1817_v56 = vsel %vm1813_vm3, %v1811_v32, %v1815_v26  ;;  %v6352_v29 = vsel %vm1814_vm10, %v1812_v53, %v1816_v55  ;;  %v2368_v32 = vld [vmem:[%s8376_s5 + $0x1c0] sm:$0xff] }
 0x375   : > { %v1829_v58 = vrot.slane %v1817_v56, 4  ;;  %v1821_v60 = vrot.slane %v1817_v56, 3  ;;  %v1835_v0 = vrot.slane %v1817_v56, 5  ;;  %v1843_v17 = vrot.slane %v1817_v56, 7  ;;  %v2336_v53 = vld [vmem:[%s8376_s5 + $0xc0] sm:$0xff] }
 0x376   : > { %v1830_v4 = vrot.slane %v6352_v29, 4  ;;  %v1822_v43 = vrot.slane %v6352_v29, 3  ;;  %v1836_v5 = vrot.slane %v6352_v29, 5  ;;  %v1844_v23 = vrot.slane %v6352_v29, 7  ;;  %v2400_v55 = vld [vmem:[%s8376_s5 + $0x2c0] sm:$0xff] }
 0x377   : > { %3942 = vmatmul.msk.f32.vlgmr.msrb.gmra.mxu2 %vm4806_vm6, %v1829_v58  ;;  %v1826_v61 = vsel %vm520_vm13, 0.0, %v1821_v60  ;;  %v1840_v18 = vsel %vm552_vm2, 0.0, %v1835_v0  ;;  %v1848_v1 = vsel %vm571_vm15, 0.0, %v1843_v17  ;;  %v1851_v16 = vrot.slane %v1817_v56, 1 }
 0x378   : > { %3939 = vmatmul.msk.f32.vlgmr.msrb.gmra.mxu1 %vm4731_vm14, %v1826_v61  ;;  %3943 = vmatmul.msk.f32.vlgmr.msrb.gmra.mxu3 %vm4911_vm8, %v1840_v18  ;;  %v1831_v19 = vsel %vm539_vm5, %v1829_v58, %v1830_v4  ;;  %v1823_v13 = vsel %vm520_vm13, %v1821_v60, %v1822_v43  ;;  %v1837_v25 = vsel %vm552_vm2, %v1835_v0, %v1836_v5  ;;  %v1852_v62 = vrot.slane %v6352_v29, 1  ;;  %v2366_v58 = vld [vmem:[%s8376_s5 + $0x1b0] sm:$0xff]  ;;  %v2364_v61 = vld [vmem:[%s8376_s5 + $0x1a0] sm:$0xff] }
 0x379   : > { %3945 = vmatmul.msk.f32.vlgmr.msrb.gmra.mxu0 %vm4731_vm14, %v1848_v1  ;;  %2197 = vmatpush.msrb.mxu1 %v2012_v9  ;;  %v1845_v63 = vsel %vm571_vm15, %v1843_v17, %v1844_v23  ;;  %v1860_v57 = vsel %vm520_vm13, %v1822_v43, 0.0  ;;  %v1866_v45 = vsel %vm552_vm2, %v1836_v5, 0.0  ;;  %v2334_v60 = vld [vmem:[%s8376_s5 + $0xb0] sm:$0xff]  ;;  %v2332_v18 = vld [vmem:[%s8376_s5 + $0xa0] sm:$0xff] }
 0x37a   : > { %v1853_v33 = vsel %vm588_vm4, %v1851_v16, %v1852_v62  ;;  %v1856_v40 = vsel %vm588_vm4, %v1852_v62, 0.0  ;;  %2623 = vmatpush.msrb.mxu3 %v2374_v46  ;;  %2600 = vmatpush.msrb.mxu2 %v2342_v22  ;;  %v2398_v0 = vld [vmem:[%s8376_s5 + $0x2b0] sm:$0xff]  ;;  %v2396_v1 = vld [vmem:[%s8376_s5 + $0x2a0] sm:$0xff] }
 0x37b   : > { %2198 = vmatpush.msrb.mxu1 %v2011_v3  ;;  %2646 = vmatpush.msrb.mxu0 %v2406_v48  ;;  %v2428_v3 = vld [vmem:[%s8376_s5 + $0x3a0] sm:$0xff]  ;;  %v2330_v43 = vld [vmem:[%s8376_s5 + $0x90] sm:$0xff] }
 0x37c   : > { %2624 = vmatpush.msrb.mxu3 %v2372_v54  ;;  %2601 = vmatpush.msrb.mxu2 %v2340_v12  ;;  %v2394_v5 = vld [vmem:[%s8376_s5 + $0x290] sm:$0xff]  ;;  %v2352_v46 = vld [vmem:[%s8376_s5 + $0x140] sm:$0xff] }
 0x37d   : > { %2199 = vmatpush.msrb.mxu1 %v2010_v28  ;;  %2647 = vmatpush.msrb.mxu0 %v2404_v11  ;;  %v2362_v28 = vld [vmem:[%s8376_s5 + $0x190] sm:$0xff]  ;;  %v2320_v48 = vld [vmem:[%s8376_s5 + $0x40] sm:$0xff] }
 0x37e   : > { %2625 = vmatpush.msrb.mxu3 %v2370_v42  ;;  %2602 = vmatpush.msrb.mxu2 %v2338_v36  ;;  %v2326_v16 = vld [vmem:[%s8376_s5 + $0x70] sm:$0xff]  ;;  %v2416_v54 = vld [vmem:[%s8376_s5 + $0x340] sm:$0xff] }
 0x37f   : > { %2055 = vmatmul.f32.gmra.mxu2 %v1831_v19  ;;  %2200 = vmatpush.msrb.mxu1 %v2009_v6  ;;  %v2426_v6 = vld [vmem:[%s8376_s5 + $0x390] sm:$0xff] }
 0x380   : > { %3940 = vmatmul.msk.f32.gmra.mxu1 %vm4812_vm7, %v1823_v13  ;;  %3944 = vmatmul.msk.f32.gmra.mxu3 %vm4978_vm9, %v1837_v25  ;;  %v2390_v62 = vld [vmem:[%s8376_s5 + $0x270] sm:$0xff] }
 0x381   : > { %3946 = vmatmul.msk.f32.gmra.mxu0 %vm4812_vm7, %v1845_v63  ;;  %2201 = vmatpush.msrb.mxu1 %v2008_v21  ;;  %v2328_v21 = vld [vmem:[%s8376_s5 + $0x80] sm:$0xff]  ;;  %v2350_v11 = vld [vmem:[%s8376_s5 + $0x130] sm:$0xff] }
 0x382   : > { %2648 = vmatpush.msrb.mxu0 %v2402_v15  ;;  %2626 = vmatpush.msrb.mxu3 %v2368_v32  ;;  %v2318_v42 = vld [vmem:[%s8376_s5 + $0x30] sm:$0xff] }
 0x383   : > { %2202 = vmatpush.msrb.mxu1 %v2007_v2  ;;  %2603 = vmatpush.msrb.mxu2 %v2336_v53  ;;  %v2358_v2 = vld [vmem:[%s8376_s5 + $0x170] sm:$0xff]  ;;  %v2316_v53 = vld [vmem:[%s8376_s5 + $0x20] sm:$0xff] }
 0x384   : > { %2649 = vmatpush.msrb.mxu0 %v2400_v55  ;;  %2627 = vmatpush.msrb.mxu3 %v2366_v58  ;;  %v2382_v36 = vld [vmem:[%s8376_s5 + $0x230] sm:$0xff]  ;;  %v2412_v55 = vld [vmem:[%s8376_s5 + $0x320] sm:$0xff] }
 0x385   : > { %2203 = vmatpush.msrb.mxu1 %v2006_v30  ;;  %2604 = vmatpush.msrb.mxu2 %v2334_v60  ;;  %v2414_v15 = vld [vmem:[%s8376_s5 + $0x330] sm:$0xff] }
 0x386   : > { %2650 = vmatpush.msrb.mxu0 %v2398_v0  ;;  %2628 = vmatpush.msrb.mxu3 %v2364_v61  ;;  %v2346_v58 = vld [vmem:[%s8376_s5 + $0x110] sm:$0xff] }
 0x387   : > { %3947 = vmatmul.msk.f32.vlgmr.msra.gmra.mxu2 %vm4911_vm8, %v1853_v33  ;;  %2204 = vmatpush.msrb.mxu1 %v2005_v31  ;;  %v2422_v31 = vld [vmem:[%s8376_s5 + $0x370] sm:$0xff] }
 0x388   : > { %2121 = vmatmul.f32.vlgmr.msra.gmra.mxu1 %v1817_v56  ;;  %3949 = vmatmul.msk.f32.vlgmr.msra.gmra.mxu3 %vm4731_vm14, %v1823_v13  ;;  %v2432_v56 = vld [vmem:[%s8376_s5 + $0x3c0] sm:$0xff]  ;;  %v2410_v61 = vld [vmem:[%s8376_s5 + $0x310] sm:$0xff] }
 0x389   : > { %2190 = vmatmul.f32.vlgmr.msra.gmra.mxu0 %v1831_v19  ;;  %2205 = vmatpush.msrb.mxu1 %v2004_v34  ;;  %v2360_v19 = vld [vmem:[%s8376_s5 + $0x180] sm:$0xff] }
 0x38a   : > { %2605 = vmatpush.msrb.mxu2 %v2332_v18  ;;  %2651 = vmatpush.msrb.mxu0 %v2396_v1  ;;  %v2392_v13 = vld [vmem:[%s8376_s5 + $0x280] sm:$0xff] }
 0x38b   : > { %2206 = vmatpush.msrb.mxu1 %v2003_v35  ;;  %2629 = vmatpush.msrb.mxu3 %v2362_v28  ;;  %v2356_v34 = vld [vmem:[%s8376_s5 + $0x160] sm:$0xff] }
 0x38c   : > { %2606 = vmatpush.msrb.mxu2 %v2330_v43  ;;  %2652 = vmatpush.msrb.mxu0 %v2394_v5  ;;  %v2344_v18 = vld [vmem:[%s8376_s5 + $0x100] sm:$0xff] }
 0x38d   : > { %2207 = vmatpush.msrb.mxu1 %v2002_v24  ;;  %2630 = vmatpush.msrb.mxu3 %v2360_v19  ;;  %v2324_v24 = vld [vmem:[%s8376_s5 + $0x60] sm:$0xff]  ;;  %v2534_v19 = vld [vmem:[%s8376_s5 + $0x6f0] sm:$0xff] }
 0x38e   : > { %2607 = vmatpush.msrb.mxu2 %v2328_v21  ;;  %2653 = vmatpush.msrb.mxu0 %v2392_v13  ;;  %v2376_v28 = vld [vmem:[%s8376_s5 + $0x200] sm:$0xff]  ;;  %v2566_v13 = vld [vmem:[%s8376_s5 + $0x7f0] sm:$0xff] }
 0x38f   : > { %3948 = vmatmul.msk.f32.gmra.mxu2 %vm4978_vm9, %v1856_v40  ;;  %2208 = vmatpush.msrb.mxu1 %v2001_v38  ;;  %v2388_v38 = vld [vmem:[%s8376_s5 + $0x260] sm:$0xff] }
 0x390   : > { %2124 = vmatmul.f32.gmra.mxu1 %v6352_v29  ;;  %3950 = vmatmul.msk.f32.gmra.mxu3 %vm4812_vm7, %v1860_v57  ;;  %v2430_v29 = vld [vmem:[%s8376_s5 + $0x3b0] sm:$0xff]  ;;  %v2420_v40 = vld [vmem:[%s8376_s5 + $0x360] sm:$0xff] }
 0x391   : > { %3951 = vmatmul.msk.f32.gmra.mxu0 %vm539_vm5, %v1830_v4  ;;  %2209 = vmatpush.msrb.mxu1 %v2000_v59  ;;  %v2354_v59 = vld [vmem:[%s8376_s5 + $0x150] sm:$0xff] }
 0x392   : > { %2631 = vmatpush.msrb.mxu3 %v2358_v2  ;;  %2608 = vmatpush.msrb.mxu2 %v2326_v16  ;;  %v2532_v2 = vld [vmem:[%s8376_s5 + $0x6e0] sm:$0xff] }
 0x393   : > { %2210 = vmatpush.msrb.mxu1 %v1999_v41  ;;  %2654 = vmatpush.msrb.mxu0 %v2390_v62  ;;  %v2498_v62 = vld [vmem:[%s8376_s5 + $0x5d0] sm:$0xff] }
 0x394   : > { %2632 = vmatpush.msrb.mxu3 %v2356_v34  ;;  %2609 = vmatpush.msrb.mxu2 %v2324_v24  ;;  %v2562_v34 = vld [vmem:[%s8376_s5 + $0x7d0] sm:$0xff]  ;;  %v2496_v24 = vld [vmem:[%s8376_s5 + $0x5c0] sm:$0xff] }
 0x395   : > { %2211 = vmatpush.msrb.mxu1 %v1998_v27  ;;  %2655 = vmatpush.msrb.mxu0 %v2388_v38  ;;  %v2322_v27 = vld [vmem:[%s8376_s5 + $0x50] sm:$0xff] }
 0x396   : > { %2633 = vmatpush.msrb.mxu3 %v2354_v59  ;;  %2610 = vmatpush.msrb.mxu2 %v2322_v27  ;;  %v2528_v59 = vld [vmem:[%s8376_s5 + $0x6c0] sm:$0xff] }
 0x397   : > { %2212 = vmatpush.msrb.mxu1 %v1997_v10  ;;  %v2386_v10 = vld [vmem:[%s8376_s5 + $0x250] sm:$0xff] }
 0x398   : > { %3952 = vmatmul.msk.f32.vlgmr.msrb.gmra.mxu1 %vm4911_vm8, %v1837_v25  ;;  %v2424_v25 = vld [vmem:[%s8376_s5 + $0x380] sm:$0xff]  ;;  %2656 = vmatpush.msrb.mxu0 %v2386_v10  ;;  %v2494_v10 = vld [vmem:[%s8376_s5 + $0x5b0] sm:$0xff] }
 0x399   : > { %2669 = vmatpush.msra.mxu1 %v2438_v50  ;;  %2634 = vmatpush.msrb.mxu3 %v2352_v46  ;;  %v2384_v50 = vld [vmem:[%s8376_s5 + $0x240] sm:$0xff]  ;;  %v2526_v46 = vld [vmem:[%s8376_s5 + $0x6b0] sm:$0xff] }
 0x39a   : > { %2611 = vmatpush.msrb.mxu2 %v2320_v48  ;;  %2657 = vmatpush.msrb.mxu0 %v2384_v50  ;;  %v2492_v50 = vld [vmem:[%s8376_s5 + $0x5a0] sm:$0xff] }
 0x39b   : > { %2670 = vmatpush.msra.mxu1 %v2436_v20  ;;  %2635 = vmatpush.msrb.mxu3 %v2350_v11  ;;  %v2556_v11 = vld [vmem:[%s8376_s5 + $0x7a0] sm:$0xff] }
 0x39c   : > { %2612 = vmatpush.msrb.mxu2 %v2318_v42  ;;  %2658 = vmatpush.msrb.mxu0 %v2382_v36 }
 0x39d   : > { %2671 = vmatpush.msra.mxu1 %v2434_v44 }
 0x39e   : > { %2613 = vmatpush.msrb.mxu2 %v2316_v53 }
 0x39f   : > { %2672 = vmatpush.msra.mxu1 %v2432_v56 }
 0x3a0   : > { %3953 = vmatmul.msk.f32.gmra.mxu1 %vm4978_vm9, %v1866_v45  ;;  %v2418_v45 = vld [vmem:[%s8376_s5 + $0x350] sm:$0xff] }
 0x3a1   : > { %2673 = vmatpush.msra.mxu1 %v2430_v29  ;;  %v2378_v29 = vld [vmem:[%s8376_s5 + $0x210] sm:$0xff] }
 0x3a3   : > { %2674 = vmatpush.msra.mxu1 %v2428_v3  ;;  %v2312_v3 = vld [vmem:[%s8376_s5] sm:$0xff] }
 0x3a5   : > { %2675 = vmatpush.msra.mxu1 %v2426_v6  ;;  %v2502_v6 = vld [vmem:[%s8376_s5 + $0x5f0] sm:$0xff] }
 0x3a7   : > { %2676 = vmatpush.msra.mxu1 %v2424_v25  ;;  %v2500_v25 = vld [vmem:[%s8376_s5 + $0x5e0] sm:$0xff] }
 0x3a9   : > { %2677 = vmatpush.msra.mxu1 %v2422_v31  ;;  %v2466_v31 = vld [vmem:[%s8376_s5 + $0x4d0] sm:$0xff] }
 0x3ab   : > { %2678 = vmatpush.msra.mxu1 %v2420_v40  ;;  %v2464_v40 = vld [vmem:[%s8376_s5 + $0x4c0] sm:$0xff] }
 0x3ad   : > { %2679 = vmatpush.msra.mxu1 %v2418_v45 }
 0x3af   : > { %2680 = vmatpush.msra.mxu1 %v2416_v54  ;;  %v2460_v54 = vld [vmem:[%s8376_s5 + $0x4a0] sm:$0xff] }
 0x3b1   : > { %2681 = vmatpush.msra.mxu1 %v2414_v15  ;;  %v2490_v15 = vld [vmem:[%s8376_s5 + $0x590] sm:$0xff] }
 0x3b3   : > { %2682 = vmatpush.msra.mxu1 %v2412_v55  ;;  %v2488_v55 = vld [vmem:[%s8376_s5 + $0x580] sm:$0xff] }
 0x3b5   : > { %2683 = vmatpush.msra.mxu1 %v2410_v61  ;;  %v2518_v61 = vld [vmem:[%s8376_s5 + $0x670] sm:$0xff] }
 0x3f5   : > { %v6443_v47 = vpop.f32.mrf.mxu1 }
 0x3f6   : > { %v6504_v17 = vpop.f32.mrf.mxu0 }
 0x3fa   : > { %v2053_v52 = vpop.f32.mrf.mxu2 }
 0x3fb   : > { %v6487_v26 = vpop.f32.mrf.mxu3  ;;  %v2054_v30 = vadd.f32 %v2053_v52, %v6443_v47  ;;  %v2348_v52 = vld [vmem:[%s8376_s5 + $0x120] sm:$0xff] }
 0x3fc   : > { %2636 = vmatpush.msrb.mxu3 %v2348_v52  ;;  %v2458_v52 = vld [vmem:[%s8376_s5 + $0x490] sm:$0xff] }
 0x3fd   : > { %v2033_v9 = vpop.f32.mrf.mxu1  ;;  %v2077_v57 = vadd.f32 %v6487_v26, %v2054_v30  ;;  %v2380_v26 = vld [vmem:[%s8376_s5 + $0x220] sm:$0xff] }
 0x3fe   : > { %v2102_v33 = vpop.f32.mrf.mxu0  ;;  %2659 = vmatpush.msrb.mxu0 %v2380_v26  ;;  %2637 = vmatpush.msrb.mxu3 %v2346_v58  ;;  %v2564_v30 = vld [vmem:[%s8376_s5 + $0x7e0] sm:$0xff] }
 0x3ff   : > { %v2100_v20 = vadd.f32 %v6504_v17, %v2077_v57  ;;  %v2560_v57 = vld [vmem:[%s8376_s5 + $0x7c0] sm:$0xff] }
 0x400   : > { %2660 = vmatpush.msrb.mxu0 %v2378_v29  ;;  %2638 = vmatpush.msrb.mxu3 %v2344_v18  ;;  %v2520_v58 = vld [vmem:[%s8376_s5 + $0x680] sm:$0xff]  ;;  %v2454_v29 = vld [vmem:[%s8376_s5 + $0x470] sm:$0xff] }
 0x401   : > { %v2550_v18 = vld [vmem:[%s8376_s5 + $0x770] sm:$0xff] }
 0x402   : > { %v2056_v4 = vpop.f32.mrf.mxu2  ;;  %2661 = vmatpush.msrb.mxu0 %v2376_v28  ;;  %2715 = vmatpush.msra.mxu3 %v2502_v6  ;;  %v2484_v28 = vld [vmem:[%s8376_s5 + $0x560] sm:$0xff] }
 0x403   : > { %v2079_v23 = vpop.f32.mrf.mxu3  ;;  %v2057_v35 = vadd.f32 %v2056_v4, %v2033_v9  ;;  %v2314_v9 = vld [vmem:[%s8376_s5 + $0x10] sm:$0xff]  ;;  %v2408_v4 = vld [vmem:[%s8376_s5 + $0x300] sm:$0xff] }
 0x404   : > { %2614 = vmatpush.msrb.mxu2 %v2314_v9  ;;  %2684 = vmatpush.msra.mxu1 %v2408_v4  ;;  %v2486_v9 = vld [vmem:[%s8376_s5 + $0x570] sm:$0xff]  ;;  %v2452_v4 = vld [vmem:[%s8376_s5 + $0x460] sm:$0xff] }
 0x405   : > { %v2122_v63 = vpop.f32.mrf.mxu1  ;;  %v2080_v22 = vadd.f32 %v2079_v23, %v2057_v35  ;;  %v2470_v23 = vld [vmem:[%s8376_s5 + $0x4f0] sm:$0xff]  ;;  %2738 = vmatpush.msra.mxu0 %v2534_v19  ;;  %2716 = vmatpush.msra.mxu3 %v2500_v25 }
 0x406   : > { %v2123_v44 = vadd.f32 %v2122_v63, %v2100_v20  ;;  %v2191_v56 = vpop.f32.mrf.mxu0  ;;  %2615 = vmatpush.msrb.mxu2 %v2312_v3  ;;  %v2468_v63 = vld [vmem:[%s8376_s5 + $0x4e0] sm:$0xff]  ;;  %2761 = vmatpush.msrb.mxu1 %v2566_v13  ;;  %v2482_v19 = vld [vmem:[%s8376_s5 + $0x550] sm:$0xff] }
 0x407   : > { %v2103_v32 = vadd.f32 %v2102_v33, %v2080_v22  ;;  %2739 = vmatpush.msra.mxu0 %v2532_v2  ;;  %v2530_v33 = vld [vmem:[%s8376_s5 + $0x6d0] sm:$0xff]  ;;  %2717 = vmatpush.msra.mxu3 %v2498_v62  ;;  %v2512_v62 = vld [vmem:[%s8376_s5 + $0x640] sm:$0xff] }
 0x408   : > { %2692 = vmatpush.msra.mxu2 %v2470_v23  ;;  %2762 = vmatpush.msrb.mxu1 %v2564_v30  ;;  %v2558_v22 = vld [vmem:[%s8376_s5 + $0x7b0] sm:$0xff]  ;;  %v2480_v30 = vld [vmem:[%s8376_s5 + $0x540] sm:$0xff] }
 0x409   : > { %2740 = vmatpush.msra.mxu0 %v2530_v33  ;;  %2718 = vmatpush.msra.mxu3 %v2496_v24  ;;  %v2514_v13 = vld [vmem:[%s8376_s5 + $0x650] sm:$0xff] }
 0x40a   : > { %v2145_v41 = vpop.f32.mrf.mxu2  ;;  %2693 = vmatpush.msra.mxu2 %v2468_v63  ;;  %2763 = vmatpush.msrb.mxu1 %v2562_v34  ;;  %v2546_v25 = vld [vmem:[%s8376_s5 + $0x750] sm:$0xff] }
 0x40b   : > { %v2168_v47 = vpop.f32.mrf.mxu3  ;;  %v2146_v60 = vadd.f32 %v2145_v41, %v2123_v44  ;;  %2741 = vmatpush.msra.mxu0 %v2528_v59  ;;  %2719 = vmatpush.msra.mxu3 %v2494_v10  ;;  %v2522_v44 = vld [vmem:[%s8376_s5 + $0x690] sm:$0xff]  ;;  %v2444_v10 = vld [vmem:[%s8376_s5 + $0x420] sm:$0xff] }
 0x40c   : > { %2694 = vmatpush.msra.mxu2 %v2466_v31  ;;  %2764 = vmatpush.msrb.mxu1 %v2560_v57  ;;  %v2544_v31 = vld [vmem:[%s8376_s5 + $0x740] sm:$0xff]  ;;  %v2446_v24 = vld [vmem:[%s8376_s5 + $0x430] sm:$0xff] }
 0x40d   : > { %v2125_v12 = vpop.f32.mrf.mxu1  ;;  %v2169_v21 = vadd.f32 %v2168_v47, %v2146_v60  ;;  %v2462_v47 = vld [vmem:[%s8376_s5 + $0x4b0] sm:$0xff]  ;;  %2742 = vmatpush.msra.mxu0 %v2526_v46  ;;  %2720 = vmatpush.msra.mxu3 %v2492_v50  ;;  %v2552_v60 = vld [vmem:[%s8376_s5 + $0x780] sm:$0xff] }
 0x40e   : > { %v2126_v0 = vadd.f32 %v2125_v12, %v2103_v32  ;;  %v2194_v38 = vpop.f32.mrf.mxu0  ;;  %2695 = vmatpush.msra.mxu2 %v2464_v40  ;;  %v2524_v12 = vld [vmem:[%s8376_s5 + $0x6a0] sm:$0xff]  ;;  %2765 = vmatpush.msrb.mxu1 %v2558_v22  ;;  %v2554_v32 = vld [vmem:[%s8376_s5 + $0x790] sm:$0xff] }
 0x40f   : > { %v2192_v35 = vadd.f32 %v2191_v56, %v2169_v21  ;;  %2743 = vmatpush.msra.mxu0 %v2524_v12  ;;  %2721 = vmatpush.msra.mxu3 %v2490_v15  ;;  %v2456_v56 = vld [vmem:[%s8376_s5 + $0x480] sm:$0xff]  ;;  %v2450_v21 = vld [vmem:[%s8376_s5 + $0x450] sm:$0xff] }
 0x410   : > { %2696 = vmatpush.msra.mxu2 %v2462_v47  ;;  %2766 = vmatpush.msrb.mxu1 %v2556_v11  ;;  %v2542_v40 = vld [vmem:[%s8376_s5 + $0x730] sm:$0xff]  ;;  %v2540_v47 = vld [vmem:[%s8376_s5 + $0x720] sm:$0xff] }
 0x411   : > { %2744 = vmatpush.msra.mxu0 %v2522_v44  ;;  %2722 = vmatpush.msra.mxu3 %v2488_v55  ;;  %v2474_v50 = vld [vmem:[%s8376_s5 + $0x510] sm:$0xff]  ;;  %v2536_v15 = vld [vmem:[%s8376_s5 + $0x700] sm:$0xff] }
 0x412   : > { %v2148_v17 = vpop.f32.mrf.mxu2  ;;  %2697 = vmatpush.msra.mxu2 %v2460_v54  ;;  %2767 = vmatpush.msrb.mxu1 %v2554_v32  ;;  %v2442_v54 = vld [vmem:[%s8376_s5 + $0x410] sm:$0xff] }
 0x413   : > { %v2149_v1 = vadd.f32 %v2148_v17, %v2126_v0  ;;  %v2171_v43 = vpop.f32.mrf.mxu3  ;;  %2745 = vmatpush.msra.mxu0 %v2520_v58  ;;  %2723 = vmatpush.msra.mxu3 %v2486_v9  ;;  %v2506_v12 = vld [vmem:[%s8376_s5 + $0x610] sm:$0xff] }
 0x414   : > { %2698 = vmatpush.msra.mxu2 %v2458_v52  ;;  %2768 = vmatpush.msrb.mxu1 %v2552_v60 }
 0x415   : > { %v2214_v5 = vpop.f32.mrf.mxu1  ;;  %v2172_v16 = vadd.f32 %v2171_v43, %v2149_v1  ;;  %2746 = vmatpush.msra.mxu0 %v2518_v61  ;;  %v2516_v43 = vld [vmem:[%s8376_s5 + $0x660] sm:$0xff]  ;;  %2724 = vmatpush.msra.mxu3 %v2484_v28  ;;  %v2343_v28 = vld [vmem:[%s8376_s5 + $0xf8] sm:$0xff] }
 0x416   : > { %v6692_v41 = vadd.f32 %v2214_v5, %v2192_v35  ;;  %2699 = vmatpush.msra.mxu2 %v2456_v56  ;;  %v2548_v5 = vld [vmem:[%s8376_s5 + $0x760] sm:$0xff]  ;;  %2769 = vmatpush.msrb.mxu1 %v2550_v18  ;;  %v2478_v35 = vld [vmem:[%s8376_s5 + $0x530] sm:$0xff] }
 0x417   : > { %v2195_v27 = vadd.f32 %v2194_v38, %v2172_v16  ;;  %2747 = vmatpush.msra.mxu0 %v2516_v43  ;;  %2725 = vmatpush.msra.mxu3 %v2482_v19  ;;  %v2448_v16 = vld [vmem:[%s8376_s5 + $0x440] sm:$0xff]  ;;  %v2510_v38 = vld [vmem:[%s8376_s5 + $0x630] sm:$0xff]  ;;  %v2375_v19 = vld [vmem:[%s8376_s5 + $0x1f8] sm:$0xff] }
 0x418   : > { %v2228_v20 = vmul.f32 %v6692_v41, %v6692_v41  ;;  %2700 = vmatpush.msra.mxu2 %v2454_v29  ;;  %2770 = vmatpush.msrb.mxu1 %v2548_v5 }
 0x419   : > { %2748 = vmatpush.msra.mxu0 %v2514_v13  ;;  %2726 = vmatpush.msra.mxu3 %v2480_v30  ;;  %v2341_v13 = vld [vmem:[%s8376_s5 + $0xe8] sm:$0xff] }
 0x41a   : > { %2701 = vmatpush.msra.mxu2 %v2452_v4  ;;  %2771 = vmatpush.msrb.mxu1 %v2546_v25  ;;  %v2405_v30 = vld [vmem:[%s8376_s5 + $0x2e8] sm:$0xff] }
 0x41b   : > { %2749 = vmatpush.msra.mxu0 %v2512_v62  ;;  %2727 = vmatpush.msra.mxu3 %v2478_v35  ;;  %v2594_v62 = vld [vmem:[%s8376_s5 + $0x8d0] sm:$0xff] }
 0x41c   : > { %2702 = vmatpush.msra.mxu2 %v2450_v21  ;;  %2772 = vmatpush.msrb.mxu1 %v2544_v31  ;;  %v2407_v21 = vld [vmem:[%s8376_s5 + $0x2f8] sm:$0xff] }
 0x41d   : > { %v2217_v45 = vpop.f32.mrf.mxu1  ;;  %2750 = vmatpush.msra.mxu0 %v2510_v38  ;;  %v2371_v31 = vld [vmem:[%s8376_s5 + $0x1d8] sm:$0xff]  ;;  %v2369_v38 = vld [vmem:[%s8376_s5 + $0x1c8] sm:$0xff] }
 0x41e   : > { %v6706_v48 = vadd.f32 %v2217_v45, %v2195_v27  ;;  %2703 = vmatpush.msra.mxu2 %v2448_v16  ;;  %v2476_v27 = vld [vmem:[%s8376_s5 + $0x520] sm:$0xff]  ;;  %2773 = vmatpush.msrb.mxu1 %v2542_v40  ;;  %v2339_v16 = vld [vmem:[%s8376_s5 + $0xd8] sm:$0xff] }
 0x41f   : > { %v2508_v45 = vld [vmem:[%s8376_s5 + $0x620] sm:$0xff]  ;;  %2728 = vmatpush.msra.mxu3 %v2476_v27 }
 0x420   : > { %v2220_v42 = vadd.f32 %v6706_v48, %v6692_v41  ;;  %v2229_v36 = vmul.f32 %v6706_v48, %v6706_v48  ;;  %2704 = vmatpush.msra.mxu2 %v2446_v24  ;;  %2751 = vmatpush.msra.mxu0 %v2508_v45  ;;  %v2592_v24 = vld [vmem:[%s8376_s5 + $0x8c0] sm:$0xff] }
 0x421   : > { %2774 = vmatpush.msrb.mxu1 %v2540_v47  ;;  %2729 = vmatpush.msra.mxu3 %v2474_v50 }
 0x422   : > { %v2221_v53 = vrot.slane %v2220_v42, 4  ;;  %v2230_v26 = vadd.f32 %v2229_v36, %v2228_v20  ;;  %2705 = vmatpush.msra.mxu2 %v2444_v10  ;;  %v2472_v20 = vld [vmem:[%s8376_s5 + $0x500] sm:$0xff]  ;;  %2752 = vmatpush.msra.mxu0 %v2506_v12  ;;  %v2335_v10 = vld [vmem:[%s8376_s5 + $0xb8] sm:$0xff] }
 0x423   : > { %v2504_v36 = vld [vmem:[%s8376_s5 + $0x600] sm:$0xff]  ;;  %2730 = vmatpush.msra.mxu3 %v2472_v20  ;;  %v2399_v12 = vld [vmem:[%s8376_s5 + $0x2b8] sm:$0xff]  ;;  %v2365_v20 = vld [vmem:[%s8376_s5 + $0x1a8] sm:$0xff] }
 0x424   : > { %v2222_v0 = vadd.f32 %v2221_v53, %v2220_v42  ;;  %v2231_v17 = vrot.slane %v2230_v26, 4  ;;  %v2440_v42 = vld [vmem:[%s8376_s5 + $0x400] sm:$0xff]  ;;  %2706 = vmatpush.msra.mxu2 %v2442_v54  ;;  %2753 = vmatpush.msra.mxu0 %v2504_v36  ;;  %v2331_v36 = vld [vmem:[%s8376_s5 + $0x98] sm:$0xff] }
 0x426   : > { %v2223_v1 = vrot.slane %v2222_v0, 2  ;;  %v2232_v3 = vadd.f32 %v2231_v17, %v2230_v26  ;;  %2707 = vmatpush.msra.mxu2 %v2440_v42  ;;  %v2397_v42 = vld [vmem:[%s8376_s5 + $0x2a8] sm:$0xff] }
 0x428   : > { %v2224_v6 = vadd.f32 %v2223_v1, %v2222_v0  ;;  %v2233_v23 = vrot.slane %v2232_v3, 2 }
 0x42a   : > { %v2225_v63 = vrot.slane %v2224_v6, 1  ;;  %v2234_v2 = vadd.f32 %v2233_v23, %v2232_v3  ;;  %v2598_v23 = vld [vmem:[%s8376_s5 + $0x8f0] sm:$0xff] }
 0x42c   : > { %v2226_v33 = vadd.f32 %v2225_v63, %v2224_v6  ;;  %v2235_v34 = vrot.slane %v2234_v2, 1  ;;  %v2596_v63 = vld [vmem:[%s8376_s5 + $0x8e0] sm:$0xff] }
 0x42e   : > { %v2227_v59 = vmul.f32 %v2226_v33, %v5728_v49  ;;  %v2236_v57 = vadd.f32 %v2235_v34, %v2234_v2  ;;  %v2373_v2 = vld [vmem:[%s8376_s5 + $0x1e8] sm:$0xff]  ;;  %v2403_v33 = vld [vmem:[%s8376_s5 + $0x2d8] sm:$0xff] }
 0x42f   : > { %v2337_v34 = vld [vmem:[%s8376_s5 + $0xc8] sm:$0xff] }
 0x430   : > { %v2237_v46 = vmul.f32 %v2236_v57, %v5728_v49  ;;  %v2238_v22 = vmul.f32 %v2227_v59, %v2227_v59  ;;  %v2538_v49 = vld [vmem:[%s8376_s5 + $0x710] sm:$0xff]  ;;  %v2241_v60 = vsub.f32 %v6692_v41, %v2227_v59  ;;  %v2242_v0 = vsub.f32 %v6706_v48, %v2227_v59  ;;  %v2401_v59 = vld [vmem:[%s8376_s5 + $0x2c8] sm:$0xff] }
 0x431   : > { %2775 = vmatpush.msrb.mxu1 %v2538_v49  ;;  %v2333_v49 = vld [vmem:[%s8376_s5 + $0xa8] sm:$0xff] }
 0x432   : > { %v2239_v11 = vsub.f32 %v2237_v46, %v2238_v22  ;;  %v2590_v46 = vld [vmem:[%s8376_s5 + $0x8b0] sm:$0xff]  ;;  %v2367_v22 = vld [vmem:[%s8376_s5 + $0x1b8] sm:$0xff] }
 0x433   : > { %2776 = vmatpush.msrb.mxu1 %v2536_v15  ;;  %v2586_v15 = vld [vmem:[%s8376_s5 + $0x890] sm:$0xff] }
 0x434   : > { %v2240_v52 = vmax.f32 %v2239_v11, 0.0  ;;  %v2588_v11 = vld [vmem:[%s8376_s5 + $0x8a0] sm:$0xff] }
 0x436   : > { %v2243_v44 = vadd.f32 1e-05, %v2240_v52  ;;  %v2363_v52 = vld [vmem:[%s8376_s5 + $0x198] sm:$0xff] }
 0x438   : > { %4150 = vrsqrt.f32 %v2243_v44  ;;  %vm2250_vm11 = vweird.f32 %v2243_v44 }
 0x43e   : > { %v4151_v32 = vpop.eup %4150 }
 0x43f   : > { %v2245_v53 = vmul.f32 %v4151_v32, %v2243_v44  ;;  %vm2251_vm0 = vweird.f32 %v4151_v32  ;;  %v2395_v44 = vld [vmem:[%s8376_s5 + $0x298] sm:$0xff] }
 0x440   : > { %vm2252_vm12 = vmor %vm2250_vm11, %vm2251_vm0 }
 0x441   : > { %v2246_v26 = vmul.f32 %v4151_v32, %v2245_v53 }
 0x443   : > { %v2247_v55 = vmul.f32 0.5, %v2246_v26 }
 0x445   : > { %v2248_v56 = vsub.f32 1.5, %v2247_v55  ;;  %v2584_v55 = vld [vmem:[%s8376_s5 + $0x880] sm:$0xff] }
 0x447   : > { %v2249_v58 = vmul.f32 %v4151_v32, %v2248_v56  ;;  %v2361_v56 = vld [vmem:[%s8376_s5 + $0x188] sm:$0xff] }
 0x449   : > { %v2253_v17 = vsel %vm2252_vm12, %v4151_v32, %v2249_v58  ;;  %v2329_v32 = vld [vmem:[%s8376_s5 + $0x88] sm:$0xff] }
 0x44a   : > { %v2254_v9 = vmul.f32 %v2253_v17, %v2241_v60  ;;  %v2255_v29 = vmul.f32 %v2253_v17, %v2242_v0  ;;  %v2393_v58 = vld [vmem:[%s8376_s5 + $0x288] sm:$0xff]  ;;  %v2327_v60 = vld [vmem:[%s8376_s5 + $0x78] sm:$0xff]  ;;  %v2582_v17 = vld [vmem:[%s8376_s5 + $0x870] sm:$0xff] }
 0x44c   : > { %vm2256_vm3 = vcmp.ge.f32.partialorder %v2254_v9, 0.0  ;;  %v2258_v61 = vmul.f32 0.05, %v2254_v9  ;;  %v2259_v18 = vmul.f32 0.05, %v2255_v29  ;;  %vm2257_vm10 = vcmp.ge.f32.partialorder %v2255_v29, 0.0 }
 0x44e   : > { %v6850_v1 = vsel %vm2256_vm3, %v2254_v9, %v2258_v61  ;;  %v6888_v25 = vsel %vm2257_vm10, %v2255_v29, %v2259_v18  ;;  %v2359_v9 = vld [vmem:[%s8376_s5 + $0x178] sm:$0xff]  ;;  %v2325_v61 = vld [vmem:[%s8376_s5 + $0x68] sm:$0xff]  ;;  %v2580_v18 = vld [vmem:[%s8376_s5 + $0x860] sm:$0xff] }
 0x44f   : > { %v6853_v3 = vrot.slane %v6850_v1, 4  ;;  %v2264_v41 = vrot.slane %v6850_v1, 3  ;;  %v2278_v48 = vrot.slane %v6850_v1, 5  ;;  %v2286_v4 = vrot.slane %v6850_v1, 7  ;;  %v2391_v29 = vld [vmem:[%s8376_s5 + $0x278] sm:$0xff] }
 0x450   : > { %v6921_v35 = vrot.slane %v6888_v25, 4  ;;  %v2265_v40 = vrot.slane %v6888_v25, 3  ;;  %v2279_v57 = vrot.slane %v6888_v25, 5  ;;  %v2287_v27 = vrot.slane %v6888_v25, 7 }
 0x451   : > { %3957 = vmatmul.msk.f32.vlgmr.msrb.gmra.mxu3 %vm4806_vm6, %v6853_v3  ;;  %v6865_v43 = vsel %vm520_vm13, 0.0, %v2264_v41  ;;  %v6868_v5 = vsel %vm552_vm2, 0.0, %v2278_v48  ;;  %v6871_v6 = vsel %vm571_vm15, 0.0, %v2286_v4  ;;  %v2294_v53 = vrot.slane %v6850_v1, 1 }
 0x452   : > { %2807 = vmatpush.msrb.mxu3 %v2343_v28  ;;  %3954 = vmatmul.msk.f32.vlgmr.msrb.gmra.mxu2 %vm4731_vm14, %v6865_v43  ;;  %v6941_v45 = vsel %vm539_vm5, %v6853_v3, %v6921_v35  ;;  %v6947_v47 = vsel %vm520_vm13, %v2264_v41, %v2265_v40  ;;  %v6961_v50 = vsel %vm552_vm2, %v2278_v48, %v2279_v57  ;;  %v2295_v26 = vrot.slane %v6888_v25, 1  ;;  %v2357_v28 = vld [vmem:[%s8376_s5 + $0x168] sm:$0xff]  ;;  %v2323_v48 = vld [vmem:[%s8376_s5 + $0x58] sm:$0xff] }
 0x453   : > { %3958 = vmatmul.msk.f32.vlgmr.msrb.gmra.mxu0 %vm4911_vm8, %v6868_v5  ;;  %3960 = vmatmul.msk.f32.vlgmr.msra.gmra.mxu1 %vm4731_vm14, %v6871_v6  ;;  %v6964_v54 = vsel %vm571_vm15, %v2286_v4, %v2287_v27  ;;  %v2389_v41 = vld [vmem:[%s8376_s5 + $0x268] sm:$0xff]  ;;  %v2578_v4 = vld [vmem:[%s8376_s5 + $0x850] sm:$0xff]  ;;  %v2315_v27 = vld [vmem:[%s8376_s5 + $0x18] sm:$0xff] }
 0x454   : > { %2784 = vmatpush.msrb.mxu2 %v2598_v23  ;;  %2830 = vmatpush.msrb.mxu0 %v2375_v19  ;;  %v7017_v0 = vsel %vm588_vm4, %v2294_v53, %v2295_v26  ;;  %v2355_v23 = vld [vmem:[%s8376_s5 + $0x158] sm:$0xff]  ;;  %v2501_v53 = vld [vmem:[%s8376_s5 + $0x5e8] sm:$0xff] }
 0x455   : > { %2853 = vmatpush.msra.mxu1 %v2407_v21  ;;  %2808 = vmatpush.msrb.mxu3 %v2341_v13  ;;  %v2387_v19 = vld [vmem:[%s8376_s5 + $0x258] sm:$0xff]  ;;  %v2321_v21 = vld [vmem:[%s8376_s5 + $0x48] sm:$0xff]  ;;  %v2576_v13 = vld [vmem:[%s8376_s5 + $0x840] sm:$0xff] }
 0x456   : > { %2785 = vmatpush.msrb.mxu2 %v2596_v63  ;;  %2831 = vmatpush.msrb.mxu0 %v2373_v2  ;;  %v2353_v63 = vld [vmem:[%s8376_s5 + $0x148] sm:$0xff] }
 0x457   : > { %2854 = vmatpush.msra.mxu1 %v2405_v30  ;;  %2809 = vmatpush.msrb.mxu3 %v2339_v16  ;;  %v2385_v2 = vld [vmem:[%s8376_s5 + $0x248] sm:$0xff]  ;;  %v2319_v30 = vld [vmem:[%s8376_s5 + $0x38] sm:$0xff]  ;;  %v7076_v16 = vsel %vm588_vm4, %v2295_v26, 0.0 }
 0x458   : > { %2786 = vmatpush.msrb.mxu2 %v2594_v62  ;;  %2832 = vmatpush.msrb.mxu0 %v2371_v31  ;;  %v2574_v62 = vld [vmem:[%s8376_s5 + $0x830] sm:$0xff]  ;;  %v2351_v31 = vld [vmem:[%s8376_s5 + $0x138] sm:$0xff] }
 0x459   : > { %2855 = vmatpush.msra.mxu1 %v2403_v33  ;;  %2810 = vmatpush.msrb.mxu3 %v2337_v34  ;;  %v7091_v33 = vsel %vm520_vm13, %v2265_v40, 0.0  ;;  %v2383_v34 = vld [vmem:[%s8376_s5 + $0x238] sm:$0xff]  ;;  %v2349_v40 = vld [vmem:[%s8376_s5 + $0x128] sm:$0xff] }
 0x45a   : > { %2787 = vmatpush.msrb.mxu2 %v2592_v24  ;;  %2833 = vmatpush.msrb.mxu0 %v2369_v38  ;;  %v2317_v24 = vld [vmem:[%s8376_s5 + $0x28] sm:$0xff]  ;;  %v2572_v38 = vld [vmem:[%s8376_s5 + $0x820] sm:$0xff]  ;;  %v2467_v26 = vld [vmem:[%s8376_s5 + $0x4d8] sm:$0xff] }
 0x45b   : > { %2856 = vmatpush.msra.mxu1 %v2401_v59  ;;  %2642 = vmatmul.f32.gmra.mxu3 %v6941_v45  ;;  %v2381_v59 = vld [vmem:[%s8376_s5 + $0x228] sm:$0xff] }
 0x45c   : > { %2811 = vmatpush.msrb.mxu3 %v2335_v10  ;;  %3955 = vmatmul.msk.f32.gmra.mxu2 %vm4812_vm7, %v6947_v47  ;;  %v2570_v10 = vld [vmem:[%s8376_s5 + $0x810] sm:$0xff] }
 0x45d   : > { %3959 = vmatmul.msk.f32.gmra.mxu0 %vm4978_vm9, %v6961_v50  ;;  %3961 = vmatmul.msk.f32.gmra.mxu1 %vm4812_vm7, %v6964_v54 }
 0x45e   : > { %2788 = vmatpush.msrb.mxu2 %v2590_v46  ;;  %2834 = vmatpush.msrb.mxu0 %v2367_v22  ;;  %v2347_v46 = vld [vmem:[%s8376_s5 + $0x118] sm:$0xff] }
 0x45f   : > { %2857 = vmatpush.msra.mxu1 %v2399_v12  ;;  %2812 = vmatpush.msrb.mxu3 %v2333_v49  ;;  %v2379_v22 = vld [vmem:[%s8376_s5 + $0x218] sm:$0xff]  ;;  %v2313_v12 = vld [vmem:[%s8376_s5 + $0x8] sm:$0xff]  ;;  %v2568_v49 = vld [vmem:[%s8376_s5 + $0x800] sm:$0xff] }
 0x460   : > { %2789 = vmatpush.msrb.mxu2 %v2588_v11  ;;  %2835 = vmatpush.msrb.mxu0 %v2365_v20  ;;  %v2345_v11 = vld [vmem:[%s8376_s5 + $0x108] sm:$0xff] }
 0x461   : > { %2858 = vmatpush.msra.mxu1 %v2397_v42  ;;  %2813 = vmatpush.msrb.mxu3 %v2331_v36  ;;  %v2377_v20 = vld [vmem:[%s8376_s5 + $0x208] sm:$0xff]  ;;  %v2471_v42 = vld [vmem:[%s8376_s5 + $0x4f8] sm:$0xff] }
 0x462   : > { %2790 = vmatpush.msrb.mxu2 %v2586_v15  ;;  %2836 = vmatpush.msrb.mxu0 %v2363_v52  ;;  %v2439_v36 = vld [vmem:[%s8376_s5 + $0x3f8] sm:$0xff] }
 0x463   : > { %2859 = vmatpush.msra.mxu1 %v2395_v44  ;;  %2814 = vmatpush.msrb.mxu3 %v2329_v32  ;;  %v2503_v15 = vld [vmem:[%s8376_s5 + $0x5f8] sm:$0xff]  ;;  %v2469_v44 = vld [vmem:[%s8376_s5 + $0x4e8] sm:$0xff] }
 0x464   : > { %2791 = vmatpush.msrb.mxu2 %v2584_v55  ;;  %2837 = vmatpush.msrb.mxu0 %v2361_v56  ;;  %v2535_v52 = vld [vmem:[%s8376_s5 + $0x6f8] sm:$0xff]  ;;  %v2437_v32 = vld [vmem:[%s8376_s5 + $0x3e8] sm:$0xff] }
 0x465   : > { %2860 = vmatpush.msra.mxu1 %v2393_v58  ;;  %3962 = vmatmul.msk.f32.vlgmr.msra.gmra.mxu3 %vm4911_vm8, %v7017_v0  ;;  %v2435_v55 = vld [vmem:[%s8376_s5 + $0x3d8] sm:$0xff]  ;;  %v2465_v56 = vld [vmem:[%s8376_s5 + $0x4c8] sm:$0xff] }
 0x466   : > { %2815 = vmatpush.msrb.mxu3 %v2327_v60  ;;  %2708 = vmatmul.f32.vlgmr.msra.gmra.mxu2 %v6850_v1  ;;  %v2497_v58 = vld [vmem:[%s8376_s5 + $0x5c8] sm:$0xff] }
 0x467   : > { %3964 = vmatmul.msk.f32.vlgmr.msra.gmra.mxu0 %vm4731_vm14, %v6947_v47  ;;  %2777 = vmatmul.f32.vlgmr.msrb.gmra.mxu1 %v6941_v45  ;;  %v2529_v60 = vld [vmem:[%s8376_s5 + $0x6c8] sm:$0xff] }
 0x468   : > { %2792 = vmatpush.msrb.mxu2 %v2582_v17  ;;  %2838 = vmatpush.msrb.mxu0 %v2359_v9  ;;  %v2463_v17 = vld [vmem:[%s8376_s5 + $0x4b8] sm:$0xff] }
 0x469   : > { %2861 = vmatpush.msra.mxu1 %v2391_v29  ;;  %2816 = vmatpush.msrb.mxu3 %v2325_v61  ;;  %v2431_v9 = vld [vmem:[%s8376_s5 + $0x3b8] sm:$0xff] }
 0x46a   : > { %2793 = vmatpush.msrb.mxu2 %v2580_v18  ;;  %2839 = vmatpush.msrb.mxu0 %v2357_v28  ;;  %v2495_v29 = vld [vmem:[%s8376_s5 + $0x5b8] sm:$0xff]  ;;  %v2461_v18 = vld [vmem:[%s8376_s5 + $0x4a8] sm:$0xff]  ;;  %v7218_v28 = vsel %vm552_vm2, %v2279_v57, 0.0 }
 0x46b   : > { %2862 = vmatpush.msra.mxu1 %v2389_v41  ;;  %2817 = vmatpush.msrb.mxu3 %v2323_v48  ;;  %v2527_v61 = vld [vmem:[%s8376_s5 + $0x6b8] sm:$0xff]  ;;  %v2429_v41 = vld [vmem:[%s8376_s5 + $0x3a8] sm:$0xff] }
 0x46c   : > { %2794 = vmatpush.msrb.mxu2 %v2578_v4  ;;  %2840 = vmatpush.msrb.mxu0 %v2355_v23  ;;  %v2493_v48 = vld [vmem:[%s8376_s5 + $0x5a8] sm:$0xff]  ;;  %v2459_v57 = vld [vmem:[%s8376_s5 + $0x498] sm:$0xff] }
 0x46d   : > { %2863 = vmatpush.msra.mxu1 %v2387_v19  ;;  %2818 = vmatpush.msrb.mxu3 %v2321_v21  ;;  %v2525_v4 = vld [vmem:[%s8376_s5 + $0x6a8] sm:$0xff]  ;;  %v2427_v23 = vld [vmem:[%s8376_s5 + $0x398] sm:$0xff] }
 0x46e   : > { %2795 = vmatpush.msrb.mxu2 %v2576_v13  ;;  %2841 = vmatpush.msrb.mxu0 %v2353_v63  ;;  %v2491_v19 = vld [vmem:[%s8376_s5 + $0x598] sm:$0xff]  ;;  %v2457_v13 = vld [vmem:[%s8376_s5 + $0x488] sm:$0xff] }
 0x46f   : > { %2864 = vmatpush.msra.mxu1 %v2385_v2  ;;  %3963 = vmatmul.msk.f32.gmra.mxu3 %vm4978_vm9, %v7076_v16  ;;  %v2523_v21 = vld [vmem:[%s8376_s5 + $0x698] sm:$0xff]  ;;  %v2425_v63 = vld [vmem:[%s8376_s5 + $0x388] sm:$0xff] }
 0x470   : > { %2819 = vmatpush.msrb.mxu3 %v2319_v30  ;;  %2711 = vmatmul.f32.gmra.mxu2 %v6888_v25  ;;  %v2489_v2 = vld [vmem:[%s8376_s5 + $0x588] sm:$0xff] }
 0x471   : > { %3965 = vmatmul.msk.f32.gmra.mxu0 %vm4812_vm7, %v7091_v33  ;;  %3966 = vmatmul.msk.f32.gmra.mxu1 %vm539_vm5, %v6921_v35  ;;  %v2521_v30 = vld [vmem:[%s8376_s5 + $0x688] sm:$0xff] }
 0x472   : > { %2796 = vmatpush.msrb.mxu2 %v2574_v62  ;;  %2842 = vmatpush.msrb.mxu0 %v2351_v31  ;;  %v2455_v62 = vld [vmem:[%s8376_s5 + $0x478] sm:$0xff] }
 0x473   : > { %2865 = vmatpush.msra.mxu1 %v2383_v34  ;;  %2820 = vmatpush.msrb.mxu3 %v2317_v24  ;;  %v2423_v31 = vld [vmem:[%s8376_s5 + $0x378] sm:$0xff] }
 0x474   : > { %2797 = vmatpush.msrb.mxu2 %v2572_v38  ;;  %2843 = vmatpush.msrb.mxu0 %v2349_v40  ;;  %v2487_v34 = vld [vmem:[%s8376_s5 + $0x578] sm:$0xff]  ;;  %v2453_v38 = vld [vmem:[%s8376_s5 + $0x468] sm:$0xff] }
 0x475   : > { %2866 = vmatpush.msra.mxu1 %v2381_v59  ;;  %2821 = vmatpush.msrb.mxu3 %v2315_v27  ;;  %v2519_v24 = vld [vmem:[%s8376_s5 + $0x678] sm:$0xff]  ;;  %v2421_v40 = vld [vmem:[%s8376_s5 + $0x368] sm:$0xff] }
 0x476   : > { %2798 = vmatpush.msrb.mxu2 %v2570_v10  ;;  %2844 = vmatpush.msrb.mxu0 %v2347_v46  ;;  %v2485_v59 = vld [vmem:[%s8376_s5 + $0x568] sm:$0xff]  ;;  %v2451_v10 = vld [vmem:[%s8376_s5 + $0x458] sm:$0xff] }
 0x477   : > { %2867 = vmatpush.msra.mxu1 %v2379_v22  ;;  %2822 = vmatpush.msrb.mxu3 %v2313_v12  ;;  %v2517_v27 = vld [vmem:[%s8376_s5 + $0x668] sm:$0xff]  ;;  %v2419_v46 = vld [vmem:[%s8376_s5 + $0x358] sm:$0xff] }
 0x478   : > { %2799 = vmatpush.msrb.mxu2 %v2568_v49  ;;  %2845 = vmatpush.msrb.mxu0 %v2345_v11  ;;  %v2483_v22 = vld [vmem:[%s8376_s5 + $0x558] sm:$0xff]  ;;  %v2449_v49 = vld [vmem:[%s8376_s5 + $0x448] sm:$0xff] }
 0x479   : > { %2868 = vmatpush.msra.mxu1 %v2377_v20  ;;  %2899 = vmatpush.msra.mxu3 %v2471_v42  ;;  %v2515_v12 = vld [vmem:[%s8376_s5 + $0x658] sm:$0xff]  ;;  %v2417_v11 = vld [vmem:[%s8376_s5 + $0x348] sm:$0xff] }
 0x47a   : > { %3969 = vmatmul.msk.f32.vlgmr.msrb.gmra.mxu3 %vm4731_vm14, %v6865_v43  ;;  %2876 = vmatpush.msra.mxu2 %v2439_v36  ;;  %v2533_v43 = vld [vmem:[%s8376_s5 + $0x6e8] sm:$0xff]  ;;  %v2447_v36 = vld [vmem:[%s8376_s5 + $0x438] sm:$0xff] }
 0x47b   : > { %2922 = vmatpush.msra.mxu0 %v2503_v15  ;;  %2945 = vmatpush.msrb.mxu1 %v2535_v52  ;;  %v2481_v20 = vld [vmem:[%s8376_s5 + $0x548] sm:$0xff]  ;;  %v2415_v15 = vld [vmem:[%s8376_s5 + $0x338] sm:$0xff] }
 0x47c   : > { %3967 = vmatmul.msk.f32.vlgmr.msrb.gmra.mxu2 %vm4911_vm8, %v6961_v50  ;;  %3972 = vmatmul.msk.f32.vlgmr.msrb.gmra.mxu0 %vm4806_vm6, %v6853_v3  ;;  %v2531_v3 = vld [vmem:[%s8376_s5 + $0x6d8] sm:$0xff]  ;;  %v2513_v42 = vld [vmem:[%s8376_s5 + $0x648] sm:$0xff] }
 0x47d   : > { %3973 = vmatmul.msk.f32.vlgmr.msra.gmra.mxu1 %vm4911_vm8, %v6868_v5  ;;  %2900 = vmatpush.msra.mxu3 %v2469_v44  ;;  %v2433_v5 = vld [vmem:[%s8376_s5 + $0x3c8] sm:$0xff]  ;;  %v2479_v52 = vld [vmem:[%s8376_s5 + $0x538] sm:$0xff] }
 0x47e   : > { %2877 = vmatpush.msra.mxu2 %v2437_v32  ;;  %2923 = vmatpush.msra.mxu0 %v2501_v53  ;;  %v2511_v44 = vld [vmem:[%s8376_s5 + $0x638] sm:$0xff]  ;;  %v2445_v32 = vld [vmem:[%s8376_s5 + $0x428] sm:$0xff] }
 0x47f   : > { %2946 = vmatpush.msrb.mxu1 %v2533_v43  ;;  %2901 = vmatpush.msra.mxu3 %v2467_v26  ;;  %v2413_v53 = vld [vmem:[%s8376_s5 + $0x328] sm:$0xff] }
 0x480   : > { %2878 = vmatpush.msra.mxu2 %v2435_v55  ;;  %2924 = vmatpush.msra.mxu0 %v2499_v37  ;;  %v2477_v43 = vld [vmem:[%s8376_s5 + $0x528] sm:$0xff]  ;;  %v2443_v55 = vld [vmem:[%s8376_s5 + $0x418] sm:$0xff] }
 0x481   : > { %2947 = vmatpush.msrb.mxu1 %v2531_v3  ;;  %2902 = vmatpush.msra.mxu3 %v2465_v56  ;;  %v2509_v26 = vld [vmem:[%s8376_s5 + $0x628] sm:$0xff]  ;;  %v2411_v37 = vld [vmem:[%s8376_s5 + $0x318] sm:$0xff] }
 0x482   : > { %2879 = vmatpush.msra.mxu2 %v2433_v5  ;;  %2925 = vmatpush.msra.mxu0 %v2497_v58  ;;  %v2475_v3 = vld [vmem:[%s8376_s5 + $0x518] sm:$0xff]  ;;  %v2441_v5 = vld [vmem:[%s8376_s5 + $0x408] sm:$0xff] }
 0x483   : > { %2948 = vmatpush.msrb.mxu1 %v2529_v60  ;;  %2903 = vmatpush.msra.mxu3 %v2463_v17  ;;  %v2507_v56 = vld [vmem:[%s8376_s5 + $0x618] sm:$0xff]  ;;  %v2409_v58 = vld [vmem:[%s8376_s5 + $0x308] sm:$0xff] }
 0x484   : > { %3970 = vmatmul.msk.f32.gmra.mxu3 %vm4812_vm7, %v6947_v47  ;;  %2880 = vmatpush.msra.mxu2 %v2431_v9  ;;  %v2473_v60 = vld [vmem:[%s8376_s5 + $0x508] sm:$0xff]  ;;  %v2599_v9 = vld [vmem:[%s8376_s5 + $0x8f8] sm:$0xff] }
 0x485   : > { %2926 = vmatpush.msra.mxu0 %v2495_v29  ;;  %2949 = vmatpush.msrb.mxu1 %v2527_v61  ;;  %v2505_v17 = vld [vmem:[%s8376_s5 + $0x608] sm:$0xff]  ;;  %v2567_v29 = vld [vmem:[%s8376_s5 + $0x7f8] sm:$0xff] }
 0x486   : > { %3968 = vmatmul.msk.f32.gmra.mxu2 %vm4978_vm9, %v7218_v28  ;;  %2849 = vmatmul.f32.gmra.mxu0 %v6941_v45  ;;  %v2597_v61 = vld [vmem:[%s8376_s5 + $0x8e8] sm:$0xff] }
 0x487   : > { %3974 = vmatmul.msk.f32.gmra.mxu1 %vm4978_vm9, %v6961_v50  ;;  %2904 = vmatpush.msra.mxu3 %v2461_v18  ;;  %v2595_v18 = vld [vmem:[%s8376_s5 + $0x8d8] sm:$0xff] }
 0x488   : > { %2881 = vmatpush.msra.mxu2 %v2429_v41  ;;  %2927 = vmatpush.msra.mxu0 %v2493_v48  ;;  %v2559_v41 = vld [vmem:[%s8376_s5 + $0x7b8] sm:$0xff]  ;;  %v2589_v48 = vld [vmem:[%s8376_s5 + $0x8a8] sm:$0xff] }
 0x489   : > { %2950 = vmatpush.msrb.mxu1 %v2525_v4  ;;  %2905 = vmatpush.msra.mxu3 %v2459_v57  ;;  %v2587_v4 = vld [vmem:[%s8376_s5 + $0x898] sm:$0xff] }
 0x48a   : > { %2882 = vmatpush.msra.mxu2 %v2427_v23  ;;  %2928 = vmatpush.msra.mxu0 %v2491_v19  ;;  %v2551_v57 = vld [vmem:[%s8376_s5 + $0x778] sm:$0xff]  ;;  %v2581_v23 = vld [vmem:[%s8376_s5 + $0x868] sm:$0xff] }
 0x48b   : > { %2951 = vmatpush.msrb.mxu1 %v2523_v21  ;;  %2906 = vmatpush.msra.mxu3 %v2457_v13  ;;  %v2549_v19 = vld [vmem:[%s8376_s5 + $0x768] sm:$0xff]  ;;  %v2579_v21 = vld [vmem:[%s8376_s5 + $0x858] sm:$0xff] }
 0x48c   : > { %2883 = vmatpush.msra.mxu2 %v2425_v63  ;;  %2929 = vmatpush.msra.mxu0 %v2489_v2  ;;  %v2547_v13 = vld [vmem:[%s8376_s5 + $0x758] sm:$0xff]  ;;  %v2577_v63 = vld [vmem:[%s8376_s5 + $0x848] sm:$0xff] }
 0x48d   : > { %2952 = vmatpush.msrb.mxu1 %v2521_v30  ;;  %2907 = vmatpush.msra.mxu3 %v2455_v62  ;;  %v2545_v2 = vld [vmem:[%s8376_s5 + $0x748] sm:$0xff]  ;;  %v2575_v30 = vld [vmem:[%s8376_s5 + $0x838] sm:$0xff] }
 0x48e   : > { %2884 = vmatpush.msra.mxu2 %v2423_v31  ;;  %2930 = vmatpush.msra.mxu0 %v2487_v34  ;;  %v2543_v62 = vld [vmem:[%s8376_s5 + $0x738] sm:$0xff]  ;;  %v2573_v31 = vld [vmem:[%s8376_s5 + $0x828] sm:$0xff] }
 0x48f   : > { %2953 = vmatpush.msrb.mxu1 %v2519_v24  ;;  %2908 = vmatpush.msra.mxu3 %v2453_v38  ;;  %v2541_v34 = vld [vmem:[%s8376_s5 + $0x728] sm:$0xff]  ;;  %v2571_v24 = vld [vmem:[%s8376_s5 + $0x818] sm:$0xff] }
 0x490   : > { %2885 = vmatpush.msra.mxu2 %v2421_v40  ;;  %2931 = vmatpush.msra.mxu0 %v2485_v59  ;;  %v2539_v38 = vld [vmem:[%s8376_s5 + $0x718] sm:$0xff]  ;;  %v2569_v40 = vld [vmem:[%s8376_s5 + $0x808] sm:$0xff] }
 0x491   : > { %2954 = vmatpush.msrb.mxu1 %v2517_v27  ;;  %2909 = vmatpush.msra.mxu3 %v2451_v10  ;;  %v2537_v59 = vld [vmem:[%s8376_s5 + $0x708] sm:$0xff] }
 0x492   : > { %2886 = vmatpush.msra.mxu2 %v2419_v46  ;;  %2932 = vmatpush.msra.mxu0 %v2483_v22 }
 0x493   : > { %2955 = vmatpush.msrb.mxu1 %v2515_v12  ;;  %2910 = vmatpush.msra.mxu3 %v2449_v49 }
 0x494   : > { %2887 = vmatpush.msra.mxu2 %v2417_v11  ;;  %2933 = vmatpush.msra.mxu0 %v2481_v20 }
 0x495   : > { %2956 = vmatpush.msrb.mxu1 %v2513_v42  ;;  %2911 = vmatpush.msra.mxu3 %v2447_v36 }
 0x496   : > { %2888 = vmatpush.msra.mxu2 %v2415_v15  ;;  %2934 = vmatpush.msra.mxu0 %v2479_v52 }
 0x497   : > { %2957 = vmatpush.msrb.mxu1 %v2511_v44  ;;  %2912 = vmatpush.msra.mxu3 %v2445_v32 }
 0x498   : > { %2889 = vmatpush.msra.mxu2 %v2413_v53  ;;  %2935 = vmatpush.msra.mxu0 %v2477_v43 }
 0x499   : > { %2958 = vmatpush.msrb.mxu1 %v2509_v26  ;;  %2913 = vmatpush.msra.mxu3 %v2443_v55 }
 0x49a   : > { %2890 = vmatpush.msra.mxu2 %v2411_v37  ;;  %2936 = vmatpush.msra.mxu0 %v2475_v3 }
 0x49b   : > { %2959 = vmatpush.msrb.mxu1 %v2507_v56  ;;  %2914 = vmatpush.msra.mxu3 %v2441_v5 }
 0x49c   : > { %2891 = vmatpush.msra.mxu2 %v2409_v58  ;;  %2915 = vmatmul.f32.vlgmr.msra.gmra.mxu3 %v6850_v1  ;;  %v2565_v1 = vld [vmem:[%s8376_s5 + $0x7e8] sm:$0xff] }
 0x49d   : > { %2937 = vmatpush.msra.mxu0 %v2473_v60  ;;  %2960 = vmatpush.msrb.mxu1 %v2505_v17 }
 0x49e   : > { %2991 = vmatpush.msrb.mxu3 %v2599_v9  ;;  %3975 = vmatmul.msk.f32.vlgmr.msra.gmra.mxu2 %vm4731_vm14, %v6871_v6  ;;  %v2563_v6 = vld [vmem:[%s8376_s5 + $0x7d8] sm:$0xff] }
 0x49f   : > { %3977 = vmatmul.msk.f32.vlgmr.msra.gmra.mxu0 %vm4911_vm8, %v7017_v0  ;;  %3979 = vmatmul.msk.f32.vlgmr.msrb.gmra.mxu1 %vm4731_vm14, %v6947_v47  ;;  %v2593_v0 = vld [vmem:[%s8376_s5 + $0x8c8] sm:$0xff]  ;;  %v2591_v47 = vld [vmem:[%s8376_s5 + $0x8b8] sm:$0xff] }
 0x4a0   : > { %2968 = vmatpush.msrb.mxu2 %v2567_v29  ;;  %2992 = vmatpush.msrb.mxu3 %v2597_v61 }
 0x4a2   : > { %2969 = vmatpush.msrb.mxu2 %v2565_v1  ;;  %2993 = vmatpush.msrb.mxu3 %v2595_v18 }
 0x4a4   : > { %2970 = vmatpush.msrb.mxu2 %v2563_v6  ;;  %2994 = vmatpush.msrb.mxu3 %v2593_v0 }
 0x4a5   : > { %2918 = vmatmul.f32.gmra.mxu3 %v6888_v25  ;;  %v2557_v25 = vld [vmem:[%s8376_s5 + $0x7a8] sm:$0xff] }
 0x4a6   : > { %2971 = vmatpush.msrb.mxu2 %v2561_v8  ;;  %2995 = vmatpush.msrb.mxu3 %v2591_v47 }
 0x4a7   : > { %3976 = vmatmul.msk.f32.gmra.mxu2 %vm4812_vm7, %v6964_v54  ;;  %3978 = vmatmul.msk.f32.gmra.mxu0 %vm4978_vm9, %v7076_v16  ;;  %v2555_v54 = vld [vmem:[%s8376_s5 + $0x798] sm:$0xff]  ;;  %v2585_v16 = vld [vmem:[%s8376_s5 + $0x888] sm:$0xff] }
 0x4a8   : > { %3980 = vmatmul.msk.f32.gmra.mxu1 %vm4812_vm7, %v7091_v33  ;;  %2972 = vmatpush.msrb.mxu2 %v2559_v41  ;;  %v2583_v33 = vld [vmem:[%s8376_s5 + $0x878] sm:$0xff] }
 0x4a9   : > { %2996 = vmatpush.msrb.mxu3 %v2589_v48 }
 0x4aa   : > { %2973 = vmatpush.msrb.mxu2 %v2557_v25 }
 0x4ab   : > { %2997 = vmatpush.msrb.mxu3 %v2587_v4 }
 0x4ac   : > { %2974 = vmatpush.msrb.mxu2 %v2555_v54 }
 0x4ad   : > { %2998 = vmatpush.msrb.mxu3 %v2585_v16 }
 0x4ae   : > { %2975 = vmatpush.msrb.mxu2 %v2553_v39 }
 0x4af   : > { %2999 = vmatpush.msrb.mxu3 %v2583_v33 }
 0x4b0   : > { %2976 = vmatpush.msrb.mxu2 %v2551_v57 }
 0x4b1   : > { %3000 = vmatpush.msrb.mxu3 %v2581_v23 }
 0x4b2   : > { %2977 = vmatpush.msrb.mxu2 %v2549_v19 }
 0x4b3   : > { %3001 = vmatpush.msrb.mxu3 %v2579_v21 }
 0x4b4   : > { %2978 = vmatpush.msrb.mxu2 %v2547_v13 }
 0x4b5   : > { %3002 = vmatpush.msrb.mxu3 %v2577_v63 }
 0x4b6   : > { %2979 = vmatpush.msrb.mxu2 %v2545_v2 }
 0x4b7   : > { %3003 = vmatpush.msrb.mxu3 %v2575_v30 }
 0x4b8   : > { %2980 = vmatpush.msrb.mxu2 %v2543_v62 }
 0x4b9   : > { %3004 = vmatpush.msrb.mxu3 %v2573_v31 }
 0x4ba   : > { %2981 = vmatpush.msrb.mxu2 %v2541_v34 }
 0x4bb   : > { %3005 = vmatpush.msrb.mxu3 %v2571_v24 }
 0x4bc   : > { %2982 = vmatpush.msrb.mxu2 %v2539_v38 }
 0x4bd   : > { %3006 = vmatpush.msrb.mxu3 %v2569_v40 }
 0x4be   : > { %2983 = vmatpush.msrb.mxu2 %v2537_v59  ;;  %3982 = vmatmul.msk.f32.vlgmr.msrb.gmra.mxu3 %vm4911_vm8, %v6961_v50  ;;  %vm7940_vm8 = vmneg %vm571_vm15  ;;  %vm8392_vm15 = vcmask 130048  }
 0x4bf   : > { %2984 = vmatmul.f32.vlgmr.msrb.gmra.mxu2 %v6941_v45 }
 0x4c6   : > { %3983 = vmatmul.msk.f32.gmra.mxu3 %vm4978_vm9, %v7218_v28 }
 0x4c7   : > { %3981 = vmatmul.msk.f32.gmra.mxu2 %vm539_vm5, %v6921_v35 }
 0x4d0   : > { %v2663_v22 = vpop.f32.mrf.mxu0  ;;  %v2686_v12 = vpop.f32.mrf.mxu1 }
 0x4d4   : > { %v2640_v10 = vpop.f32.mrf.mxu3 }
 0x4d5   : > { %v2617_v27 = vpop.f32.mrf.mxu2 }
 0x4d6   : > { %v2641_v42 = vadd.f32 %v2640_v10, %v2617_v27 }
 0x4d8   : > { %v2664_v36 = vadd.f32 %v2663_v22, %v2641_v42 }
 0x4da   : > { %v2666_v20 = vpop.f32.mrf.mxu0  ;;  %v2689_v50 = vpop.f32.mrf.mxu1  ;;  %v2687_v51 = vadd.f32 %v2686_v12, %v2664_v36 }
 0x4de   : > { %v2643_v49 = vpop.f32.mrf.mxu3 }
 0x4df   : > { %v2620_v46 = vpop.f32.mrf.mxu2 }
 0x4e0   : > { %v2644_v14 = vadd.f32 %v2643_v49, %v2620_v46 }
 0x4e2   : > { %v2667_v52 = vadd.f32 %v2666_v20, %v2644_v14 }
 0x4e4   : > { %v2755_v28 = vpop.f32.mrf.mxu0  ;;  %v2690_v32 = vadd.f32 %v2689_v50, %v2667_v52  ;;  %v2778_v53 = vpop.f32.mrf.mxu1 }
 0x4e8   : > { %v2732_v45 = vpop.f32.mrf.mxu3 }
 0x4e9   : > { %v2709_v11 = vpop.f32.mrf.mxu2 }
 0x4ea   : > { %v2710_v44 = vadd.f32 %v2709_v11, %v2687_v51 }
 0x4ec   : > { %v2733_v43 = vadd.f32 %v2732_v45, %v2710_v44 }
 0x4ee   : > { %v2756_v3 = vadd.f32 %v2755_v28, %v2733_v43  ;;  %v2758_v56 = vpop.f32.mrf.mxu0  ;;  %v2781_v60 = vpop.f32.mrf.mxu1 }
 0x4f0   : > { %v2779_v58 = vadd.f32 %v2778_v53, %v2756_v3 }
 0x4f2   : > { %v2735_v26 = vpop.f32.mrf.mxu3 }
 0x4f3   : > { %v2712_v15 = vpop.f32.mrf.mxu2 }
 0x4f4   : > { %v2713_v35 = vadd.f32 %v2712_v15, %v2690_v32 }
 0x4f6   : > { %v2736_v37 = vadd.f32 %v2735_v26, %v2713_v35 }
 0x4f8   : > { %v2759_v5 = vadd.f32 %v2758_v56, %v2736_v37 }
 0x4f9   : > { %v2847_v21 = vpop.f32.mrf.mxu0 }
 0x4fa   : > { %v2782_v9 = vadd.f32 %v2781_v60, %v2759_v5  ;;  %v2870_v63 = vpop.f32.mrf.mxu1 }
 0x4fd   : > { %v2824_v23 = vpop.f32.mrf.mxu3 }
 0x4fe   : > { %v2848_v31 = vadd.f32 %v2847_v21, %v2824_v23 }
 0x4ff   : > { %v2801_v55 = vpop.f32.mrf.mxu2 }
 0x500   : > { %v7481_v17 = vadd.f32 %v2801_v55, %v2779_v58  ;;  %v2871_v38 = vadd.f32 %v2870_v63, %v2848_v31 }
 0x502   : > { %v3028_v1 = vmul.f32 %v7481_v17, %v7481_v17 }
 0x503   : > { %v2850_v62 = vpop.f32.mrf.mxu0 }
 0x504   : > { %v2873_v34 = vpop.f32.mrf.mxu1 }
 0x507   : > { %v2827_v13 = vpop.f32.mrf.mxu3 }
 0x508   : > { %v2851_v24 = vadd.f32 %v2850_v62, %v2827_v13 }
 0x509   : > { %v2804_v29 = vpop.f32.mrf.mxu2 }
 0x50a   : > { %v7483_v61 = vadd.f32 %v2804_v29, %v2782_v9  ;;  %v2874_v46 = vadd.f32 %v2873_v34, %v2851_v24 }
 0x50c   : > { %v3014_v18 = vadd.f32 %v7483_v61, %v7481_v17  ;;  %v3030_v6 = vmul.f32 %v7483_v61, %v7483_v61 }
 0x50e   : > { %v3015_v0 = vrot.slane %v3014_v18, 4  ;;  %v3032_v8 = vadd.f32 %v3030_v6, %v3028_v1 }
 0x510   : > { %v3033_v47 = vrot.slane %v3032_v8, 4  ;;  %v3016_v41 = vadd.f32 %v3015_v0, %v3014_v18 }
 0x512   : > { %v3017_v48 = vrot.slane %v3016_v41, 2  ;;  %v3034_v25 = vadd.f32 %v3033_v47, %v3032_v8 }
 0x514   : > { %v3018_v4 = vadd.f32 %v3017_v48, %v3016_v41  ;;  %v3035_v54 = vrot.slane %v3034_v25, 2 }
 0x516   : > { %v3019_v16 = vrot.slane %v3018_v4, 1  ;;  %v3036_v33 = vadd.f32 %v3035_v54, %v3034_v25 }
 0x518   : > { %v3020_v39 = vadd.f32 %v3019_v16, %v3018_v4  ;;  %v3037_v57 = vrot.slane %v3036_v33, 1 }
 0x51a   : > { %3047 = vrot.lane.b32.xlu2 %v3020_v39, %s4167_s23  ;;  %v3038_v19 = vadd.f32 %v3037_v57, %v3036_v33 }
 0x51c   : > { %v2939_v40 = vpop.f32.mrf.mxu0  ;;  %v2962_v49 = vpop.f32.mrf.mxu1 }
 0x51f   : > { %v2916_v2 = vpop.f32.mrf.mxu3 }
 0x521   : > { %v2893_v30 = vpop.f32.mrf.mxu2 }
 0x522   : > { %3059 = vrot.lane.b32.xlu2 %v3038_v19, %s4167_s23  ;;  %v2894_v59 = vadd.f32 %v2893_v30, %v2871_v38 }
 0x524   : > { %v2917_v22 = vadd.f32 %v2916_v2, %v2894_v59  ;;  %v2942_v50 = vpop.f32.mrf.mxu0  ;;  %v3271_v59 = vld [vmem:[%s8377_s6 + $0xf8] sm:$0xff] }
 0x525   : > { %v2965_v52 = vpop.f32.mrf.mxu1  ;;  %3388 = vmatpush.msra.mxu1 %v3271_v59  ;;  %v3289_v59 = vld [vmem:[%s8377_s6 + $0x188] sm:$0xff] }
 0x526   : > { %v2940_v20 = vadd.f32 %v2939_v40, %v2917_v22  ;;  %v3255_v40 = vld [vmem:[%s8377_s6 + $0x78] sm:$0xff]  ;;  %v3270_v22 = vld [vmem:[%s8377_s6 + $0xf0] sm:$0xff] }
 0x527   : > { %3368 = vmatpush.msrb.mxu0 %v3255_v40  ;;  %3389 = vmatpush.msra.mxu1 %v3270_v22  ;;  %v3273_v40 = vld [vmem:[%s8377_s6 + $0x108] sm:$0xff]  ;;  %v3288_v22 = vld [vmem:[%s8377_s6 + $0x180] sm:$0xff] }
 0x528   : > { %v2919_v27 = vpop.f32.mrf.mxu3  ;;  %v2963_v36 = vadd.f32 %v2962_v49, %v2940_v20  ;;  %v3302_v49 = vld [vmem:[%s8377_s6 + $0x1f0] sm:$0xff]  ;;  %v3269_v20 = vld [vmem:[%s8377_s6 + $0xe8] sm:$0xff] }
 0x529   : > { %3390 = vmatpush.msra.mxu1 %v3269_v20  ;;  %v3367_v20 = vld [vmem:[%s8377_s6 + $0x3f8] sm:$0xff] }
 0x52a   : > { %v2896_v10 = vpop.f32.mrf.mxu2 }
 0x52b   : > { %v2897_v12 = vadd.f32 %v2896_v10, %v2874_v46  ;;  %v3303_v10 = vld [vmem:[%s8377_s6 + $0x1f8] sm:$0xff]  ;;  %v3254_v46 = vld [vmem:[%s8377_s6 + $0x70] sm:$0xff] }
 0x52c   : > { %3428 = vmatpush.msra.mxu3 %v3303_v10  ;;  %3369 = vmatpush.msrb.mxu0 %v3254_v46  ;;  %v3256_v10 = vld [vmem:[%s8377_s6 + $0x80] sm:$0xff] }
 0x52d   : > { %v2920_v11 = vadd.f32 %v2919_v27, %v2897_v12  ;;  %v3287_v27 = vld [vmem:[%s8377_s6 + $0x178] sm:$0xff]  ;;  %v3286_v12 = vld [vmem:[%s8377_s6 + $0x170] sm:$0xff]  ;;  %v3272_v46 = vld [vmem:[%s8377_s6 + $0x100] sm:$0xff] }
 0x52e   : > { %3408 = vmatpush.msra.mxu2 %v3287_v27  ;;  %3429 = vmatpush.msra.mxu3 %v3302_v49  ;;  %v3240_v27 = vld [vmem:[%s8377_s6] sm:$0xff]  ;;  %v3335_v49 = vld [vmem:[%s8377_s6 + $0x2f8] sm:$0xff] }
 0x52f   : > { %v2943_v45 = vadd.f32 %v2942_v50, %v2920_v11  ;;  %v3253_v11 = vld [vmem:[%s8377_s6 + $0x68] sm:$0xff]  ;;  %v3252_v50 = vld [vmem:[%s8377_s6 + $0x60] sm:$0xff] }
 0x530   : > { %3409 = vmatpush.msra.mxu2 %v3286_v12  ;;  %3370 = vmatpush.msrb.mxu0 %v3253_v11  ;;  %v3319_v12 = vld [vmem:[%s8377_s6 + $0x278] sm:$0xff] }
 0x531   : > { %v2966_v51 = vadd.f32 %v2965_v52, %v2943_v45  ;;  %v3284_v45 = vld [vmem:[%s8377_s6 + $0x160] sm:$0xff]  ;;  %v3251_v52 = vld [vmem:[%s8377_s6 + $0x58] sm:$0xff] }
 0x532   : > { %3371 = vmatpush.msrb.mxu0 %v3252_v50  ;;  %v3351_v11 = vld [vmem:[%s8377_s6 + $0x378] sm:$0xff]  ;;  %v3350_v50 = vld [vmem:[%s8377_s6 + $0x370] sm:$0xff] }
 0x534   : > { %3372 = vmatpush.msrb.mxu0 %v3251_v52  ;;  %v3349_v52 = vld [vmem:[%s8377_s6 + $0x368] sm:$0xff] }
 0x541   : > { %v3008_v42 = vpop.f32.mrf.mxu3 }
 0x542   : > { %v2985_v14 = vpop.f32.mrf.mxu2 }
 0x543   : > { %v2986_v15 = vadd.f32 %v2985_v14, %v2963_v36  ;;  %v3301_v14 = vld [vmem:[%s8377_s6 + $0x1e8] sm:$0xff]  ;;  %v3268_v36 = vld [vmem:[%s8377_s6 + $0xe0] sm:$0xff] }
 0x544   : > { %3430 = vmatpush.msra.mxu3 %v3301_v14  ;;  %3391 = vmatpush.msra.mxu1 %v3268_v36  ;;  %v3334_v14 = vld [vmem:[%s8377_s6 + $0x2f0] sm:$0xff] }
 0x545   : > { %v7493_v44 = vadd.f32 %v3008_v42, %v2986_v15  ;;  %v3285_v42 = vld [vmem:[%s8377_s6 + $0x168] sm:$0xff]  ;;  %v3300_v15 = vld [vmem:[%s8377_s6 + $0x1e0] sm:$0xff]  ;;  %v3366_v36 = vld [vmem:[%s8377_s6 + $0x3f0] sm:$0xff] }
 0x546   : > { %3410 = vmatpush.msra.mxu2 %v3285_v42  ;;  %3431 = vmatpush.msra.mxu3 %v3300_v15  ;;  %v3318_v42 = vld [vmem:[%s8377_s6 + $0x270] sm:$0xff]  ;;  %v3333_v15 = vld [vmem:[%s8377_s6 + $0x2e8] sm:$0xff] }
 0x547   : > { %v3029_v43 = vmul.f32 %v7493_v44, %v7493_v44 }
 0x548   : > { %3411 = vmatpush.msra.mxu2 %v3284_v45  ;;  %v3317_v45 = vld [vmem:[%s8377_s6 + $0x268] sm:$0xff] }
 0x549   : > { %v3011_v35 = vpop.f32.mrf.mxu3 }
 0x54a   : > { %v2988_v28 = vpop.f32.mrf.mxu2 }
 0x54b   : > { %v2989_v32 = vadd.f32 %v2988_v28, %v2966_v51  ;;  %v3267_v51 = vld [vmem:[%s8377_s6 + $0xd8] sm:$0xff] }
 0x54c   : > { %v3283_v28 = vld [vmem:[%s8377_s6 + $0x158] sm:$0xff]  ;;  %3392 = vmatpush.msra.mxu1 %v3267_v51  ;;  %v3365_v51 = vld [vmem:[%s8377_s6 + $0x3e8] sm:$0xff] }
 0x54d   : > { %v7495_v53 = vadd.f32 %v3011_v35, %v2989_v32  ;;  %v3299_v32 = vld [vmem:[%s8377_s6 + $0x1d8] sm:$0xff]  ;;  %v3250_v35 = vld [vmem:[%s8377_s6 + $0x50] sm:$0xff]  ;;  %3412 = vmatpush.msra.mxu2 %v3283_v28  ;;  %v3316_v28 = vld [vmem:[%s8377_s6 + $0x260] sm:$0xff] }
 0x54e   : > { %3432 = vmatpush.msra.mxu3 %v3299_v32  ;;  %3373 = vmatpush.msrb.mxu0 %v3250_v35  ;;  %v3332_v32 = vld [vmem:[%s8377_s6 + $0x2e0] sm:$0xff] }
 0x54f   : > { %v3021_v26 = vadd.f32 %v7495_v53, %v7493_v44  ;;  %v3031_v55 = vmul.f32 %v7495_v53, %v7495_v53  ;;  %v3348_v35 = vld [vmem:[%s8377_s6 + $0x360] sm:$0xff] }
 0x551   : > { %v3022_v37 = vrot.slane %v3021_v26, 4  ;;  %v3039_v3 = vadd.f32 %v3031_v55, %v3029_v43  ;;  %v3266_v43 = vld [vmem:[%s8377_s6 + $0xd0] sm:$0xff] }
 0x552   : > { %v3298_v55 = vld [vmem:[%s8377_s6 + $0x1d0] sm:$0xff]  ;;  %3393 = vmatpush.msra.mxu1 %v3266_v43  ;;  %v3364_v43 = vld [vmem:[%s8377_s6 + $0x3e0] sm:$0xff] }
 0x553   : > { %v3023_v56 = vadd.f32 %v3022_v37, %v3021_v26  ;;  %v3040_v5 = vrot.slane %v3039_v3, 4  ;;  %v3282_v26 = vld [vmem:[%s8377_s6 + $0x150] sm:$0xff]  ;;  %v3249_v37 = vld [vmem:[%s8377_s6 + $0x48] sm:$0xff]  ;;  %3433 = vmatpush.msra.mxu3 %v3298_v55  ;;  %v3331_v55 = vld [vmem:[%s8377_s6 + $0x2d8] sm:$0xff] }
 0x554   : > { %3413 = vmatpush.msra.mxu2 %v3282_v26  ;;  %3374 = vmatpush.msrb.mxu0 %v3249_v37  ;;  %v3315_v26 = vld [vmem:[%s8377_s6 + $0x258] sm:$0xff] }
 0x555   : > { %v3024_v58 = vrot.slane %v3023_v56, 2  ;;  %v3041_v60 = vadd.f32 %v3040_v5, %v3039_v3  ;;  %v3265_v3 = vld [vmem:[%s8377_s6 + $0xc8] sm:$0xff]  ;;  %v3347_v37 = vld [vmem:[%s8377_s6 + $0x358] sm:$0xff] }
 0x556   : > { %v3297_v5 = vld [vmem:[%s8377_s6 + $0x1c8] sm:$0xff]  ;;  %3394 = vmatpush.msra.mxu1 %v3265_v3  ;;  %v3363_v3 = vld [vmem:[%s8377_s6 + $0x3d8] sm:$0xff] }
 0x557   : > { %v3025_v9 = vadd.f32 %v3024_v58, %v3023_v56  ;;  %v3042_v29 = vrot.slane %v3041_v60, 2  ;;  %v3281_v56 = vld [vmem:[%s8377_s6 + $0x148] sm:$0xff]  ;;  %v3248_v58 = vld [vmem:[%s8377_s6 + $0x40] sm:$0xff]  ;;  %3434 = vmatpush.msra.mxu3 %v3297_v5  ;;  %v3330_v5 = vld [vmem:[%s8377_s6 + $0x2d0] sm:$0xff] }
 0x558   : > { %3414 = vmatpush.msra.mxu2 %v3281_v56  ;;  %3375 = vmatpush.msrb.mxu0 %v3248_v58  ;;  %v3314_v56 = vld [vmem:[%s8377_s6 + $0x250] sm:$0xff] }
 0x559   : > { %v3026_v1 = vrot.slane %v3025_v9, 1  ;;  %v3043_v18 = vadd.f32 %v3042_v29, %v3041_v60  ;;  %v3264_v60 = vld [vmem:[%s8377_s6 + $0xc0] sm:$0xff]  ;;  %v3346_v58 = vld [vmem:[%s8377_s6 + $0x350] sm:$0xff] }
 0x55a   : > { %v3296_v29 = vld [vmem:[%s8377_s6 + $0x1c0] sm:$0xff]  ;;  %3395 = vmatpush.msra.mxu1 %v3264_v60  ;;  %v3362_v60 = vld [vmem:[%s8377_s6 + $0x3d0] sm:$0xff] }
 0x55b   : > { %v3027_v6 = vadd.f32 %v3026_v1, %v3025_v9  ;;  %v3044_v0 = vrot.slane %v3043_v18, 1  ;;  %v3280_v9 = vld [vmem:[%s8377_s6 + $0x140] sm:$0xff]  ;;  %v3247_v1 = vld [vmem:[%s8377_s6 + $0x38] sm:$0xff]  ;;  %3435 = vmatpush.msra.mxu3 %v3296_v29 }
 0x55c   : > { %3415 = vmatpush.msra.mxu2 %v3280_v9  ;;  %3376 = vmatpush.msrb.mxu0 %v3247_v1 }
 0x55d   : > { %3053 = vrot.lane.b32.xlu0 %v3027_v6, %s4167_s23  ;;  %v3045_v8 = vadd.f32 %v3044_v0, %v3043_v18  ;;  %v3263_v18 = vld [vmem:[%s8377_s6 + $0xb8] sm:$0xff] }
 0x55e   : > { %v3295_v0 = vld [vmem:[%s8377_s6 + $0x1b8] sm:$0xff]  ;;  %3396 = vmatpush.msra.mxu1 %v3263_v18  ;;  %v3313_v18 = vld [vmem:[%s8377_s6 + $0x248] sm:$0xff] }
 0x55f   : > { %3065 = vrot.lane.b32.xlu1 %v3045_v8, %s4167_s23  ;;  %3436 = vmatpush.msra.mxu3 %v3295_v0  ;;  %v3345_v0 = vld [vmem:[%s8377_s6 + $0x348] sm:$0xff] }
 0x574   : > { %v3048_v47 = vpop.permute.xlu2 %3047 }
 0x575   : > { %v3050_v48 = vadd.f32 %v3048_v47, %v3020_v39  ;;  %v3262_v47 = vld [vmem:[%s8377_s6 + $0xb0] sm:$0xff] }
 0x576   : > { %3397 = vmatpush.msra.mxu1 %v3262_v47 }
 0x577   : > { %v3051_v4 = vadd.f32 %v3050_v48, %v3027_v6  ;;  %v3279_v6 = vld [vmem:[%s8377_s6 + $0x138] sm:$0xff]  ;;  %v3294_v48 = vld [vmem:[%s8377_s6 + $0x1b0] sm:$0xff] }
 0x578   : > { %3416 = vmatpush.msra.mxu2 %v3279_v6  ;;  %3437 = vmatpush.msra.mxu3 %v3294_v48  ;;  %v3329_v6 = vld [vmem:[%s8377_s6 + $0x2c8] sm:$0xff]  ;;  %v3328_v48 = vld [vmem:[%s8377_s6 + $0x2c0] sm:$0xff] }
 0x57c   : > { %v3060_v41 = vpop.permute.xlu2 %3059 }
 0x57d   : > { %v3062_v25 = vadd.f32 %v3060_v41, %v3038_v19  ;;  %v3278_v41 = vld [vmem:[%s8377_s6 + $0x130] sm:$0xff] }
 0x57e   : > { %3417 = vmatpush.msra.mxu2 %v3278_v41  ;;  %v3312_v41 = vld [vmem:[%s8377_s6 + $0x240] sm:$0xff] }
 0x57f   : > { %v3063_v33 = vadd.f32 %v3062_v25, %v3045_v8  ;;  %v3246_v8 = vld [vmem:[%s8377_s6 + $0x30] sm:$0xff]  ;;  %v3245_v25 = vld [vmem:[%s8377_s6 + $0x28] sm:$0xff] }
 0x580   : > { %3377 = vmatpush.msrb.mxu0 %v3246_v8 }
 0x582   : > { %3378 = vmatpush.msrb.mxu0 %v3245_v25  ;;  %v3344_v25 = vld [vmem:[%s8377_s6 + $0x340] sm:$0xff] }
 0x5cf   : > { %v3054_v54 = vpop.permute.xlu0 %3053 }
 0x5d0   : > { %v3056_v16 = vadd.f32 %v3054_v54, %v3051_v4  ;;  %v3261_v4 = vld [vmem:[%s8377_s6 + $0xa8] sm:$0xff] }
 0x5d1   : > { %v3066_v57 = vpop.permute.xlu1 %3065  ;;  %v3277_v54 = vld [vmem:[%s8377_s6 + $0x128] sm:$0xff]  ;;  %3398 = vmatpush.msra.mxu1 %v3261_v4 }
 0x5d2   : > { %v7506_v23 = vmul.f32 %v3056_v16, %v4293_v7  ;;  %v3068_v21 = vadd.f32 %v3066_v57, %v3063_v33  ;;  %v3293_v16 = vld [vmem:[%s8377_s6 + $0x1a8] sm:$0xff]  ;;  %v3244_v33 = vld [vmem:[%s8377_s6 + $0x20] sm:$0xff]  ;;  %3418 = vmatpush.msra.mxu2 %v3277_v54 }
 0x5d3   : > { %v3260_v57 = vld [vmem:[%s8377_s6 + $0xa0] sm:$0xff]  ;;  %3438 = vmatpush.msra.mxu3 %v3293_v16  ;;  %3379 = vmatpush.msrb.mxu0 %v3244_v33  ;;  %v3311_v33 = vld [vmem:[%s8377_s6 + $0x238] sm:$0xff] }
 0x5d4   : > { %v3069_v13 = vmul.f32 %v3068_v21, %v4293_v7  ;;  %v3070_v63 = vmul.f32 %v7506_v23, %v7506_v23  ;;  %3085 = vrot.lane.b32.xlu2 %v7506_v23, %s4167_s23  ;;  %v3276_v21 = vld [vmem:[%s8377_s6 + $0x120] sm:$0xff]  ;;  %3399 = vmatpush.msra.mxu1 %v3260_v57 }
 0x5d5   : > { %3419 = vmatpush.msra.mxu2 %v3276_v21  ;;  %v3360_v16 = vld [vmem:[%s8377_s6 + $0x3c0] sm:$0xff] }
 0x5d6   : > { %v3071_v2 = vsub.f32 %v3069_v13, %v3070_v63  ;;  %v3292_v13 = vld [vmem:[%s8377_s6 + $0x1a0] sm:$0xff]  ;;  %v3243_v63 = vld [vmem:[%s8377_s6 + $0x18] sm:$0xff] }
 0x5d7   : > { %3439 = vmatpush.msra.mxu3 %v3292_v13  ;;  %3380 = vmatpush.msrb.mxu0 %v3243_v63  ;;  %v3359_v13 = vld [vmem:[%s8377_s6 + $0x3b8] sm:$0xff]  ;;  %v3310_v63 = vld [vmem:[%s8377_s6 + $0x230] sm:$0xff] }
 0x5d8   : > { %v3072_v39 = vmax.f32 %v3071_v2, 0.0  ;;  %v3259_v2 = vld [vmem:[%s8377_s6 + $0x98] sm:$0xff] }
 0x5d9   : > { %3400 = vmatpush.msra.mxu1 %v3259_v2  ;;  %v3326_v2 = vld [vmem:[%s8377_s6 + $0x2b0] sm:$0xff] }
 0x5da   : > { %v3073_v19 = vadd.f32 1e-05, %v3072_v39  ;;  %v3275_v39 = vld [vmem:[%s8377_s6 + $0x118] sm:$0xff] }
 0x5db   : > { %3420 = vmatpush.msra.mxu2 %v3275_v39  ;;  %v3342_v39 = vld [vmem:[%s8377_s6 + $0x330] sm:$0xff] }
 0x5dc   : > { %4152 = vrsqrt.f32 %v3073_v19  ;;  %vm3080_vm14 = vweird.f32 %v3073_v19 }
 0x5e2   : > { %v4153_v30 = vpop.eup %4152 }
 0x5e3   : > { %v3075_v62 = vmul.f32 %v4153_v30, %v3073_v19  ;;  %vm3081_vm13 = vweird.f32 %v4153_v30  ;;  %v3291_v19 = vld [vmem:[%s8377_s6 + $0x198] sm:$0xff] }
 0x5e4   : > { %vm3082_vm2 = vmor %vm3080_vm14, %vm3081_vm13  ;;  %3440 = vmatpush.msra.mxu3 %v3291_v19  ;;  %v3358_v19 = vld [vmem:[%s8377_s6 + $0x3b0] sm:$0xff] }
 0x5e5   : > { %v3076_v31 = vmul.f32 %v4153_v30, %v3075_v62  ;;  %v3258_v62 = vld [vmem:[%s8377_s6 + $0x90] sm:$0xff] }
 0x5e6   : > { %3401 = vmatpush.msra.mxu1 %v3258_v62 }
 0x5e7   : > { %v3077_v34 = vmul.f32 0.5, %v3076_v31  ;;  %v3274_v31 = vld [vmem:[%s8377_s6 + $0x110] sm:$0xff] }
 0x5e8   : > { %3421 = vmatpush.msra.mxu2 %v3274_v31  ;;  %v3309_v31 = vld [vmem:[%s8377_s6 + $0x228] sm:$0xff] }
 0x5e9   : > { %v3078_v24 = vsub.f32 1.5, %v3077_v34  ;;  %v3290_v34 = vld [vmem:[%s8377_s6 + $0x190] sm:$0xff] }
 0x5ea   : > { %3441 = vmatpush.msra.mxu3 %v3290_v34  ;;  %3422 = vmatpush.msra.mxu2 %v3273_v40  ;;  %v3325_v34 = vld [vmem:[%s8377_s6 + $0x2a8] sm:$0xff] }
 0x5eb   : > { %v3079_v38 = vmul.f32 %v4153_v30, %v3078_v24  ;;  %v3241_v24 = vld [vmem:[%s8377_s6 + $0x8] sm:$0xff] }
 0x5ec   : > { %3442 = vmatpush.msra.mxu3 %v3289_v59  ;;  %3423 = vmatpush.msra.mxu2 %v3272_v46  ;;  %v3324_v46 = vld [vmem:[%s8377_s6 + $0x2a0] sm:$0xff] }
 0x5ed   : > { %v7513_v7 = vsel %vm3082_vm2, %v4153_v30, %v3079_v38  ;;  %v3242_v30 = vld [vmem:[%s8377_s6 + $0x10] sm:$0xff]  ;;  %v3257_v38 = vld [vmem:[%s8377_s6 + $0x88] sm:$0xff] }
 0x5ee   : > { %3090 = vrot.lane.b32.xlu0 %v7513_v7, %s4167_s23  ;;  %3381 = vmatpush.msrb.mxu0 %v3242_v30 }
 0x5ef   : > { %3402 = vmatpush.msra.mxu1 %v3257_v38  ;;  %3443 = vmatpush.msra.mxu3 %v3288_v22 }
 0x5f0   : > { %3382 = vmatpush.msrb.mxu0 %v3241_v24  ;;  %3488 = vmatpush.msrb.mxu2 %v3351_v11  ;;  %v3341_v24 = vld [vmem:[%s8377_s6 + $0x328] sm:$0xff]  ;;  %v3340_v11 = vld [vmem:[%s8377_s6 + $0x320] sm:$0xff] }
 0x5f1   : > { %3403 = vmatpush.msra.mxu1 %v3256_v10  ;;  %3508 = vmatpush.msrb.mxu3 %v3367_v20  ;;  %v3308_v10 = vld [vmem:[%s8377_s6 + $0x220] sm:$0xff] }
 0x5f2   : > { %3383 = vmatpush.msrb.mxu0 %v3240_v27  ;;  %3489 = vmatpush.msrb.mxu2 %v3350_v50  ;;  %v3357_v27 = vld [vmem:[%s8377_s6 + $0x3a8] sm:$0xff] }
 0x5f3   : > { %3468 = vmatpush.msrb.mxu1 %v3335_v49  ;;  %3509 = vmatpush.msrb.mxu3 %v3366_v36 }
 0x5f4   : > { %3448 = vmatpush.msra.mxu0 %v3319_v12  ;;  %3490 = vmatpush.msrb.mxu2 %v3349_v52 }
 0x5f5   : > { %3469 = vmatpush.msrb.mxu1 %v3334_v14  ;;  %3510 = vmatpush.msrb.mxu3 %v3365_v51 }
 0x5f6   : > { %3449 = vmatpush.msra.mxu0 %v3318_v42  ;;  %3491 = vmatpush.msrb.mxu2 %v3348_v35  ;;  %v3307_v35 = vld [vmem:[%s8377_s6 + $0x218] sm:$0xff] }
 0x5f7   : > { %3470 = vmatpush.msrb.mxu1 %v3333_v15  ;;  %3511 = vmatpush.msrb.mxu3 %v3364_v43  ;;  %v3323_v43 = vld [vmem:[%s8377_s6 + $0x298] sm:$0xff] }
 0x5f8   : > { %3450 = vmatpush.msra.mxu0 %v3317_v45  ;;  %3492 = vmatpush.msrb.mxu2 %v3347_v37  ;;  %v3355_v37 = vld [vmem:[%s8377_s6 + $0x398] sm:$0xff] }
 0x5f9   : > { %3471 = vmatpush.msrb.mxu1 %v3332_v32  ;;  %3512 = vmatpush.msrb.mxu3 %v3363_v3  ;;  %v3356_v32 = vld [vmem:[%s8377_s6 + $0x3a0] sm:$0xff]  ;;  %v3306_v3 = vld [vmem:[%s8377_s6 + $0x210] sm:$0xff] }
 0x5fa   : > { %3451 = vmatpush.msra.mxu0 %v3316_v28  ;;  %3493 = vmatpush.msrb.mxu2 %v3346_v58  ;;  %v3338_v58 = vld [vmem:[%s8377_s6 + $0x310] sm:$0xff] }
 0x5fb   : > { %3472 = vmatpush.msrb.mxu1 %v3331_v55  ;;  %3513 = vmatpush.msrb.mxu3 %v3362_v60  ;;  %v3339_v55 = vld [vmem:[%s8377_s6 + $0x318] sm:$0xff]  ;;  %v3354_v60 = vld [vmem:[%s8377_s6 + $0x390] sm:$0xff] }
 0x5fc   : > { %3452 = vmatpush.msra.mxu0 %v3315_v26  ;;  %3494 = vmatpush.msrb.mxu2 %v3345_v0 }
 0x5fd   : > { %3473 = vmatpush.msrb.mxu1 %v3330_v5  ;;  %v3322_v5 = vld [vmem:[%s8377_s6 + $0x290] sm:$0xff] }
 0x5fe   : > { %3453 = vmatpush.msra.mxu0 %v3314_v56  ;;  %3495 = vmatpush.msrb.mxu2 %v3344_v25  ;;  %v3352_v25 = vld [vmem:[%s8377_s6 + $0x380] sm:$0xff] }
 0x5ff   : > { %3474 = vmatpush.msrb.mxu1 %v3329_v6 }
 0x600   : > { %3454 = vmatpush.msra.mxu0 %v3313_v18  ;;  %v3337_v18 = vld [vmem:[%s8377_s6 + $0x308] sm:$0xff] }
 0x601   : > { %3475 = vmatpush.msrb.mxu1 %v3328_v48  ;;  %v3336_v48 = vld [vmem:[%s8377_s6 + $0x300] sm:$0xff] }
 0x602   : > { %3455 = vmatpush.msra.mxu0 %v3312_v41  ;;  %v3320_v41 = vld [vmem:[%s8377_s6 + $0x280] sm:$0xff] }
 0x604   : > { %3456 = vmatpush.msra.mxu0 %v3311_v33 }
 0x606   : > { %3457 = vmatpush.msra.mxu0 %v3310_v63 }
 0x608   : > { %3458 = vmatpush.msra.mxu0 %v3309_v31 }
 0x60a   : > { %3459 = vmatpush.msra.mxu0 %v3308_v10 }
 0x60c   : > { %3460 = vmatpush.msra.mxu0 %v3307_v35  ;;  %v4051_v35 = vld [vmem:[%s8377_s6 + $0x5d8] sm:$0xff] }
 0x60e   : > { %3461 = vmatpush.msra.mxu0 %v3306_v3  ;;  %v4001_v3 = vld [vmem:[%s8377_s6 + $0x448] sm:$0xff] }
 0x62e   : > { %v3086_v9 = vpop.permute.xlu2 %3085 }
 0x62f   : > { %v3088_v29 = vsel %vm355_vm1, %v7506_v23, %v3086_v9  ;;  %v3361_v23 = vld [vmem:[%s8377_s6 + $0x3c8] sm:$0xff] }
 0x630   : > { %v7783_v1 = vperm.slane %v3088_v29, 0  ;;  %3514 = vmatpush.msrb.mxu3 %v3361_v23  ;;  %v3305_v29 = vld [vmem:[%s8377_s6 + $0x208] sm:$0xff]  ;;  %v3304_v23 = vld [vmem:[%s8377_s6 + $0x200] sm:$0xff] }
 0x631   : > { %3462 = vmatpush.msra.mxu0 %v3305_v29  ;;  %v4032_v29 = vld [vmem:[%s8377_s6 + $0x540] sm:$0xff] }
 0x632   : > { %v3095_v4 = vsub.f32 %v7481_v17, %v7783_v1  ;;  %3515 = vmatpush.msrb.mxu3 %v3360_v16  ;;  %v3327_v17 = vld [vmem:[%s8377_s6 + $0x2b8] sm:$0xff]  ;;  %v3097_v38 = vsub.f32 %v7483_v61, %v7783_v1  ;;  %v3098_v61 = vsub.f32 %v7495_v53, %v7783_v1 }
 0x633   : > { %3476 = vmatpush.msrb.mxu1 %v3327_v17  ;;  %3463 = vmatpush.msra.mxu0 %v3304_v23  ;;  %v3998_v23 = vld [vmem:[%s8377_s6 + $0x430] sm:$0xff] }
 0x634   : > { %3516 = vmatpush.msrb.mxu3 %v3359_v13 }
 0x635   : > { %3477 = vmatpush.msrb.mxu1 %v3326_v2 }
 0x636   : > { %3517 = vmatpush.msrb.mxu3 %v3358_v19 }
 0x637   : > { %3478 = vmatpush.msrb.mxu1 %v3325_v34  ;;  %v4007_v34 = vld [vmem:[%s8377_s6 + $0x478] sm:$0xff] }
 0x638   : > { %3518 = vmatpush.msrb.mxu3 %v3357_v27 }
 0x639   : > { %3479 = vmatpush.msrb.mxu1 %v3324_v46  ;;  %v4039_v46 = vld [vmem:[%s8377_s6 + $0x578] sm:$0xff] }
 0x63a   : > { %3519 = vmatpush.msrb.mxu3 %v3356_v32  ;;  %v4035_v32 = vld [vmem:[%s8377_s6 + $0x558] sm:$0xff] }
 0x63b   : > { %3480 = vmatpush.msrb.mxu1 %v3323_v43  ;;  %v4002_v43 = vld [vmem:[%s8377_s6 + $0x450] sm:$0xff] }
 0x63c   : > { %3520 = vmatpush.msrb.mxu3 %v3355_v37  ;;  %v4050_v37 = vld [vmem:[%s8377_s6 + $0x5d0] sm:$0xff] }
 0x63d   : > { %3481 = vmatpush.msrb.mxu1 %v3322_v5  ;;  %v4033_v5 = vld [vmem:[%s8377_s6 + $0x548] sm:$0xff] }
 0x63e   : > { %3521 = vmatpush.msrb.mxu3 %v3354_v60  ;;  %v4000_v60 = vld [vmem:[%s8377_s6 + $0x440] sm:$0xff] }
 0x660   : > { %v3091_v8 = vpop.permute.xlu0 %3090 }
 0x661   : > { %v3093_v47 = vsel %vm355_vm1, %v7513_v7, %v3091_v8  ;;  %v3096_v7 = vsub.f32 %v7493_v44, %v7783_v1  ;;  %v3343_v44 = vld [vmem:[%s8377_s6 + $0x338] sm:$0xff]  ;;  %v3321_v1 = vld [vmem:[%s8377_s6 + $0x288] sm:$0xff] }
 0x662   : > { %v3099_v54 = vperm.slane %v3093_v47, 0  ;;  %3496 = vmatpush.msrb.mxu2 %v3343_v44  ;;  %v3353_v8 = vld [vmem:[%s8377_s6 + $0x388] sm:$0xff]  ;;  %3482 = vmatpush.msrb.mxu1 %v3321_v1  ;;  %v4048_v1 = vld [vmem:[%s8377_s6 + $0x5c0] sm:$0xff] }
 0x663   : > { %3522 = vmatpush.msrb.mxu3 %v3353_v8  ;;  %v4047_v8 = vld [vmem:[%s8377_s6 + $0x5b8] sm:$0xff] }
 0x664   : > { %v3100_v57 = vmul.f32 %v3099_v54, %v3095_v4  ;;  %v3101_v21 = vmul.f32 %v3099_v54, %v3096_v7  ;;  %3497 = vmatpush.msrb.mxu2 %v3342_v39  ;;  %v3102_v20 = vmul.f32 %v3099_v54, %v3097_v38  ;;  %v3103_v53 = vmul.f32 %v3099_v54, %v3098_v61  ;;  %v4022_v61 = vld [vmem:[%s8377_s6 + $0x4f0] sm:$0xff] }
 0x665   : > { %3483 = vmatpush.msrb.mxu1 %v3320_v41  ;;  %3523 = vmatpush.msrb.mxu3 %v3352_v25  ;;  %v4030_v41 = vld [vmem:[%s8377_s6 + $0x530] sm:$0xff]  ;;  %v3997_v25 = vld [vmem:[%s8377_s6 + $0x428] sm:$0xff] }
 0x666   : > { %vm3104_vm1 = vcmp.ge.f32.partialorder %v3100_v57, 0.0  ;;  %vm3105_vm5 = vcmp.ge.f32.partialorder %v3101_v21, 0.0  ;;  %v3108_v30 = vmul.f32 0.05, %v3100_v57  ;;  %v3109_v62 = vmul.f32 0.05, %v3101_v21  ;;  %3498 = vmatpush.msrb.mxu2 %v3341_v24 }
 0x667   : > { %vm3106_vm6 = vcmp.ge.f32.partialorder %v3102_v20, 0.0  ;;  %v3110_v45 = vmul.f32 0.05, %v3102_v20  ;;  %vm3107_vm7 = vcmp.ge.f32.partialorder %v3103_v53, 0.0  ;;  %v3111_v52 = vmul.f32 0.05, %v3103_v53 }
 0x668   : > { %v7850_v40 = vsel %vm3104_vm1, %v3100_v57, %v3108_v30  ;;  %v7852_v59 = vsel %vm3105_vm5, %v3101_v21, %v3109_v62  ;;  %3499 = vmatpush.msrb.mxu2 %v3340_v11  ;;  %v4055_v11 = vld [vmem:[%s8377_s6 + $0x5f8] sm:$0xff]  ;;  %v4042_v62 = vld [vmem:[%s8377_s6 + $0x590] sm:$0xff] }
 0x669   : > { %3116 = vst [vmem:[#allocation2] sm:$0x1] %v7850_v40  ;;  %v3119_v22 = vrot.slane %v7850_v40, 1  ;;  %v3123_v12 = vrot.slane %v7852_v59, 1  ;;  %v3126_v49 = vrot.slane %v7850_v40, 2  ;;  %v3129_v42 = vrot.slane %v7852_v59, 2 }
 0x66a   : > { %3117 = vst [vmem:[#allocation2 + $0x1] sm:$0x1] %v7852_v59  ;;  %v3132_v14 = vrot.slane %v7850_v40, 3  ;;  %v3135_v50 = vrot.slane %v7852_v59, 3  ;;  %v3138_v36 = vrot.slane %v7850_v40, 4  ;;  %v3141_v15 = vrot.slane %v7852_v59, 4  ;;  %3500 = vmatpush.msrb.mxu2 %v3339_v55 }
 0x66b   : > { %3121 = vst [vmem:[#allocation2 + $0x8] sm:$0x1] %v3119_v22  ;;  %v3144_v51 = vrot.slane %v7850_v40, 5  ;;  %v3147_v28 = vrot.slane %v7852_v59, 5  ;;  %v3150_v26 = vrot.slane %v7850_v40, 6  ;;  %v3153_v56 = vrot.slane %v7852_v59, 6 }
 0x66c   : > { %3125 = vst [vmem:[#allocation2 + $0x9] sm:$0x1] %v3123_v12  ;;  %v3156_v9 = vrot.slane %v7850_v40, 7  ;;  %v3114_v6 = vsel %vm3106_vm6, %v3102_v20, %v3110_v45  ;;  %v3159_v0 = vrot.slane %v7852_v59, 7  ;;  %3501 = vmatpush.msrb.mxu2 %v3338_v58  ;;  %v3115_v47 = vsel %vm3107_vm7, %v3103_v53, %v3111_v52  ;;  %v4023_v40 = vld [vmem:[%s8377_s6 + $0x4f8] sm:$0xff]  ;;  %v4006_v59 = vld [vmem:[%s8377_s6 + $0x470] sm:$0xff] }
 0x66d   : > { %3128 = vst [vmem:[#allocation2 + $0x10] sm:$0x1] %v3126_v49  ;;  %v3165_v4 = vrot.slane %v3114_v6, 1  ;;  %v3169_v7 = vrot.slane %v3115_v47, 1  ;;  %v3172_v54 = vrot.slane %v3114_v6, 2  ;;  %v3175_v16 = vrot.slane %v3115_v47, 2 }
 0x66e   : > { %3131 = vst [vmem:[#allocation2 + $0x11] sm:$0x1] %v3129_v42  ;;  %3502 = vmatpush.msrb.mxu2 %v3337_v18  ;;  %v3178_v33 = vrot.slane %v3114_v6, 3  ;;  %v3181_v17 = vrot.slane %v3115_v47, 3  ;;  %v3184_v44 = vrot.slane %v3114_v6, 4  ;;  %v3187_v57 = vrot.slane %v3115_v47, 4 }
 0x66f   : > { %3134 = vst [vmem:[#allocation2 + $0x18] sm:$0x1] %v3132_v14  ;;  %v3190_v21 = vrot.slane %v3114_v6, 5  ;;  %v3193_v13 = vrot.slane %v3115_v47, 5  ;;  %v3196_v63 = vrot.slane %v3114_v6, 6  ;;  %v3199_v2 = vrot.slane %v3115_v47, 6 }
 0x670   : > { %3137 = vst [vmem:[#allocation2 + $0x19] sm:$0x1] %v3135_v50  ;;  %3503 = vmatpush.msrb.mxu2 %v3336_v48  ;;  %v3202_v39 = vrot.slane %v3114_v6, 7  ;;  %v3205_v19 = vrot.slane %v3115_v47, 7  ;;  %v4005_v12 = vld [vmem:[%s8377_s6 + $0x468] sm:$0xff]  ;;  %v4038_v20 = vld [vmem:[%s8377_s6 + $0x570] sm:$0xff] }
 0x671   : > { %3140 = vst [vmem:[#allocation2 + $0x2] sm:$0x1] %v3138_v36  ;;  %v4021_v42 = vld [vmem:[%s8377_s6 + $0x4e8] sm:$0xff]  ;;  %v4004_v53 = vld [vmem:[%s8377_s6 + $0x460] sm:$0xff]  ;;  %v4054_v14 = vld [vmem:[%s8377_s6 + $0x5f0] sm:$0xff] }
 0x672   : > { %3143 = vst [vmem:[#allocation2 + $0x3] sm:$0x1] %v3141_v15  ;;  %v4037_v50 = vld [vmem:[%s8377_s6 + $0x568] sm:$0xff]  ;;  %v4020_v36 = vld [vmem:[%s8377_s6 + $0x4e0] sm:$0xff]  ;;  %v4034_v55 = vld [vmem:[%s8377_s6 + $0x550] sm:$0xff] }
 0x673   : > { %3146 = vst [vmem:[#allocation2 + $0xa] sm:$0x1] %v3144_v51  ;;  %v4053_v45 = vld [vmem:[%s8377_s6 + $0x5e8] sm:$0xff]  ;;  %v4036_v15 = vld [vmem:[%s8377_s6 + $0x560] sm:$0xff]  ;;  %v4003_v51 = vld [vmem:[%s8377_s6 + $0x458] sm:$0xff] }
 0x674   : > { %3149 = vst [vmem:[#allocation2 + $0xb] sm:$0x1] %v3147_v28  ;;  %v4052_v52 = vld [vmem:[%s8377_s6 + $0x5e0] sm:$0xff]  ;;  %v4019_v28 = vld [vmem:[%s8377_s6 + $0x4d8] sm:$0xff]  ;;  %v4049_v58 = vld [vmem:[%s8377_s6 + $0x5c8] sm:$0xff] }
 0x675   : > { %3152 = vst [vmem:[#allocation2 + $0x12] sm:$0x1] %v3150_v26  ;;  %v4018_v26 = vld [vmem:[%s8377_s6 + $0x4d0] sm:$0xff]  ;;  %v3999_v18 = vld [vmem:[%s8377_s6 + $0x438] sm:$0xff] }
 0x676   : > { %3155 = vst [vmem:[#allocation2 + $0x13] sm:$0x1] %v3153_v56  ;;  %v4017_v56 = vld [vmem:[%s8377_s6 + $0x4c8] sm:$0xff]  ;;  %v4046_v48 = vld [vmem:[%s8377_s6 + $0x5b0] sm:$0xff] }
 0x677   : > { %3158 = vst [vmem:[#allocation2 + $0x1a] sm:$0x1] %v3156_v9  ;;  %v4016_v9 = vld [vmem:[%s8377_s6 + $0x4c0] sm:$0xff] }
 0x678   : > { %3161 = vst [vmem:[#allocation2 + $0x1b] sm:$0x1] %v3159_v0  ;;  %v4031_v0 = vld [vmem:[%s8377_s6 + $0x538] sm:$0xff] }
 0x679   : > { %3162 = vst [vmem:[#allocation2 + $0x4] sm:$0x1] %v3114_v6  ;;  %v4015_v6 = vld [vmem:[%s8377_s6 + $0x4b8] sm:$0xff] }
 0x67a   : > { %3163 = vst [vmem:[#allocation2 + $0x5] sm:$0x1] %v3115_v47  ;;  %v4014_v47 = vld [vmem:[%s8377_s6 + $0x4b0] sm:$0xff] }
 0x67b   : > { %3167 = vst [vmem:[#allocation2 + $0xc] sm:$0x1] %v3165_v4  ;;  %v4013_v4 = vld [vmem:[%s8377_s6 + $0x4a8] sm:$0xff] }
 0x67c   : > { %3171 = vst [vmem:[#allocation2 + $0xd] sm:$0x1] %v3169_v7  ;;  %v4029_v7 = vld [vmem:[%s8377_s6 + $0x528] sm:$0xff] }
 0x67d   : > { %3174 = vst [vmem:[#allocation2 + $0x14] sm:$0x1] %v3172_v54  ;;  %v4045_v54 = vld [vmem:[%s8377_s6 + $0x5a8] sm:$0xff] }
 0x67e   : > { %3177 = vst [vmem:[#allocation2 + $0x15] sm:$0x1] %v3175_v16  ;;  %v3996_v16 = vld [vmem:[%s8377_s6 + $0x420] sm:$0xff] }
 0x67f   : > { %3180 = vst [vmem:[#allocation2 + $0x1c] sm:$0x1] %v3178_v33  ;;  %v4012_v33 = vld [vmem:[%s8377_s6 + $0x4a0] sm:$0xff] }
 0x680   : > { %3183 = vst [vmem:[#allocation2 + $0x1d] sm:$0x1] %v3181_v17  ;;  %v4028_v17 = vld [vmem:[%s8377_s6 + $0x520] sm:$0xff] }
 0x681   : > { %3186 = vst [vmem:[#allocation2 + $0x6] sm:$0x1] %v3184_v44  ;;  %v4044_v44 = vld [vmem:[%s8377_s6 + $0x5a0] sm:$0xff] }
 0x682   : > { %3189 = vst [vmem:[#allocation2 + $0x7] sm:$0x1] %v3187_v57  ;;  %v3995_v57 = vld [vmem:[%s8377_s6 + $0x418] sm:$0xff] }
 0x683   : > { %3192 = vst [vmem:[#allocation2 + $0xe] sm:$0x1] %v3190_v21  ;;  %v4011_v21 = vld [vmem:[%s8377_s6 + $0x498] sm:$0xff] }
 0x684   : > { %3195 = vst [vmem:[#allocation2 + $0xf] sm:$0x1] %v3193_v13  ;;  %v4027_v13 = vld [vmem:[%s8377_s6 + $0x518] sm:$0xff] }
 0x685   : > { %3198 = vst [vmem:[#allocation2 + $0x16] sm:$0x1] %v3196_v63  ;;  %v4043_v63 = vld [vmem:[%s8377_s6 + $0x598] sm:$0xff] }
 0x686   : > { %3201 = vst [vmem:[#allocation2 + $0x17] sm:$0x1] %v3199_v2  ;;  %v3994_v2 = vld [vmem:[%s8377_s6 + $0x410] sm:$0xff] }
 0x687   : > { %3204 = vst [vmem:[#allocation2 + $0x1e] sm:$0x1] %v3202_v39  ;;  %v4010_v39 = vld [vmem:[%s8377_s6 + $0x490] sm:$0xff] }
 0x688   : > { %3207 = vst [vmem:[#allocation2 + $0x1f] sm:$0x1] %v3205_v19  ;;  %v4026_v19 = vld [vmem:[%s8377_s6 + $0x510] sm:$0xff] }
 0x689   : > { %v7937_v30 = vld [vmem:[#allocation2] sm:$0xff] }
 0x68a   : > { %v3216_v31 = vrot.slane %v7937_v30, 7 }
 0x68b   : > { %v7948_v24 = vld [vmem:[#allocation2 + $0x8] sm:$0xff] }
 0x68c   : > { %3985 = vmatmul.msk.f32.vlgmr.msrb.gmra.mxu0 %vm7940_vm8, %v3216_v31  ;;  %v3217_v38 = vrot.slane %v7948_v24, 7  ;;  %v3993_v31 = vld [vmem:[%s8377_s6 + $0x408] sm:$0xff] }
 0x68d   : > { %v7959_v27 = vld [vmem:[#allocation2 + $0x10] sm:$0xff]  ;;  %3658 = vmatpush.msrb.mxu0 %v4007_v34  ;;  %v4009_v34 = vld [vmem:[%s8377_s6 + $0x488] sm:$0xff] }
 0x68e   : > { %3987 = vmatmul.msk.f32.vlgmr.msra.gmra.mxu1 %vm7940_vm8, %v3217_v38  ;;  %v3218_v10 = vrot.slane %v7959_v27, 7  ;;  %v4025_v38 = vld [vmem:[%s8377_s6 + $0x508] sm:$0xff] }
 0x68f   : > { %v7970_v22 = vld [vmem:[#allocation2 + $0x18] sm:$0xff]  ;;  %3678 = vmatpush.msra.mxu1 %v4023_v40  ;;  %3659 = vmatpush.msrb.mxu0 %v4006_v59  ;;  %v4041_v40 = vld [vmem:[%s8377_s6 + $0x588] sm:$0xff]  ;;  %v3992_v59 = vld [vmem:[%s8377_s6 + $0x400] sm:$0xff] }
 0x690   : > { %3989 = vmatmul.msk.f32.vlgmr.msra.gmra.mxu2 %vm7940_vm8, %v3218_v10  ;;  %v3219_v49 = vrot.slane %v7970_v22, 7  ;;  %v4008_v10 = vld [vmem:[%s8377_s6 + $0x480] sm:$0xff] }
 0x691   : > { %3698 = vmatpush.msra.mxu2 %v4039_v46  ;;  %3679 = vmatpush.msra.mxu1 %v4022_v61  ;;  %v4024_v46 = vld [vmem:[%s8377_s6 + $0x500] sm:$0xff] }
 0x692   : > { %3991 = vmatmul.msk.f32.vlgmr.msra.gmra.mxu3 %vm7940_vm8, %v3219_v49  ;;  %3660 = vmatpush.msrb.mxu0 %v4005_v12  ;;  %v4040_v61 = vld [vmem:[%s8377_s6 + $0x580] sm:$0xff]  ;;  %v4071_v12 = vld [vmem:[%s8377_s6 + $0x678] sm:$0xff] }
 0x693   : > { %3718 = vmatpush.msra.mxu3 %v4055_v11  ;;  %3699 = vmatpush.msra.mxu2 %v4038_v20  ;;  %v4087_v49 = vld [vmem:[%s8377_s6 + $0x6f8] sm:$0xff] }
 0x694   : > { %3680 = vmatpush.msra.mxu1 %v4021_v42  ;;  %3661 = vmatpush.msrb.mxu0 %v4004_v53  ;;  %v4103_v11 = vld [vmem:[%s8377_s6 + $0x778] sm:$0xff]  ;;  %v4070_v42 = vld [vmem:[%s8377_s6 + $0x670] sm:$0xff] }
 0x695   : > { %3719 = vmatpush.msra.mxu3 %v4054_v14  ;;  %3700 = vmatpush.msra.mxu2 %v4037_v50  ;;  %v4119_v20 = vld [vmem:[%s8377_s6 + $0x7f8] sm:$0xff]  ;;  %v4086_v53 = vld [vmem:[%s8377_s6 + $0x6f0] sm:$0xff] }
 0x696   : > { %3681 = vmatpush.msra.mxu1 %v4020_v36  ;;  %3464 = vmatmul.f32.vlgmr.msra.gmra.mxu0 %v7937_v30  ;;  %v4102_v14 = vld [vmem:[%s8377_s6 + $0x770] sm:$0xff]  ;;  %v4069_v36 = vld [vmem:[%s8377_s6 + $0x668] sm:$0xff] }
 0x697   : > { %3720 = vmatpush.msra.mxu3 %v4053_v45  ;;  %3701 = vmatpush.msra.mxu2 %v4036_v15  ;;  %v4118_v50 = vld [vmem:[%s8377_s6 + $0x7f0] sm:$0xff]  ;;  %v4085_v45 = vld [vmem:[%s8377_s6 + $0x6e8] sm:$0xff] }
 0x698   : > { %3484 = vmatmul.f32.vlgmr.msrb.gmra.mxu1 %v7948_v24  ;;  %3504 = vmatmul.f32.vlgmr.msrb.gmra.mxu2 %v7959_v27  ;;  %v4101_v15 = vld [vmem:[%s8377_s6 + $0x768] sm:$0xff] }
 0x699   : > { %3721 = vmatpush.msra.mxu3 %v4052_v52  ;;  %3662 = vmatpush.msrb.mxu0 %v4003_v51  ;;  %v4117_v52 = vld [vmem:[%s8377_s6 + $0x7e8] sm:$0xff]  ;;  %v4068_v51 = vld [vmem:[%s8377_s6 + $0x660] sm:$0xff] }
 0x69a   : > { %3524 = vmatmul.f32.vlgmr.msrb.gmra.mxu3 %v7970_v22  ;;  %3682 = vmatpush.msra.mxu1 %v4019_v28  ;;  %v4084_v28 = vld [vmem:[%s8377_s6 + $0x6e0] sm:$0xff] }
 0x69b   : > { %3702 = vmatpush.msra.mxu2 %v4035_v32  ;;  %3722 = vmatpush.msra.mxu3 %v4051_v35  ;;  %v4100_v32 = vld [vmem:[%s8377_s6 + $0x760] sm:$0xff] }
 0x69c   : > { %3663 = vmatpush.msrb.mxu0 %v4002_v43  ;;  %3683 = vmatpush.msra.mxu1 %v4018_v26  ;;  %v4116_v35 = vld [vmem:[%s8377_s6 + $0x7e0] sm:$0xff]  ;;  %v4067_v43 = vld [vmem:[%s8377_s6 + $0x658] sm:$0xff] }
 0x69d   : > { %3703 = vmatpush.msra.mxu2 %v4034_v55  ;;  %3723 = vmatpush.msra.mxu3 %v4050_v37  ;;  %v4083_v26 = vld [vmem:[%s8377_s6 + $0x6d8] sm:$0xff] }
 0x69e   : > { %3664 = vmatpush.msrb.mxu0 %v4001_v3  ;;  %3684 = vmatpush.msra.mxu1 %v4017_v56  ;;  %v4099_v55 = vld [vmem:[%s8377_s6 + $0x758] sm:$0xff]  ;;  %v4066_v3 = vld [vmem:[%s8377_s6 + $0x650] sm:$0xff] }
 0x69f   : > { %3704 = vmatpush.msra.mxu2 %v4033_v5  ;;  %3724 = vmatpush.msra.mxu3 %v4049_v58  ;;  %v4115_v37 = vld [vmem:[%s8377_s6 + $0x7d8] sm:$0xff]  ;;  %v4082_v56 = vld [vmem:[%s8377_s6 + $0x6d0] sm:$0xff] }
 0x6a0   : > { %3665 = vmatpush.msrb.mxu0 %v4000_v60  ;;  %3685 = vmatpush.msra.mxu1 %v4016_v9  ;;  %v4098_v5 = vld [vmem:[%s8377_s6 + $0x750] sm:$0xff]  ;;  %v4065_v60 = vld [vmem:[%s8377_s6 + $0x648] sm:$0xff] }
 0x6a1   : > { %3705 = vmatpush.msra.mxu2 %v4032_v29  ;;  %3725 = vmatpush.msra.mxu3 %v4048_v1  ;;  %v4114_v58 = vld [vmem:[%s8377_s6 + $0x7d0] sm:$0xff]  ;;  %v4081_v9 = vld [vmem:[%s8377_s6 + $0x6c8] sm:$0xff] }
 0x6a2   : > { %3666 = vmatpush.msrb.mxu0 %v3999_v18  ;;  %3686 = vmatpush.msra.mxu1 %v4015_v6  ;;  %v4097_v29 = vld [vmem:[%s8377_s6 + $0x748] sm:$0xff]  ;;  %v4064_v18 = vld [vmem:[%s8377_s6 + $0x640] sm:$0xff] }
 0x6a3   : > { %3706 = vmatpush.msra.mxu2 %v4031_v0  ;;  %3726 = vmatpush.msra.mxu3 %v4047_v8  ;;  %v4113_v1 = vld [vmem:[%s8377_s6 + $0x7c8] sm:$0xff]  ;;  %v4080_v6 = vld [vmem:[%s8377_s6 + $0x6c0] sm:$0xff] }
 0x6a4   : > { %3667 = vmatpush.msrb.mxu0 %v3998_v23  ;;  %3687 = vmatpush.msra.mxu1 %v4014_v47  ;;  %v4096_v0 = vld [vmem:[%s8377_s6 + $0x740] sm:$0xff]  ;;  %v4063_v23 = vld [vmem:[%s8377_s6 + $0x638] sm:$0xff] }
 0x6a5   : > { %3707 = vmatpush.msra.mxu2 %v4030_v41  ;;  %3727 = vmatpush.msra.mxu3 %v4046_v48  ;;  %v4112_v8 = vld [vmem:[%s8377_s6 + $0x7c0] sm:$0xff]  ;;  %v4079_v47 = vld [vmem:[%s8377_s6 + $0x6b8] sm:$0xff] }
 0x6a6   : > { %3668 = vmatpush.msrb.mxu0 %v3997_v25  ;;  %3688 = vmatpush.msra.mxu1 %v4013_v4  ;;  %v4095_v41 = vld [vmem:[%s8377_s6 + $0x738] sm:$0xff]  ;;  %v4062_v25 = vld [vmem:[%s8377_s6 + $0x630] sm:$0xff] }
 0x6a7   : > { %3708 = vmatpush.msra.mxu2 %v4029_v7  ;;  %3728 = vmatpush.msra.mxu3 %v4045_v54  ;;  %v4111_v48 = vld [vmem:[%s8377_s6 + $0x7b8] sm:$0xff]  ;;  %v4078_v4 = vld [vmem:[%s8377_s6 + $0x6b0] sm:$0xff] }
 0x6a8   : > { %3669 = vmatpush.msrb.mxu0 %v3996_v16  ;;  %3689 = vmatpush.msra.mxu1 %v4012_v33  ;;  %v4094_v7 = vld [vmem:[%s8377_s6 + $0x730] sm:$0xff]  ;;  %v4061_v16 = vld [vmem:[%s8377_s6 + $0x628] sm:$0xff] }
 0x6a9   : > { %3709 = vmatpush.msra.mxu2 %v4028_v17  ;;  %3729 = vmatpush.msra.mxu3 %v4044_v44  ;;  %v4110_v54 = vld [vmem:[%s8377_s6 + $0x7b0] sm:$0xff]  ;;  %v4077_v33 = vld [vmem:[%s8377_s6 + $0x6a8] sm:$0xff] }
 0x6aa   : > { %3670 = vmatpush.msrb.mxu0 %v3995_v57  ;;  %3690 = vmatpush.msra.mxu1 %v4011_v21  ;;  %v4093_v17 = vld [vmem:[%s8377_s6 + $0x728] sm:$0xff]  ;;  %v4060_v57 = vld [vmem:[%s8377_s6 + $0x620] sm:$0xff] }
 0x6ab   : > { %3710 = vmatpush.msra.mxu2 %v4027_v13  ;;  %3730 = vmatpush.msra.mxu3 %v4043_v63  ;;  %v4109_v44 = vld [vmem:[%s8377_s6 + $0x7a8] sm:$0xff]  ;;  %v4076_v21 = vld [vmem:[%s8377_s6 + $0x6a0] sm:$0xff] }
 0x6ac   : > { %3671 = vmatpush.msrb.mxu0 %v3994_v2  ;;  %3691 = vmatpush.msra.mxu1 %v4010_v39  ;;  %v4092_v13 = vld [vmem:[%s8377_s6 + $0x720] sm:$0xff]  ;;  %v4059_v2 = vld [vmem:[%s8377_s6 + $0x618] sm:$0xff] }
 0x6ad   : > { %3711 = vmatpush.msra.mxu2 %v4026_v19  ;;  %3731 = vmatpush.msra.mxu3 %v4042_v62  ;;  %v4108_v63 = vld [vmem:[%s8377_s6 + $0x7a0] sm:$0xff]  ;;  %v4075_v39 = vld [vmem:[%s8377_s6 + $0x698] sm:$0xff] }
 0x6ae   : > { %3672 = vmatpush.msrb.mxu0 %v3993_v31  ;;  %3692 = vmatpush.msra.mxu1 %v4009_v34  ;;  %v4091_v19 = vld [vmem:[%s8377_s6 + $0x718] sm:$0xff]  ;;  %v4058_v31 = vld [vmem:[%s8377_s6 + $0x610] sm:$0xff] }
 0x6af   : > { %3712 = vmatpush.msra.mxu2 %v4025_v38  ;;  %3732 = vmatpush.msra.mxu3 %v4041_v40  ;;  %v4107_v62 = vld [vmem:[%s8377_s6 + $0x798] sm:$0xff]  ;;  %v4074_v34 = vld [vmem:[%s8377_s6 + $0x690] sm:$0xff] }
 0x6b0   : > { %3673 = vmatpush.msrb.mxu0 %v3992_v59  ;;  %3693 = vmatpush.msra.mxu1 %v4008_v10  ;;  %v4090_v38 = vld [vmem:[%s8377_s6 + $0x710] sm:$0xff]  ;;  %v4057_v59 = vld [vmem:[%s8377_s6 + $0x608] sm:$0xff] }
 0x6b1   : > { %3713 = vmatpush.msra.mxu2 %v4024_v46  ;;  %3733 = vmatpush.msra.mxu3 %v4040_v61  ;;  %v4106_v40 = vld [vmem:[%s8377_s6 + $0x790] sm:$0xff]  ;;  %v4073_v10 = vld [vmem:[%s8377_s6 + $0x688] sm:$0xff] }
 0x6b2   : > { %3674 = vmatmul.f32.vlgmr.msrb.gmra.mxu0 %v7937_v30  ;;  %3694 = vmatmul.f32.vlgmr.msra.gmra.mxu1 %v7948_v24  ;;  %v4089_v46 = vld [vmem:[%s8377_s6 + $0x708] sm:$0xff] }
 0x6b3   : > { %3714 = vmatmul.f32.vlgmr.msra.gmra.mxu2 %v7959_v27  ;;  %3734 = vmatmul.f32.vlgmr.msra.gmra.mxu3 %v7970_v22  ;;  %v4105_v61 = vld [vmem:[%s8377_s6 + $0x788] sm:$0xff] }
 0x6b4   : > { %3738 = vmatpush.msra.mxu0 %v4071_v12  ;;  %3758 = vmatpush.msrb.mxu1 %v4087_v49  ;;  %v4056_v12 = vld [vmem:[%s8377_s6 + $0x600] sm:$0xff] }
 0x6b5   : > { %3778 = vmatpush.msrb.mxu2 %v4103_v11  ;;  %3798 = vmatpush.msrb.mxu3 %v4119_v20  ;;  %v4072_v49 = vld [vmem:[%s8377_s6 + $0x680] sm:$0xff] }
 0x6b6   : > { %3739 = vmatpush.msra.mxu0 %v4070_v42  ;;  %3759 = vmatpush.msrb.mxu1 %v4086_v53  ;;  %v4088_v11 = vld [vmem:[%s8377_s6 + $0x700] sm:$0xff]  ;;  %v3228_v42 = vrot.slane %v7937_v30, 1  ;;  %v3229_v53 = vrot.slane %v7948_v24, 1 }
 0x6b7   : > { %3779 = vmatpush.msrb.mxu2 %v4102_v14  ;;  %3799 = vmatpush.msrb.mxu3 %v4118_v50  ;;  %v4104_v20 = vld [vmem:[%s8377_s6 + $0x780] sm:$0xff]  ;;  %v3230_v14 = vrot.slane %v7959_v27, 1  ;;  %v3231_v50 = vrot.slane %v7970_v22, 1 }
 0x6b8   : > { %3740 = vmatpush.msra.mxu0 %v4069_v36  ;;  %3760 = vmatpush.msrb.mxu1 %v4085_v45 }
 0x6b9   : > { %3780 = vmatpush.msrb.mxu2 %v4101_v15  ;;  %3800 = vmatpush.msrb.mxu3 %v4117_v52 }
 0x6ba   : > { %3741 = vmatpush.msra.mxu0 %v4068_v51  ;;  %3761 = vmatpush.msrb.mxu1 %v4084_v28 }
 0x6bb   : > { %3781 = vmatpush.msrb.mxu2 %v4100_v32  ;;  %3801 = vmatpush.msrb.mxu3 %v4116_v35 }
 0x6bc   : > { %3742 = vmatpush.msra.mxu0 %v4067_v43  ;;  %3762 = vmatpush.msrb.mxu1 %v4083_v26 }
 0x6bd   : > { %3782 = vmatpush.msrb.mxu2 %v4099_v55  ;;  %3802 = vmatpush.msrb.mxu3 %v4115_v37 }
 0x6be   : > { %3743 = vmatpush.msra.mxu0 %v4066_v3  ;;  %3763 = vmatpush.msrb.mxu1 %v4082_v56 }
 0x6bf   : > { %3783 = vmatpush.msrb.mxu2 %v4098_v5  ;;  %3803 = vmatpush.msrb.mxu3 %v4114_v58 }
 0x6c0   : > { %3744 = vmatpush.msra.mxu0 %v4065_v60  ;;  %3764 = vmatpush.msrb.mxu1 %v4081_v9 }
 0x6c1   : > { %3784 = vmatpush.msrb.mxu2 %v4097_v29  ;;  %3804 = vmatpush.msrb.mxu3 %v4113_v1 }
 0x6c2   : > { %3745 = vmatpush.msra.mxu0 %v4064_v18  ;;  %3765 = vmatpush.msrb.mxu1 %v4080_v6 }
 0x6c3   : > { %3785 = vmatpush.msrb.mxu2 %v4096_v0  ;;  %3805 = vmatpush.msrb.mxu3 %v4112_v8 }
 0x6c4   : > { %3746 = vmatpush.msra.mxu0 %v4063_v23  ;;  %3766 = vmatpush.msrb.mxu1 %v4079_v47 }
 0x6c5   : > { %3786 = vmatpush.msrb.mxu2 %v4095_v41  ;;  %3806 = vmatpush.msrb.mxu3 %v4111_v48 }
 0x6c6   : > { %3747 = vmatpush.msra.mxu0 %v4062_v25  ;;  %3767 = vmatpush.msrb.mxu1 %v4078_v4 }
 0x6c7   : > { %3787 = vmatpush.msrb.mxu2 %v4094_v7  ;;  %3807 = vmatpush.msrb.mxu3 %v4110_v54 }
 0x6c8   : > { %3748 = vmatpush.msra.mxu0 %v4061_v16  ;;  %3768 = vmatpush.msrb.mxu1 %v4077_v33 }
 0x6c9   : > { %3788 = vmatpush.msrb.mxu2 %v4093_v17  ;;  %3808 = vmatpush.msrb.mxu3 %v4109_v44 }
 0x6ca   : > { %3749 = vmatpush.msra.mxu0 %v4060_v57  ;;  %3769 = vmatpush.msrb.mxu1 %v4076_v21 }
 0x6cb   : > { %3789 = vmatpush.msrb.mxu2 %v4092_v13  ;;  %3809 = vmatpush.msrb.mxu3 %v4108_v63 }
 0x6cc   : > { %3750 = vmatpush.msra.mxu0 %v4059_v2  ;;  %3770 = vmatpush.msrb.mxu1 %v4075_v39 }
 0x6cd   : > { %3790 = vmatpush.msrb.mxu2 %v4091_v19  ;;  %3810 = vmatpush.msrb.mxu3 %v4107_v62 }
 0x6ce   : > { %3751 = vmatpush.msra.mxu0 %v4058_v31  ;;  %3771 = vmatpush.msrb.mxu1 %v4074_v34 }
 0x6cf   : > { %3791 = vmatpush.msrb.mxu2 %v4090_v38  ;;  %3811 = vmatpush.msrb.mxu3 %v4106_v40 }
 0x6d0   : > { %3752 = vmatpush.msra.mxu0 %v4057_v59  ;;  %3772 = vmatpush.msrb.mxu1 %v4073_v10 }
 0x6d1   : > { %3792 = vmatpush.msrb.mxu2 %v4089_v46  ;;  %3812 = vmatpush.msrb.mxu3 %v4105_v61 }
 0x6d2   : > { %3753 = vmatpush.msra.mxu0 %v4056_v12  ;;  %3773 = vmatpush.msrb.mxu1 %v4072_v49 }
 0x6d3   : > { %3793 = vmatpush.msrb.mxu2 %v4088_v11  ;;  %3813 = vmatpush.msrb.mxu3 %v4104_v20 }
 0x6d4   : > { %4120 = vmatmul.msk.f32.vlgmr.msra.gmra.mxu0 %vm588_vm4, %v3228_v42  ;;  %4121 = vmatmul.msk.f32.vlgmr.msrb.gmra.mxu1 %vm588_vm4, %v3229_v53 }
 0x6d5   : > { %4122 = vmatmul.msk.f32.vlgmr.msrb.gmra.mxu2 %vm588_vm4, %v3230_v14  ;;  %4123 = vmatmul.msk.f32.vlgmr.msrb.gmra.mxu3 %vm588_vm4, %v3231_v50  ;;  %vm8393_vm4 = vmmov %vm8392_vm15 }
 0x709   : > { %v3385_v36 = vpop.f32.mrf.mxu0 }
 0x70b   : > { %v3405_v45 = vpop.f32.mrf.mxu1 }
 0x70c   : > { %v3406_v30 = vadd.f32 %v3405_v45, %v3385_v36 }
 0x713   : > { %v3425_v15 = vpop.f32.mrf.mxu2  ;;  %v3465_v28 = vpop.f32.mrf.mxu0 }
 0x714   : > { %v3426_v24 = vadd.f32 %v3425_v15, %v3406_v30 }
 0x715   : > { %v3445_v52 = vpop.f32.mrf.mxu3  ;;  %v3485_v32 = vpop.f32.mrf.mxu1 }
 0x716   : > { %v3446_v51 = vadd.f32 %v3445_v52, %v3426_v24 }
 0x718   : > { %v3466_v27 = vadd.f32 %v3465_v28, %v3446_v51 }
 0x71a   : > { %v3486_v22 = vadd.f32 %v3485_v32, %v3466_v27 }
 0x71b   : > { %v3505_v35 = vpop.f32.mrf.mxu2 }
 0x71c   : > { %v3506_v43 = vadd.f32 %v3505_v35, %v3486_v22 }
 0x71d   : > { %v3525_v26 = vpop.f32.mrf.mxu3 }
 0x71e   : > { %v3526_v55 = vadd.f32 %v3525_v26, %v3506_v43 }
 0x720   : > { %4154 = vtanh.f32 %v3526_v55 }
 0x726   : > { %v4155_v37 = vpop.eup %4154 }
 0x727   : > { %3819 = vst.msk [vmem:[%s278_s28] sm:$0xff] %vm8392_vm15, %v4155_v37 }
 0x72f   : > { %v3675_v3 = vpop.f32.mrf.mxu0  ;;  %v3695_v56 = vpop.f32.mrf.mxu1 }
 0x730   : > { %v3696_v58 = vadd.f32 %v3695_v56, %v3675_v3 }
 0x736   : > { %v3715_v5 = vpop.f32.mrf.mxu2  ;;  %v3735_v9 = vpop.f32.mrf.mxu3 }
 0x737   : > { %v3716_v60 = vadd.f32 %v3715_v5, %v3696_v58 }
 0x739   : > { %v3736_v29 = vadd.f32 %v3735_v9, %v3716_v60 }
 0x751   : > { %v3755_v1 = vpop.f32.mrf.mxu0  ;;  %v3775_v6 = vpop.f32.mrf.mxu1 }
 0x752   : > { %v3756_v18 = vadd.f32 %v3755_v1, %v3736_v29 }
 0x754   : > { %v3776_v0 = vadd.f32 %v3775_v6, %v3756_v18 }
 0x758   : > { %v3795_v8 = vpop.f32.mrf.mxu2  ;;  %v3815_v47 = vpop.f32.mrf.mxu3 }
 0x759   : > { %v3796_v23 = vadd.f32 %v3795_v8, %v3776_v0 }
 0x75b   : > { %v3816_v41 = vadd.f32 %v3815_v47, %v3796_v23 }
 0x75d   : > { %4156 = vtanh.f32 %v3816_v41 }
 0x763   : > { %v4157_v48 = vpop.eup %4156 }
 0x764   : > { %4124 = vst.msk [vmem:[%s278_s28 + $0x8] sm:$0xff] %vm8393_vm4, %v4157_v48 }
 0x765 PF: > { %s17_s24 = sadd.s32 1, %s4164_s24  }
 0x766   : > { %p14_p4 = scmp.ge.s32.totalorder %s17_s24, 4  }
 0x768   :  { %16 = sbr.rel (!%p14_p4) target bundleno = 1 (0x1), region = 80 }

</bundles_post_ra>
